<compile_context>
chip_gen: v7x
topology: tpu7x:2x2x1
jax: 0.10.0
libtpu: 0.0.40
codegen_flags: <defaults>
</compile_context>

<pallas_src>
import functools

import jax
import jax.numpy as jnp
from jax.experimental import pallas as pl
from jax.experimental.pallas import tpu as pltpu

LANE = 128  # TPU lane width; every feature/gate dimension is padded to this.


# --------------------------------- Pallas kernels ---------------------------------

def _gnn_kernel(*refs, n_layers, eps):
    """GIN-style GNN encoder for ONE month (one grid step). All dots bf16 on the MXU."""
    x_ref, adj_ref, s_ref = refs[0], refs[1], refs[2]
    i = 3
    layers = []
    for _ in range(n_layers):
        layers.append((refs[i], refs[i + 1], refs[i + 2]))      # we_aug, w, b
        i += 3
    w_out_ref, b_out_ref = refs[i], refs[i + 1]
    emb_ref = refs[i + 2]

    x = x_ref[0]          # [N, 128]  bf16 (zero-padded node features)
    adj = adj_ref[0]      # [N, N]    bf16 (dense dst<-src adjacency counts)
    s_aug = s_ref[0]      # [N, 128]  bf16 (= segment_sum([edge_attr | 1], dst), padded)

    h = x
    for we_ref, w_ref, b_ref in layers:
        edge_agg = jnp.dot(s_aug, we_ref[...], preferred_element_type=jnp.float32)
        agg = ((1.0 + eps) * h.astype(jnp.float32)
               + jnp.dot(adj, h, preferred_element_type=jnp.float32)
               + edge_agg)
        h = jnp.maximum(
            jnp.dot(agg.astype(jnp.bfloat16), w_ref[...],
                    preferred_element_type=jnp.float32) + b_ref[...], 0.0)
        h = h.astype(jnp.bfloat16)
    emb = jnp.dot(h, w_out_ref[...], preferred_element_type=jnp.float32) + b_out_ref[...]
    emb_ref[0] = emb.astype(jnp.bfloat16)


def _gru_decoder_kernel(*refs, n_layers):
    """Multi-layer GRU over the month grid (sequential) + decoder on the last month.

    Gate weights are packed with a 128-lane stride per gate, so every gate slice
    gx[:, g*128:(g+1)*128] is a whole, lane-aligned tile (no masked VPU work).
    """
    emb_ref, h_init_ref = refs[0], refs[1]
    i = 2
    layers = []
    for _ in range(n_layers):
        layers.append((refs[i], refs[i + 1], refs[i + 2], refs[i + 3]))  # wx, wh, bx, bh
        i += 4
    w_dec_ref, b_dec_ref = refs[i], refs[i + 1]
    i += 2
    scores_ref, h0_ref = refs[i], refs[i + 1]
    i += 2
    h_scr = list(refs[i:i + n_layers])                                   # VMEM hiddens

    m = pl.program_id(0)
    last = pl.num_programs(0) - 1
    G = LANE  # gate stride (padded hidden width)

    @pl.when(m == 0)
    def _():
        for layer_idx, hs in enumerate(h_scr):
            hs[...] = h_init_ref[layer_idx]

    inp = emb_ref[0]                                      # [N, 128] bf16
    for (wx_ref, wh_ref, bx_ref, bh_ref), hs in zip(layers, h_scr):
        h_prev = hs[...]                                  # [N, 128] f32
        gx = jnp.dot(inp, wx_ref[...], preferred_element_type=jnp.float32) + bx_ref[...]
        gh = jnp.dot(h_prev.astype(jnp.bfloat16), wh_ref[...],
                     preferred_element_type=jnp.float32) + bh_ref[...]
        r = jax.nn.sigmoid(gx[:, 0:G] + gh[:, 0:G])
        z = jax.nn.sigmoid(gx[:, G:2 * G] + gh[:, G:2 * G])
        n = jnp.tanh(gx[:, 2 * G:3 * G] + r * gh[:, 2 * G:3 * G])
        h_new = (1.0 - z) * n + z * h_prev
        hs[...] = h_new
        inp = h_new.astype(jnp.bfloat16)

    # Layer-0 hidden after the FIRST month (mirrors `if i == 0: h0 = [get_hidden(...)]`).
    @pl.when(m == 0)
    def _():
        h0_ref[...] = h_scr[0][...]

    # Decoder on the last month's last-layer hidden (lane-dense 128-wide padded output).
    @pl.when(m == last)
    def _():
        scores_ref[...] = (jnp.dot(h_scr[-1][...].astype(jnp.bfloat16), w_dec_ref[...],
                                   preferred_element_type=jnp.float32) + b_dec_ref[...])


# ------------------------------ spec / padding helpers -----------------------------

def _pad_last(a, target):
    pad = target - a.shape[-1]
    if pad <= 0:
        return a
    widths = [(0, 0)] * (a.ndim - 1) + [(0, pad)]
    return jnp.pad(a, widths)


def _month_spec(a):
    nd = a.ndim
    return pl.BlockSpec((1,) + tuple(a.shape[1:]),
                        lambda m, _z=nd - 1: (m,) + (0,) * _z)


def _const_spec(a, single_buffered):
    nd = a.ndim
    idx = lambda m, _z=nd: (0,) * _z
    if single_buffered:
        # Weights never change across the month grid -> no point double-buffering them.
        return pl.BlockSpec(tuple(a.shape), idx, pipeline_mode=pl.Buffered(1))
    return pl.BlockSpec(tuple(a.shape), idx)


def _vmem_limit_bytes(*arrays):
    footprint = sum(int(a.size) * jnp.dtype(a.dtype).itemsize for a in arrays)
    # double-buffered month blocks + compiler scratch headroom, capped for v7x (64 MiB).
    return int(min(64 * 2 ** 20, max(32 * 2 ** 20, 4 * footprint)))


# ------------------------------ fused forward (jitted) -----------------------------

def prepare_inputs(x_raw, ei_stack, ea_stack, n_nodes):
    """Graph prep (runs under the same jit as the kernels)."""
    def one_month(ei, ea):
        src, dst = ei[0], ei[1]
        adj = jnp.zeros((n_nodes, n_nodes), jnp.float32).at[dst, src].add(1.0)
        ea_aug = jnp.concatenate([ea, jnp.ones((ea.shape[0], 1), ea.dtype)], axis=1)
        s_aug = jax.ops.segment_sum(ea_aug, dst, num_segments=n_nodes)
        return adj, s_aug

    adj, s_aug = jax.vmap(one_month)(ei_stack, ea_stack)
    x_pad = _pad_last(x_raw, LANE).astype(jnp.bfloat16)
    s_pad = _pad_last(s_aug, LANE).astype(jnp.bfloat16)
    # TODO(synk): at production N, keep adj in HBM (memory_space=pl.ANY) and row-tile it
    # via manual make_async_copy instead of a dense [N,N] month block (v7x 64 MiB VMEM).
    return x_pad, adj.astype(jnp.bfloat16), s_pad


def _gnn_encode(gnn_params, x_pad, adj, s_pad, eps, single_buffered):
    n_months, n_nodes, _ = x_pad.shape
    n_layers = len(gnn_params["layers"])
    weights = []
    for lp in gnn_params["layers"]:
        weights += [lp["we"], lp["w"], lp["b"]]
    weights += [gnn_params["w_out"], gnn_params["b_out"]]

    kernel = functools.partial(_gnn_kernel, n_layers=n_layers, eps=float(eps))
    return pl.pallas_call(
        kernel,
        out_shape=jax.ShapeDtypeStruct((n_months, n_nodes, LANE), jnp.bfloat16),
        grid_spec=pltpu.PrefetchScalarGridSpec(
            num_scalar_prefetch=0,
            grid=(n_months,),
            in_specs=[_month_spec(x_pad), _month_spec(adj), _month_spec(s_pad)]
                     + [_const_spec(w, single_buffered) for w in weights],
            out_specs=pl.BlockSpec((1, n_nodes, LANE), lambda m: (m, 0, 0))),
        compiler_params=pltpu.CompilerParams(
            dimension_semantics=("parallel",),   # month-independent -> both TCs on v7x
            vmem_limit_bytes=_vmem_limit_bytes(x_pad, adj, s_pad, *weights)),
    )(x_pad, adj, s_pad, *weights)


def _gru_decode(rnn_params, dec_params, emb, h_init, single_buffered):
    n_months, n_nodes, _ = emb.shape
    n_layers = len(rnn_params["layers"])
    weights = []
    for lp in rnn_params["layers"]:
        weights += [lp["wx"], lp["wh"], lp["bx"], lp["bh"]]
    weights += [dec_params["w"], dec_params["b"]]

    kernel = functools.partial(_gru_decoder_kernel, n_layers=n_layers)
    return pl.pallas_call(
        kernel,
        out_shape=(jax.ShapeDtypeStruct((n_nodes, LANE), jnp.float32),   # padded scores
                   jax.ShapeDtypeStruct((n_nodes, LANE), jnp.float32)),  # padded h0 (L0)
        grid_spec=pltpu.PrefetchScalarGridSpec(
            num_scalar_prefetch=0,
            grid=(n_months,),
            in_specs=[_month_spec(emb), _const_spec(h_init, single_buffered)]
                     + [_const_spec(w, single_buffered) for w in weights],
            out_specs=[pl.BlockSpec((n_nodes, LANE), lambda m: (0, 0)),
                       pl.BlockSpec((n_nodes, LANE), lambda m: (0, 0))],
            scratch_shapes=[pltpu.VMEM((n_nodes, LANE), jnp.float32)
                            for _ in range(n_layers)]),
        compiler_params=pltpu.CompilerParams(
            dimension_semantics=("arbitrary",),  # GRU carries state across months
            vmem_limit_bytes=_vmem_limit_bytes(emb, h_init, *weights)),
    )(emb, h_init, *weights)


def rnn_gnn_forward(params, x_raw, ei_stack, ea_stack, h_init, *,
                    eps, hidden_dim, single_buffered_weights=True):
    n_months, n_nodes, _ = x_raw.shape
    x_pad, adj_bf, s_pad = prepare_inputs(x_raw, ei_stack, ea_stack, n_nodes)
    emb = _gnn_encode(params["gnn"], x_pad, adj_bf, s_pad, eps, single_buffered_weights)
    scores_pad, h0_pad = _gru_decode(params["rnn"], params["dec"], emb, h_init,
                                     single_buffered_weights)
    return scores_pad[:, 0:1], h0_pad[:, :hidden_dim]


# --------------------------- parameter construction (padded) ------------------------

def init_params(key, *, n_nodes, gnn_input_dim, gnn_embedding_dim, gnn_output_dim,
                gnn_layers, edge_dim, eps, rnn_input_dim, rnn_hidden_dim, rnn_layers):
    keys = iter(jax.random.split(key, 256))

    def lin(d_in, d_out, scale=0.1):
        kw, kb = jax.random.split(next(keys))
        w = scale * jax.random.normal(kw, (d_in, d_out), jnp.float32)
        b = scale * jax.random.normal(kb, (1, d_out), jnp.float32)
        return w, b

    def pad2(a, rows, cols):
        return jnp.pad(a, ((0, rows - a.shape[0]), (0, cols - a.shape[1])))

    def pack_gates(mats, rows):
        # [r | z | n] with a 128-lane stride per gate -> lane-aligned gate slices.
        return jnp.concatenate([pad2(m, rows, LANE) for m in mats], axis=1)

    gnn = {"layers": []}
    d_in = gnn_input_dim
    for _ in range(gnn_layers):
        we, be = lin(edge_dim, d_in)
        we_aug = jnp.concatenate([we, be], axis=0)                    # (edge_dim+1, d_in)
        w, b = lin(d_in, gnn_embedding_dim)
        gnn["layers"].append({
            "we": pad2(we_aug, LANE, LANE).astype(jnp.bfloat16),
            "w": pad2(w, LANE, LANE).astype(jnp.bfloat16),
            "b": pad2(b, 1, LANE),                                    # f32
        })
        d_in = gnn_embedding_dim
    w_out, b_out = lin(gnn_embedding_dim, gnn_output_dim)
    gnn["w_out"] = pad2(w_out, LANE, LANE).astype(jnp.bfloat16)
    gnn["b_out"] = pad2(b_out, 1, LANE)

    rnn = {"layers": []}
    d_in = rnn_input_dim
    H = rnn_hidden_dim
    for _ in range(rnn_layers):
        wxr, bxr = lin(d_in, H); wxz, bxz = lin(d_in, H); wxn, bxn = lin(d_in, H)
        whr, bhr = lin(H, H);    whz, bhz = lin(H, H);    whn, bhn = lin(H, H)
        rnn["layers"].append({
            "wx": pack_gates([wxr, wxz, wxn], LANE).astype(jnp.bfloat16),  # (128, 384)
            "wh": pack_gates([whr, whz, whn], LANE).astype(jnp.bfloat16),  # (128, 384)
            "bx": pack_gates([bxr, bxz, bxn], 1),                          # (1, 384) f32
            "bh": pack_gates([bhr, bhz, bhn], 1),                          # (1, 384) f32
        })
        d_in = H

    wd, bd = lin(rnn_hidden_dim, 1)
    dec = {"w": pad2(wd, LANE, LANE).astype(jnp.bfloat16),                 # col 0 real
           "b": pad2(bd, 1, LANE)}

    params = {"gnn": gnn, "rnn": rnn, "dec": dec}
    meta = {"eps": float(eps), "n_nodes": int(n_nodes),
            "hidden_dim": int(rnn_hidden_dim), "rnn_layers": int(rnn_layers)}
    return params, meta


# ---------------------------------------- model -------------------------------------

class RNNGNNPallas:
    def __init__(self, params, meta, upsample=0):
        self.params = params
        self.meta = meta
        self.upsample = upsample
        base = functools.partial(rnn_gnn_forward, eps=meta["eps"],
                                 hidden_dim=meta["hidden_dim"])
        self._fwd_primary = jax.jit(functools.partial(base, single_buffered_weights=True))
        self._fwd_fallback = jax.jit(functools.partial(base, single_buffered_weights=False))
        self._use_fallback = False

    def _run(self, fn, x_raw, ei, ea, h_init):
        scores, h0_l0 = fn(self.params, x_raw, ei, ea, h_init)
        jax.block_until_ready(scores)
        return scores, h0_l0

    def forward(self, month_list, data_dict, h0=None, train=True):
        n_nodes = self.meta["n_nodes"]
        n_rnn = self.meta["rnn_layers"]

        x_raw = jnp.stack([jnp.asarray(data_dict[m]["x"], jnp.float32) for m in month_list])
        ei = jnp.stack([jnp.asarray(data_dict[m]["edge_index"], jnp.int32) for m in month_list])
        ea = jnp.stack([jnp.asarray(data_dict[m]["edge_attr"], jnp.float32) for m in month_list])
        labs = jnp.asarray(data_dict[month_list[-1]]["y"])

        if h0 is None:
            h_init = jnp.zeros((n_rnn, n_nodes, LANE), jnp.float32)
        else:
            hs = [_pad_last(jnp.asarray(h, jnp.float32), LANE) for h in h0]
            hs = hs + [jnp.zeros((n_nodes, LANE), jnp.float32)] * max(0, n_rnn - len(hs))
            h_init = jnp.stack(hs[:n_rnn])

        scores = h0_l0 = None
        if not self._use_fallback:
            try:
                scores, h0_l0 = self._run(self._fwd_primary, x_raw, ei, ea, h_init)
            except Exception:
                # pipeline_mode=pl.Buffered(1) unsupported on this jax build -> retry.
                self._use_fallback = True
        if self._use_fallback:
            scores, h0_l0 = self._run(self._fwd_fallback, x_raw, ei, ea, h_init)

        h0_out = [jax.lax.stop_gradient(h0_l0)]       # mirrors get_hidden(...).detach()
        # TODO(synk): upsample_embeddings() is undefined in the source; only the
        # upsample==0 path is implemented.
        synth_index = []
        return scores, labs, h0_out, synth_index


# ----------------------------- pure-JAX reference (same math) -----------------------

def _reference_forward(params, meta, x_pad, adj, s_pad):
    eps = meta["eps"]; H = meta["hidden_dim"]; G = LANE
    f32, bf = jnp.float32, jnp.bfloat16
    n_months, n_nodes, _ = x_pad.shape
    n_rnn = len(params["rnn"]["layers"])
    hs = [jnp.zeros((n_nodes, LANE), f32) for _ in range(n_rnn)]
    h0 = None
    for m in range(n_months):
        h = x_pad[m]
        for lp in params["gnn"]["layers"]:
            edge = jnp.dot(s_pad[m], lp["we"], preferred_element_type=f32)
            agg = ((1.0 + eps) * h.astype(f32)
                   + jnp.dot(adj[m], h, preferred_element_type=f32) + edge)
            h = jnp.maximum(jnp.dot(agg.astype(bf), lp["w"], preferred_element_type=f32)
                            + lp["b"], 0.0).astype(bf)
        emb = (jnp.dot(h, params["gnn"]["w_out"], preferred_element_type=f32)
               + params["gnn"]["b_out"]).astype(bf)
        inp = emb
        new_hs = []
        for lp, hp in zip(params["rnn"]["layers"], hs):
            gx = jnp.dot(inp, lp["wx"], preferred_element_type=f32) + lp["bx"]
            gh = jnp.dot(hp.astype(bf), lp["wh"], preferred_element_type=f32) + lp["bh"]
            r = jax.nn.sigmoid(gx[:, :G] + gh[:, :G])
            z = jax.nn.sigmoid(gx[:, G:2 * G] + gh[:, G:2 * G])
            n = jnp.tanh(gx[:, 2 * G:] + r * gh[:, 2 * G:])
            hn = (1.0 - z) * n + z * hp
            new_hs.append(hn)
            inp = hn.astype(bf)
        hs = new_hs
        if m == 0:
            h0 = hs[0]
    scores = (jnp.dot(hs[-1].astype(bf), params["dec"]["w"], preferred_element_type=f32)
              + params["dec"]["b"])
    return scores[:, 0:1], h0[:, :H]


# ---------------------------------------- main --------------------------------------

if __name__ == "__main__":
    N_NODES = 16
    GNN_INPUT_DIM = 8
    GNN_EMBEDDING_DIM = 32
    GNN_OUTPUT_DIM = 32      # == RNN_INPUT_DIM (GNN embedding feeds the RNN)
    RNN_INPUT_DIM = 32
    RNN_HIDDEN_DIM = 32
    RNN_LAYERS = 2
    GNN_LAYERS = 2
    EDGE_DIM = 4
    N_EDGES = 40
    MONTHS = ["m0", "m1", "m2"]

    key = jax.random.PRNGKey(0)
    k_params, k_data = jax.random.split(key)

    params, meta = init_params(
        k_params,
        n_nodes=N_NODES, gnn_input_dim=GNN_INPUT_DIM, gnn_embedding_dim=GNN_EMBEDDING_DIM,
        gnn_output_dim=GNN_OUTPUT_DIM, gnn_layers=GNN_LAYERS, edge_dim=EDGE_DIM, eps=0.0,
        rnn_input_dim=RNN_INPUT_DIM, rnn_hidden_dim=RNN_HIDDEN_DIM, rnn_layers=RNN_LAYERS)

    data_dict = {}
    dk = k_data
    for m in MONTHS:
        dk, kx, ke, ka, ky = jax.random.split(dk, 5)
        x = jax.random.normal(kx, (N_NODES, GNN_INPUT_DIM), jnp.float32)
        edge_index = jax.random.randint(ke, (2, N_EDGES), 0, N_NODES, dtype=jnp.int32)
        edge_attr = jax.random.normal(ka, (N_EDGES, EDGE_DIM), jnp.float32)
        y = jax.random.randint(ky, (N_NODES,), 0, 2, dtype=jnp.int32).astype(jnp.float32)
        data_dict[m] = {"x": x, "edge_index": edge_index, "edge_attr": edge_attr, "y": y}

    model = RNNGNNPallas(params, meta, upsample=0)
    scores, labs, h0, synth_index = model.forward(MONTHS, data_dict, h0=None, train=True)

    jax.block_until_ready(scores)
    jax.block_until_ready(labs)
    jax.block_until_ready(h0[0])

    assert scores.shape == (N_NODES, 1)
    assert labs.shape == (N_NODES,)
    assert h0[0].shape == (N_NODES, RNN_HIDDEN_DIM)

    # Numerical check against a pure-JAX reference of the same (bf16-matmul) math.
    x_raw = jnp.stack([data_dict[m]["x"] for m in MONTHS]).astype(jnp.float32)
    ei = jnp.stack([data_dict[m]["edge_index"] for m in MONTHS]).astype(jnp.int32)
    ea = jnp.stack([data_dict[m]["edge_attr"] for m in MONTHS]).astype(jnp.float32)
    x_pad, adj_bf, s_pad = prepare_inputs(x_raw, ei, ea, N_NODES)
    ref_scores, ref_h0 = _reference_forward(params, meta, x_pad, adj_bf, s_pad)

    assert float(jnp.max(jnp.abs(scores - ref_scores))) < 2e-2
    assert float(jnp.max(jnp.abs(h0[0] - ref_h0))) < 2e-2

    print("KERNEL_OK")
</pallas_src>

<mosaic_0001>
module attributes {stable_mosaic.version = 11 : i64} {
  func.func @_gnn_kernel(%arg0: i32, %arg1: memref<1x16x128xbf16, #tpu.memory_space<vmem>>, %arg2: memref<1x16x16xbf16, #tpu.memory_space<vmem>>, %arg3: memref<1x16x128xbf16, #tpu.memory_space<vmem>>, %arg4: memref<128x128xbf16, #tpu.memory_space<vmem>>, %arg5: memref<128x128xbf16, #tpu.memory_space<vmem>>, %arg6: memref<1x128xf32, #tpu.memory_space<vmem>>, %arg7: memref<128x128xbf16, #tpu.memory_space<vmem>>, %arg8: memref<128x128xbf16, #tpu.memory_space<vmem>>, %arg9: memref<1x128xf32, #tpu.memory_space<vmem>>, %arg10: memref<128x128xbf16, #tpu.memory_space<vmem>>, %arg11: memref<1x128xf32, #tpu.memory_space<vmem>>, %arg12: memref<1x16x128xbf16, #tpu.memory_space<vmem>>) attributes {dimension_semantics = [#tpu.dimension_semantics<parallel>], iteration_bounds = array<i64: 3>, scalar_prefetch = 0 : i64, scratch_operands = 0 : i64, tpu.core_type = #tpu.core_type<tc>, window_params = [{transform_indices = @transform_0, window_bounds = array<i64: 1, 16, 128>}, {transform_indices = @transform_1, window_bounds = array<i64: 1, 16, 16>}, {transform_indices = @transform_2, window_bounds = array<i64: 1, 16, 128>}, {pipeline_mode = #tpu.pipeline_mode<synchronous>, transform_indices = @transform_3, window_bounds = array<i64: 128, 128>}, {pipeline_mode = #tpu.pipeline_mode<synchronous>, transform_indices = @transform_4, window_bounds = array<i64: 128, 128>}, {pipeline_mode = #tpu.pipeline_mode<synchronous>, transform_indices = @transform_5, window_bounds = array<i64: 1, 128>}, {pipeline_mode = #tpu.pipeline_mode<synchronous>, transform_indices = @transform_6, window_bounds = array<i64: 128, 128>}, {pipeline_mode = #tpu.pipeline_mode<synchronous>, transform_indices = @transform_7, window_bounds = array<i64: 128, 128>}, {pipeline_mode = #tpu.pipeline_mode<synchronous>, transform_indices = @transform_8, window_bounds = array<i64: 1, 128>}, {pipeline_mode = #tpu.pipeline_mode<synchronous>, transform_indices = @transform_9, window_bounds = array<i64: 128, 128>}, {pipeline_mode = #tpu.pipeline_mode<synchronous>, transform_indices = @transform_10, window_bounds = array<i64: 1, 128>}, {transform_indices = @transform_11, window_bounds = array<i64: 1, 16, 128>}]} {
    %c0 = arith.constant 0 : index
    %c0_0 = arith.constant 0 : index
    %c0_1 = arith.constant 0 : index
    %0 = vector.load %arg1[%c0, %c0_0, %c0_1] : memref<1x16x128xbf16, #tpu.memory_space<vmem>>, vector<1x16x128xbf16>
    %1 = vector.shape_cast %0 : vector<1x16x128xbf16> to vector<16x128xbf16>
    %c0_2 = arith.constant 0 : index
    %c0_3 = arith.constant 0 : index
    %c0_4 = arith.constant 0 : index
    %2 = vector.load %arg2[%c0_2, %c0_3, %c0_4] : memref<1x16x16xbf16, #tpu.memory_space<vmem>>, vector<1x16x16xbf16>
    %3 = vector.shape_cast %2 : vector<1x16x16xbf16> to vector<16x16xbf16>
    %c0_5 = arith.constant 0 : index
    %c0_6 = arith.constant 0 : index
    %c0_7 = arith.constant 0 : index
    %4 = vector.load %arg3[%c0_5, %c0_6, %c0_7] : memref<1x16x128xbf16, #tpu.memory_space<vmem>>, vector<1x16x128xbf16>
    %5 = vector.shape_cast %4 : vector<1x16x128xbf16> to vector<16x128xbf16>
    %c0_8 = arith.constant 0 : index
    %c0_9 = arith.constant 0 : index
    %6 = vector.load %arg4[%c0_8, %c0_9] : memref<128x128xbf16, #tpu.memory_space<vmem>>, vector<128x128xbf16>
    %cst = arith.constant dense<0.000000e+00> : vector<16x128xf32>
    %7 = tpu.matmul %5, %6, %cst {dimension_numbers = #tpu.dot_dimension_numbers<[1], [0], [0], [1], [0, 0, 1, 1], [], []>} : vector<16x128xbf16>, vector<128x128xbf16>, vector<16x128xf32> -> vector<16x128xf32>
    %8 = arith.extf %1 : vector<16x128xbf16> to vector<16x128xf32>
    %cst_10 = arith.constant 1.000000e+00 : f32
    %9 = vector.broadcast %cst_10 : f32 to vector<16x128xf32>
    %10 = arith.mulf %9, %8 : vector<16x128xf32>
    %cst_11 = arith.constant dense<0.000000e+00> : vector<16x128xf32>
    %11 = tpu.matmul %3, %1, %cst_11 {dimension_numbers = #tpu.dot_dimension_numbers<[1], [0], [0], [1], [0, 0, 1, 1], [], []>} : vector<16x16xbf16>, vector<16x128xbf16>, vector<16x128xf32> -> vector<16x128xf32>
    %12 = arith.addf %10, %11 : vector<16x128xf32>
    %13 = arith.addf %12, %7 : vector<16x128xf32>
    %14 = arith.truncf %13 : vector<16x128xf32> to vector<16x128xbf16>
    %c0_12 = arith.constant 0 : index
    %c0_13 = arith.constant 0 : index
    %15 = vector.load %arg5[%c0_12, %c0_13] : memref<128x128xbf16, #tpu.memory_space<vmem>>, vector<128x128xbf16>
    %cst_14 = arith.constant dense<0.000000e+00> : vector<16x128xf32>
    %16 = tpu.matmul %14, %15, %cst_14 {dimension_numbers = #tpu.dot_dimension_numbers<[1], [0], [0], [1], [0, 0, 1, 1], [], []>} : vector<16x128xbf16>, vector<128x128xbf16>, vector<16x128xf32> -> vector<16x128xf32>
    %c0_15 = arith.constant 0 : index
    %c0_16 = arith.constant 0 : index
    %17 = vector.load %arg6[%c0_15, %c0_16] : memref<1x128xf32, #tpu.memory_space<vmem>>, vector<1x128xf32>
    %18 = vector.broadcast %17 : vector<1x128xf32> to vector<16x128xf32>
    %19 = arith.addf %16, %18 : vector<16x128xf32>
    %cst_17 = arith.constant 0.000000e+00 : f32
    %20 = vector.broadcast %cst_17 : f32 to vector<16x128xf32>
    %21 = arith.maximumf %19, %20 : vector<16x128xf32>
    %22 = arith.truncf %21 : vector<16x128xf32> to vector<16x128xbf16>
    %c0_18 = arith.constant 0 : index
    %c0_19 = arith.constant 0 : index
    %23 = vector.load %arg7[%c0_18, %c0_19] : memref<128x128xbf16, #tpu.memory_space<vmem>>, vector<128x128xbf16>
    %cst_20 = arith.constant dense<0.000000e+00> : vector<16x128xf32>
    %24 = tpu.matmul %5, %23, %cst_20 {dimension_numbers = #tpu.dot_dimension_numbers<[1], [0], [0], [1], [0, 0, 1, 1], [], []>} : vector<16x128xbf16>, vector<128x128xbf16>, vector<16x128xf32> -> vector<16x128xf32>
    %25 = arith.extf %22 : vector<16x128xbf16> to vector<16x128xf32>
    %cst_21 = arith.constant 1.000000e+00 : f32
    %26 = vector.broadcast %cst_21 : f32 to vector<16x128xf32>
    %27 = arith.mulf %26, %25 : vector<16x128xf32>
    %cst_22 = arith.constant dense<0.000000e+00> : vector<16x128xf32>
    %28 = tpu.matmul %3, %22, %cst_22 {dimension_numbers = #tpu.dot_dimension_numbers<[1], [0], [0], [1], [0, 0, 1, 1], [], []>} : vector<16x16xbf16>, vector<16x128xbf16>, vector<16x128xf32> -> vector<16x128xf32>
    %29 = arith.addf %27, %28 : vector<16x128xf32>
    %30 = arith.addf %29, %24 : vector<16x128xf32>
    %31 = arith.truncf %30 : vector<16x128xf32> to vector<16x128xbf16>
    %c0_23 = arith.constant 0 : index
    %c0_24 = arith.constant 0 : index
    %32 = vector.load %arg8[%c0_23, %c0_24] : memref<128x128xbf16, #tpu.memory_space<vmem>>, vector<128x128xbf16>
    %cst_25 = arith.constant dense<0.000000e+00> : vector<16x128xf32>
    %33 = tpu.matmul %31, %32, %cst_25 {dimension_numbers = #tpu.dot_dimension_numbers<[1], [0], [0], [1], [0, 0, 1, 1], [], []>} : vector<16x128xbf16>, vector<128x128xbf16>, vector<16x128xf32> -> vector<16x128xf32>
    %c0_26 = arith.constant 0 : index
    %c0_27 = arith.constant 0 : index
    %34 = vector.load %arg9[%c0_26, %c0_27] : memref<1x128xf32, #tpu.memory_space<vmem>>, vector<1x128xf32>
    %35 = vector.broadcast %34 : vector<1x128xf32> to vector<16x128xf32>
    %36 = arith.addf %33, %35 : vector<16x128xf32>
    %cst_28 = arith.constant 0.000000e+00 : f32
    %37 = vector.broadcast %cst_28 : f32 to vector<16x128xf32>
    %38 = arith.maximumf %36, %37 : vector<16x128xf32>
    %39 = arith.truncf %38 : vector<16x128xf32> to vector<16x128xbf16>
    %c0_29 = arith.constant 0 : index
    %c0_30 = arith.constant 0 : index
    %40 = vector.load %arg10[%c0_29, %c0_30] : memref<128x128xbf16, #tpu.memory_space<vmem>>, vector<128x128xbf16>
    %cst_31 = arith.constant dense<0.000000e+00> : vector<16x128xf32>
    %41 = tpu.matmul %39, %40, %cst_31 {dimension_numbers = #tpu.dot_dimension_numbers<[1], [0], [0], [1], [0, 0, 1, 1], [], []>} : vector<16x128xbf16>, vector<128x128xbf16>, vector<16x128xf32> -> vector<16x128xf32>
    %c0_32 = arith.constant 0 : index
    %c0_33 = arith.constant 0 : index
    %42 = vector.load %arg11[%c0_32, %c0_33] : memref<1x128xf32, #tpu.memory_space<vmem>>, vector<1x128xf32>
    %43 = vector.broadcast %42 : vector<1x128xf32> to vector<16x128xf32>
    %44 = arith.addf %41, %43 : vector<16x128xf32>
    %45 = arith.truncf %44 : vector<16x128xf32> to vector<16x128xbf16>
    %c0_34 = arith.constant 0 : index
    %c0_35 = arith.constant 0 : index
    %c0_36 = arith.constant 0 : index
    %46 = vector.load %arg12[%c0_34, %c0_35, %c0_36] : memref<1x16x128xbf16, #tpu.memory_space<vmem>>, vector<1x16x128xbf16>
    %47 = vector.shape_cast %46 : vector<1x16x128xbf16> to vector<16x128xbf16>
    %48 = vector.shape_cast %45 : vector<16x128xbf16> to vector<1x16x128xbf16>
    tpu.vector_store %arg12[%c0_34, %c0_35, %c0_36], %48 {strides = array<i32>} : memref<1x16x128xbf16, #tpu.memory_space<vmem>>, vector<1x16x128xbf16>,
    return
  }
  func.func @transform_0(%arg0: i32) -> (i32, i32, i32) {
    %c0_i32 = arith.constant 0 : i32
    %c0_i32_0 = arith.constant 0 : i32
    %c0_i32_1 = arith.constant 0 : i32
    return %arg0, %c0_i32, %c0_i32_0 : i32, i32, i32
  }
  func.func @transform_1(%arg0: i32) -> (i32, i32, i32) {
    %c0_i32 = arith.constant 0 : i32
    %c0_i32_0 = arith.constant 0 : i32
    %c0_i32_1 = arith.constant 0 : i32
    return %arg0, %c0_i32, %c0_i32_0 : i32, i32, i32
  }
  func.func @transform_2(%arg0: i32) -> (i32, i32, i32) {
    %c0_i32 = arith.constant 0 : i32
    %c0_i32_0 = arith.constant 0 : i32
    %c0_i32_1 = arith.constant 0 : i32
    return %arg0, %c0_i32, %c0_i32_0 : i32, i32, i32
  }
  func.func @transform_3(%arg0: i32) -> (i32, i32) {
    %c0_i32 = arith.constant 0 : i32
    %c0_i32_0 = arith.constant 0 : i32
    %c0_i32_1 = arith.constant 0 : i32
    return %c0_i32, %c0_i32_0 : i32, i32
  }
  func.func @transform_4(%arg0: i32) -> (i32, i32) {
    %c0_i32 = arith.constant 0 : i32
    %c0_i32_0 = arith.constant 0 : i32
    %c0_i32_1 = arith.constant 0 : i32
    return %c0_i32, %c0_i32_0 : i32, i32
  }
  func.func @transform_5(%arg0: i32) -> (i32, i32) {
    %c0_i32 = arith.constant 0 : i32
    %c0_i32_0 = arith.constant 0 : i32
    %c0_i32_1 = arith.constant 0 : i32
    return %c0_i32, %c0_i32_0 : i32, i32
  }
  func.func @transform_6(%arg0: i32) -> (i32, i32) {
    %c0_i32 = arith.constant 0 : i32
    %c0_i32_0 = arith.constant 0 : i32
    %c0_i32_1 = arith.constant 0 : i32
    return %c0_i32, %c0_i32_0 : i32, i32
  }
  func.func @transform_7(%arg0: i32) -> (i32, i32) {
    %c0_i32 = arith.constant 0 : i32
    %c0_i32_0 = arith.constant 0 : i32
    %c0_i32_1 = arith.constant 0 : i32
    return %c0_i32, %c0_i32_0 : i32, i32
  }
  func.func @transform_8(%arg0: i32) -> (i32, i32) {
    %c0_i32 = arith.constant 0 : i32
    %c0_i32_0 = arith.constant 0 : i32
    %c0_i32_1 = arith.constant 0 : i32
    return %c0_i32, %c0_i32_0 : i32, i32
  }
  func.func @transform_9(%arg0: i32) -> (i32, i32) {
    %c0_i32 = arith.constant 0 : i32
    %c0_i32_0 = arith.constant 0 : i32
    %c0_i32_1 = arith.constant 0 : i32
    return %c0_i32, %c0_i32_0 : i32, i32
  }
  func.func @transform_10(%arg0: i32) -> (i32, i32) {
    %c0_i32 = arith.constant 0 : i32
    %c0_i32_0 = arith.constant 0 : i32
    %c0_i32_1 = arith.constant 0 : i32
    return %c0_i32, %c0_i32_0 : i32, i32
  }
  func.func @transform_11(%arg0: i32) -> (i32, i32, i32) {
    %c0_i32 = arith.constant 0 : i32
    %c0_i32_0 = arith.constant 0 : i32
    %c0_i32_1 = arith.constant 0 : i32
    return %arg0, %c0_i32, %c0_i32_0 : i32, i32, i32
  }
}

module attributes {stable_mosaic.version = 11 : i64} {
  func.func @_gru_decoder_kernel(%arg0: i32, %arg1: memref<1x16x128xbf16, #tpu.memory_space<vmem>>, %arg2: memref<2x16x128xf32, #tpu.memory_space<vmem>>, %arg3: memref<128x384xbf16, #tpu.memory_space<vmem>>, %arg4: memref<128x384xbf16, #tpu.memory_space<vmem>>, %arg5: memref<1x384xf32, #tpu.memory_space<vmem>>, %arg6: memref<1x384xf32, #tpu.memory_space<vmem>>, %arg7: memref<128x384xbf16, #tpu.memory_space<vmem>>, %arg8: memref<128x384xbf16, #tpu.memory_space<vmem>>, %arg9: memref<1x384xf32, #tpu.memory_space<vmem>>, %arg10: memref<1x384xf32, #tpu.memory_space<vmem>>, %arg11: memref<128x128xbf16, #tpu.memory_space<vmem>>, %arg12: memref<1x128xf32, #tpu.memory_space<vmem>>, %arg13: memref<16x128xf32, #tpu.memory_space<vmem>>, %arg14: memref<16x128xf32, #tpu.memory_space<vmem>>, %arg15: memref<16x128xf32, #tpu.memory_space<vmem>>, %arg16: memref<16x128xf32, #tpu.memory_space<vmem>>) attributes {dimension_semantics = [#tpu.dimension_semantics<arbitrary>], iteration_bounds = array<i64: 3>, scalar_prefetch = 0 : i64, scratch_operands = 2 : i64, tpu.core_type = #tpu.core_type<tc>, window_params = [{transform_indices = @transform_0, window_bounds = array<i64: 1, 16, 128>}, {pipeline_mode = #tpu.pipeline_mode<synchronous>, transform_indices = @transform_1, window_bounds = array<i64: 2, 16, 128>}, {pipeline_mode = #tpu.pipeline_mode<synchronous>, transform_indices = @transform_2, window_bounds = array<i64: 128, 384>}, {pipeline_mode = #tpu.pipeline_mode<synchronous>, transform_indices = @transform_3, window_bounds = array<i64: 128, 384>}, {pipeline_mode = #tpu.pipeline_mode<synchronous>, transform_indices = @transform_4, window_bounds = array<i64: 1, 384>}, {pipeline_mode = #tpu.pipeline_mode<synchronous>, transform_indices = @transform_5, window_bounds = array<i64: 1, 384>}, {pipeline_mode = #tpu.pipeline_mode<synchronous>, transform_indices = @transform_6, window_bounds = array<i64: 128, 384>}, {pipeline_mode = #tpu.pipeline_mode<synchronous>, transform_indices = @transform_7, window_bounds = array<i64: 128, 384>}, {pipeline_mode = #tpu.pipeline_mode<synchronous>, transform_indices = @transform_8, window_bounds = array<i64: 1, 384>}, {pipeline_mode = #tpu.pipeline_mode<synchronous>, transform_indices = @transform_9, window_bounds = array<i64: 1, 384>}, {pipeline_mode = #tpu.pipeline_mode<synchronous>, transform_indices = @transform_10, window_bounds = array<i64: 128, 128>}, {pipeline_mode = #tpu.pipeline_mode<synchronous>, transform_indices = @transform_11, window_bounds = array<i64: 1, 128>}, {pipeline_mode = #tpu.pipeline_mode<synchronous>, transform_indices = @transform_12, window_bounds = array<i64: 16, 128>}, {pipeline_mode = #tpu.pipeline_mode<synchronous>, transform_indices = @transform_13, window_bounds = array<i64: 16, 128>}]} {
    %c0_i32 = arith.constant 0 : i32
    %0 = arith.cmpi eq, %arg0, %c0_i32 : i32
    %1 = arith.extui %0 : i1 to i32
    %c0_i32_0 = arith.constant 0 : i32
    %2 = arith.cmpi ne, %1, %c0_i32_0 : i32
    scf.if %2 {
      %c0_39 = arith.constant 0 : index
      %c0_40 = arith.constant 0 : index
      %c0_41 = arith.constant 0 : index
      %90 = vector.load %arg2[%c0_39, %c0_40, %c0_41] : memref<2x16x128xf32, #tpu.memory_space<vmem>>, vector<1x16x128xf32>
      %91 = vector.shape_cast %90 : vector<1x16x128xf32> to vector<16x128xf32>
      %c0_42 = arith.constant 0 : index
      %c0_43 = arith.constant 0 : index
      %92 = vector.load %arg15[%c0_42, %c0_43] : memref<16x128xf32, #tpu.memory_space<vmem>>, vector<16x128xf32>
      tpu.vector_store %arg15[%c0_42, %c0_43], %91 {strides = array<i32>} : memref<16x128xf32, #tpu.memory_space<vmem>>, vector<16x128xf32>,
      %c1 = arith.constant 1 : index
      %c0_44 = arith.constant 0 : index
      %c0_45 = arith.constant 0 : index
      %93 = vector.load %arg2[%c1, %c0_44, %c0_45] : memref<2x16x128xf32, #tpu.memory_space<vmem>>, vector<1x16x128xf32>
      %94 = vector.shape_cast %93 : vector<1x16x128xf32> to vector<16x128xf32>
      %c0_46 = arith.constant 0 : index
      %c0_47 = arith.constant 0 : index
      %95 = vector.load %arg16[%c0_46, %c0_47] : memref<16x128xf32, #tpu.memory_space<vmem>>, vector<16x128xf32>
      tpu.vector_store %arg16[%c0_46, %c0_47], %94 {strides = array<i32>} : memref<16x128xf32, #tpu.memory_space<vmem>>, vector<16x128xf32>,
    } else {
    }
    %c0 = arith.constant 0 : index
    %c0_1 = arith.constant 0 : index
    %c0_2 = arith.constant 0 : index
    %3 = vector.load %arg1[%c0, %c0_1, %c0_2] : memref<1x16x128xbf16, #tpu.memory_space<vmem>>, vector<1x16x128xbf16>
    %4 = vector.shape_cast %3 : vector<1x16x128xbf16> to vector<16x128xbf16>
    %c0_3 = arith.constant 0 : index
    %c0_4 = arith.constant 0 : index
    %5 = vector.load %arg15[%c0_3, %c0_4] : memref<16x128xf32, #tpu.memory_space<vmem>>, vector<16x128xf32>
    %c0_5 = arith.constant 0 : index
    %c0_6 = arith.constant 0 : index
    %6 = vector.load %arg3[%c0_5, %c0_6] : memref<128x384xbf16, #tpu.memory_space<vmem>>, vector<128x384xbf16>
    %cst = arith.constant dense<0.000000e+00> : vector<16x384xf32>
    %7 = tpu.matmul %4, %6, %cst {dimension_numbers = #tpu.dot_dimension_numbers<[1], [0], [0], [1], [0, 0, 1, 1], [], []>} : vector<16x128xbf16>, vector<128x384xbf16>, vector<16x384xf32> -> vector<16x384xf32>
    %c0_7 = arith.constant 0 : index
    %c0_8 = arith.constant 0 : index
    %8 = vector.load %arg5[%c0_7, %c0_8] : memref<1x384xf32, #tpu.memory_space<vmem>>, vector<1x384xf32>
    %9 = vector.broadcast %8 : vector<1x384xf32> to vector<16x384xf32>
    %10 = arith.addf %7, %9 : vector<16x384xf32>
    %11 = arith.truncf %5 : vector<16x128xf32> to vector<16x128xbf16>
    %c0_9 = arith.constant 0 : index
    %c0_10 = arith.constant 0 : index
    %12 = vector.load %arg4[%c0_9, %c0_10] : memref<128x384xbf16, #tpu.memory_space<vmem>>, vector<128x384xbf16>
    %cst_11 = arith.constant dense<0.000000e+00> : vector<16x384xf32>
    %13 = tpu.matmul %11, %12, %cst_11 {dimension_numbers = #tpu.dot_dimension_numbers<[1], [0], [0], [1], [0, 0, 1, 1], [], []>} : vector<16x128xbf16>, vector<128x384xbf16>, vector<16x384xf32> -> vector<16x384xf32>
    %c0_12 = arith.constant 0 : index
    %c0_13 = arith.constant 0 : index
    %14 = vector.load %arg6[%c0_12, %c0_13] : memref<1x384xf32, #tpu.memory_space<vmem>>, vector<1x384xf32>
    %15 = vector.broadcast %14 : vector<1x384xf32> to vector<16x384xf32>
    %16 = arith.addf %13, %15 : vector<16x384xf32>
    %17 = vector.extract_strided_slice %10 {offsets = [0, 0], sizes = [16, 128], strides = [1, 1]} : vector<16x384xf32> to vector<16x128xf32>
    %18 = vector.extract_strided_slice %16 {offsets = [0, 0], sizes = [16, 128], strides = [1, 1]} : vector<16x384xf32> to vector<16x128xf32>
    %19 = arith.addf %17, %18 : vector<16x128xf32>
    %20 = arith.negf %19 : vector<16x128xf32>
    %21 = math.exp %20 : vector<16x128xf32>
    %cst_14 = arith.constant 1.000000e+00 : f32
    %22 = vector.broadcast %cst_14 : f32 to vector<16x128xf32>
    %23 = arith.addf %22, %21 : vector<16x128xf32>
    %24 = arith.divf %22, %23 : vector<16x128xf32>
    %25 = vector.extract_strided_slice %10 {offsets = [0, 128], sizes = [16, 128], strides = [1, 1]} : vector<16x384xf32> to vector<16x128xf32>
    %26 = vector.extract_strided_slice %16 {offsets = [0, 128], sizes = [16, 128], strides = [1, 1]} : vector<16x384xf32> to vector<16x128xf32>
    %27 = arith.addf %25, %26 : vector<16x128xf32>
    %28 = arith.negf %27 : vector<16x128xf32>
    %29 = math.exp %28 : vector<16x128xf32>
    %cst_15 = arith.constant 1.000000e+00 : f32
    %30 = vector.broadcast %cst_15 : f32 to vector<16x128xf32>
    %31 = arith.addf %30, %29 : vector<16x128xf32>
    %32 = arith.divf %30, %31 : vector<16x128xf32>
    %33 = vector.extract_strided_slice %10 {offsets = [0, 256], sizes = [16, 128], strides = [1, 1]} : vector<16x384xf32> to vector<16x128xf32>
    %34 = vector.extract_strided_slice %16 {offsets = [0, 256], sizes = [16, 128], strides = [1, 1]} : vector<16x384xf32> to vector<16x128xf32>
    %35 = arith.mulf %24, %34 : vector<16x128xf32>
    %36 = arith.addf %33, %35 : vector<16x128xf32>
    %37 = math.tanh %36 : vector<16x128xf32>
    %cst_16 = arith.constant 1.000000e+00 : f32
    %38 = vector.broadcast %cst_16 : f32 to vector<16x128xf32>
    %39 = arith.subf %38, %32 : vector<16x128xf32>
    %40 = arith.mulf %39, %37 : vector<16x128xf32>
    %41 = arith.mulf %32, %5 : vector<16x128xf32>
    %42 = arith.addf %40, %41 : vector<16x128xf32>
    %c0_17 = arith.constant 0 : index
    %c0_18 = arith.constant 0 : index
    %43 = vector.load %arg15[%c0_17, %c0_18] : memref<16x128xf32, #tpu.memory_space<vmem>>, vector<16x128xf32>
    tpu.vector_store %arg15[%c0_17, %c0_18], %42 {strides = array<i32>} : memref<16x128xf32, #tpu.memory_space<vmem>>, vector<16x128xf32>,
    %44 = arith.truncf %42 : vector<16x128xf32> to vector<16x128xbf16>
    %c0_19 = arith.constant 0 : index
    %c0_20 = arith.constant 0 : index
    %45 = vector.load %arg16[%c0_19, %c0_20] : memref<16x128xf32, #tpu.memory_space<vmem>>, vector<16x128xf32>
    %c0_21 = arith.constant 0 : index
    %c0_22 = arith.constant 0 : index
    %46 = vector.load %arg7[%c0_21, %c0_22] : memref<128x384xbf16, #tpu.memory_space<vmem>>, vector<128x384xbf16>
    %cst_23 = arith.constant dense<0.000000e+00> : vector<16x384xf32>
    %47 = tpu.matmul %44, %46, %cst_23 {dimension_numbers = #tpu.dot_dimension_numbers<[1], [0], [0], [1], [0, 0, 1, 1], [], []>} : vector<16x128xbf16>, vector<128x384xbf16>, vector<16x384xf32> -> vector<16x384xf32>
    %c0_24 = arith.constant 0 : index
    %c0_25 = arith.constant 0 : index
    %48 = vector.load %arg9[%c0_24, %c0_25] : memref<1x384xf32, #tpu.memory_space<vmem>>, vector<1x384xf32>
    %49 = vector.broadcast %48 : vector<1x384xf32> to vector<16x384xf32>
    %50 = arith.addf %47, %49 : vector<16x384xf32>
    %51 = arith.truncf %45 : vector<16x128xf32> to vector<16x128xbf16>
    %c0_26 = arith.constant 0 : index
    %c0_27 = arith.constant 0 : index
    %52 = vector.load %arg8[%c0_26, %c0_27] : memref<128x384xbf16, #tpu.memory_space<vmem>>, vector<128x384xbf16>
    %cst_28 = arith.constant dense<0.000000e+00> : vector<16x384xf32>
    %53 = tpu.matmul %51, %52, %cst_28 {dimension_numbers = #tpu.dot_dimension_numbers<[1], [0], [0], [1], [0, 0, 1, 1], [], []>} : vector<16x128xbf16>, vector<128x384xbf16>, vector<16x384xf32> -> vector<16x384xf32>
    %c0_29 = arith.constant 0 : index
    %c0_30 = arith.constant 0 : index
    %54 = vector.load %arg10[%c0_29, %c0_30] : memref<1x384xf32, #tpu.memory_space<vmem>>, vector<1x384xf32>
    %55 = vector.broadcast %54 : vector<1x384xf32> to vector<16x384xf32>
    %56 = arith.addf %53, %55 : vector<16x384xf32>
    %57 = vector.extract_strided_slice %50 {offsets = [0, 0], sizes = [16, 128], strides = [1, 1]} : vector<16x384xf32> to vector<16x128xf32>
    %58 = vector.extract_strided_slice %56 {offsets = [0, 0], sizes = [16, 128], strides = [1, 1]} : vector<16x384xf32> to vector<16x128xf32>
    %59 = arith.addf %57, %58 : vector<16x128xf32>
    %60 = arith.negf %59 : vector<16x128xf32>
    %61 = math.exp %60 : vector<16x128xf32>
    %cst_31 = arith.constant 1.000000e+00 : f32
    %62 = vector.broadcast %cst_31 : f32 to vector<16x128xf32>
    %63 = arith.addf %62, %61 : vector<16x128xf32>
    %64 = arith.divf %62, %63 : vector<16x128xf32>
    %65 = vector.extract_strided_slice %50 {offsets = [0, 128], sizes = [16, 128], strides = [1, 1]} : vector<16x384xf32> to vector<16x128xf32>
    %66 = vector.extract_strided_slice %56 {offsets = [0, 128], sizes = [16, 128], strides = [1, 1]} : vector<16x384xf32> to vector<16x128xf32>
    %67 = arith.addf %65, %66 : vector<16x128xf32>
    %68 = arith.negf %67 : vector<16x128xf32>
    %69 = math.exp %68 : vector<16x128xf32>
    %cst_32 = arith.constant 1.000000e+00 : f32
    %70 = vector.broadcast %cst_32 : f32 to vector<16x128xf32>
    %71 = arith.addf %70, %69 : vector<16x128xf32>
    %72 = arith.divf %70, %71 : vector<16x128xf32>
    %73 = vector.extract_strided_slice %50 {offsets = [0, 256], sizes = [16, 128], strides = [1, 1]} : vector<16x384xf32> to vector<16x128xf32>
    %74 = vector.extract_strided_slice %56 {offsets = [0, 256], sizes = [16, 128], strides = [1, 1]} : vector<16x384xf32> to vector<16x128xf32>
    %75 = arith.mulf %64, %74 : vector<16x128xf32>
    %76 = arith.addf %73, %75 : vector<16x128xf32>
    %77 = math.tanh %76 : vector<16x128xf32>
    %cst_33 = arith.constant 1.000000e+00 : f32
    %78 = vector.broadcast %cst_33 : f32 to vector<16x128xf32>
    %79 = arith.subf %78, %72 : vector<16x128xf32>
    %80 = arith.mulf %79, %77 : vector<16x128xf32>
    %81 = arith.mulf %72, %45 : vector<16x128xf32>
    %82 = arith.addf %80, %81 : vector<16x128xf32>
    %c0_34 = arith.constant 0 : index
    %c0_35 = arith.constant 0 : index
    %83 = vector.load %arg16[%c0_34, %c0_35] : memref<16x128xf32, #tpu.memory_space<vmem>>, vector<16x128xf32>
    tpu.vector_store %arg16[%c0_34, %c0_35], %82 {strides = array<i32>} : memref<16x128xf32, #tpu.memory_space<vmem>>, vector<16x128xf32>,
    %c0_i32_36 = arith.constant 0 : i32
    %84 = arith.cmpi eq, %arg0, %c0_i32_36 : i32
    %85 = arith.extui %84 : i1 to i32
    %c0_i32_37 = arith.constant 0 : i32
    %86 = arith.cmpi ne, %85, %c0_i32_37 : i32
    scf.if %86 {
      %c0_39 = arith.constant 0 : index
      %c0_40 = arith.constant 0 : index
      %90 = vector.load %arg15[%c0_39, %c0_40] : memref<16x128xf32, #tpu.memory_space<vmem>>, vector<16x128xf32>
      %c0_41 = arith.constant 0 : index
      %c0_42 = arith.constant 0 : index
      %91 = vector.load %arg14[%c0_41, %c0_42] : memref<16x128xf32, #tpu.memory_space<vmem>>, vector<16x128xf32>
      tpu.vector_store %arg14[%c0_41, %c0_42], %90 {strides = array<i32>} : memref<16x128xf32, #tpu.memory_space<vmem>>, vector<16x128xf32>,
    } else {
    }
    %c2_i32 = arith.constant 2 : i32
    %87 = arith.cmpi eq, %arg0, %c2_i32 : i32
    %88 = arith.extui %87 : i1 to i32
    %c0_i32_38 = arith.constant 0 : i32
    %89 = arith.cmpi ne, %88, %c0_i32_38 : i32
    scf.if %89 {
      %c0_39 = arith.constant 0 : index
      %c0_40 = arith.constant 0 : index
      %90 = vector.load %arg16[%c0_39, %c0_40] : memref<16x128xf32, #tpu.memory_space<vmem>>, vector<16x128xf32>
      %91 = arith.truncf %90 : vector<16x128xf32> to vector<16x128xbf16>
      %c0_41 = arith.constant 0 : index
      %c0_42 = arith.constant 0 : index
      %92 = vector.load %arg11[%c0_41, %c0_42] : memref<128x128xbf16, #tpu.memory_space<vmem>>, vector<128x128xbf16>
      %cst_43 = arith.constant dense<0.000000e+00> : vector<16x128xf32>
      %93 = tpu.matmul %91, %92, %cst_43 {dimension_numbers = #tpu.dot_dimension_numbers<[1], [0], [0], [1], [0, 0, 1, 1], [], []>} : vector<16x128xbf16>, vector<128x128xbf16>, vector<16x128xf32> -> vector<16x128xf32>
      %c0_44 = arith.constant 0 : index
      %c0_45 = arith.constant 0 : index
      %94 = vector.load %arg12[%c0_44, %c0_45] : memref<1x128xf32, #tpu.memory_space<vmem>>, vector<1x128xf32>
      %95 = vector.broadcast %94 : vector<1x128xf32> to vector<16x128xf32>
      %96 = arith.addf %93, %95 : vector<16x128xf32>
      %c0_46 = arith.constant 0 : index
      %c0_47 = arith.constant 0 : index
      %97 = vector.load %arg13[%c0_46, %c0_47] : memref<16x128xf32, #tpu.memory_space<vmem>>, vector<16x128xf32>
      tpu.vector_store %arg13[%c0_46, %c0_47], %96 {strides = array<i32>} : memref<16x128xf32, #tpu.memory_space<vmem>>, vector<16x128xf32>,
    } else {
    }
    return
  }
  func.func @transform_0(%arg0: i32) -> (i32, i32, i32) {
    %c0_i32 = arith.constant 0 : i32
    %c0_i32_0 = arith.constant 0 : i32
    %c0_i32_1 = arith.constant 0 : i32
    return %arg0, %c0_i32, %c0_i32_0 : i32, i32, i32
  }
  func.func @transform_1(%arg0: i32) -> (i32, i32, i32) {
    %c0_i32 = arith.constant 0 : i32
    %c0_i32_0 = arith.constant 0 : i32
    %c0_i32_1 = arith.constant 0 : i32
    %c0_i32_2 = arith.constant 0 : i32
    return %c0_i32, %c0_i32_0, %c0_i32_1 : i32, i32, i32
  }
  func.func @transform_2(%arg0: i32) -> (i32, i32) {
    %c0_i32 = arith.constant 0 : i32
    %c0_i32_0 = arith.constant 0 : i32
    %c0_i32_1 = arith.constant 0 : i32
    return %c0_i32, %c0_i32_0 : i32, i32
  }
  func.func @transform_3(%arg0: i32) -> (i32, i32) {
    %c0_i32 = arith.constant 0 : i32
    %c0_i32_0 = arith.constant 0 : i32
    %c0_i32_1 = arith.constant 0 : i32
    return %c0_i32, %c0_i32_0 : i32, i32
  }
  func.func @transform_4(%arg0: i32) -> (i32, i32) {
    %c0_i32 = arith.constant 0 : i32
    %c0_i32_0 = arith.constant 0 : i32
    %c0_i32_1 = arith.constant 0 : i32
    return %c0_i32, %c0_i32_0 : i32, i32
  }
  func.func @transform_5(%arg0: i32) -> (i32, i32) {
    %c0_i32 = arith.constant 0 : i32
    %c0_i32_0 = arith.constant 0 : i32
    %c0_i32_1 = arith.constant 0 : i32
    return %c0_i32, %c0_i32_0 : i32, i32
  }
  func.func @transform_6(%arg0: i32) -> (i32, i32) {
    %c0_i32 = arith.constant 0 : i32
    %c0_i32_0 = arith.constant 0 : i32
    %c0_i32_1 = arith.constant 0 : i32
    return %c0_i32, %c0_i32_0 : i32, i32
  }
  func.func @transform_7(%arg0: i32) -> (i32, i32) {
    %c0_i32 = arith.constant 0 : i32
    %c0_i32_0 = arith.constant 0 : i32
    %c0_i32_1 = arith.constant 0 : i32
    return %c0_i32, %c0_i32_0 : i32, i32
  }
  func.func @transform_8(%arg0: i32) -> (i32, i32) {
    %c0_i32 = arith.constant 0 : i32
    %c0_i32_0 = arith.constant 0 : i32
    %c0_i32_1 = arith.constant 0 : i32
    return %c0_i32, %c0_i32_0 : i32, i32
  }
  func.func @transform_9(%arg0: i32) -> (i32, i32) {
    %c0_i32 = arith.constant 0 : i32
    %c0_i32_0 = arith.constant 0 : i32
    %c0_i32_1 = arith.constant 0 : i32
    return %c0_i32, %c0_i32_0 : i32, i32
  }
  func.func @transform_10(%arg0: i32) -> (i32, i32) {
    %c0_i32 = arith.constant 0 : i32
    %c0_i32_0 = arith.constant 0 : i32
    %c0_i32_1 = arith.constant 0 : i32
    return %c0_i32, %c0_i32_0 : i32, i32
  }
  func.func @transform_11(%arg0: i32) -> (i32, i32) {
    %c0_i32 = arith.constant 0 : i32
    %c0_i32_0 = arith.constant 0 : i32
    %c0_i32_1 = arith.constant 0 : i32
    return %c0_i32, %c0_i32_0 : i32, i32
  }
  func.func @transform_12(%arg0: i32) -> (i32, i32) {
    %c0_i32 = arith.constant 0 : i32
    %c0_i32_0 = arith.constant 0 : i32
    %c0_i32_1 = arith.constant 0 : i32
    return %c0_i32, %c0_i32_0 : i32, i32
  }
  func.func @transform_13(%arg0: i32) -> (i32, i32) {
    %c0_i32 = arith.constant 0 : i32
    %c0_i32_0 = arith.constant 0 : i32
    %c0_i32_1 = arith.constant 0 : i32
    return %c0_i32, %c0_i32_0 : i32, i32
  }
}

module attributes {stable_mosaic.version = 11 : i64} {
  func.func @_gnn_kernel(%arg0: i32, %arg1: memref<1x16x128xbf16, #tpu.memory_space<vmem>>, %arg2: memref<1x16x16xbf16, #tpu.memory_space<vmem>>, %arg3: memref<1x16x128xbf16, #tpu.memory_space<vmem>>, %arg4: memref<128x128xbf16, #tpu.memory_space<vmem>>, %arg5: memref<128x128xbf16, #tpu.memory_space<vmem>>, %arg6: memref<1x128xf32, #tpu.memory_space<vmem>>, %arg7: memref<128x128xbf16, #tpu.memory_space<vmem>>, %arg8: memref<128x128xbf16, #tpu.memory_space<vmem>>, %arg9: memref<1x128xf32, #tpu.memory_space<vmem>>, %arg10: memref<128x128xbf16, #tpu.memory_space<vmem>>, %arg11: memref<1x128xf32, #tpu.memory_space<vmem>>, %arg12: memref<1x16x128xbf16, #tpu.memory_space<vmem>>) attributes {dimension_semantics = [#tpu.dimension_semantics<parallel>], iteration_bounds = array<i64: 3>, scalar_prefetch = 0 : i64, scratch_operands = 0 : i64, tpu.core_type = #tpu.core_type<tc>, window_params = [{transform_indices = @transform_0, window_bounds = array<i64: 1, 16, 128>}, {transform_indices = @transform_1, window_bounds = array<i64: 1, 16, 16>}, {transform_indices = @transform_2, window_bounds = array<i64: 1, 16, 128>}, {pipeline_mode = #tpu.pipeline_mode<synchronous>, transform_indices = @transform_3, window_bounds = array<i64: 128, 128>}, {pipeline_mode = #tpu.pipeline_mode<synchronous>, transform_indices = @transform_4, window_bounds = array<i64: 128, 128>}, {pipeline_mode = #tpu.pipeline_mode<synchronous>, transform_indices = @transform_5, window_bounds = array<i64: 1, 128>}, {pipeline_mode = #tpu.pipeline_mode<synchronous>, transform_indices = @transform_6, window_bounds = array<i64: 128, 128>}, {pipeline_mode = #tpu.pipeline_mode<synchronous>, transform_indices = @transform_7, window_bounds = array<i64: 128, 128>}, {pipeline_mode = #tpu.pipeline_mode<synchronous>, transform_indices = @transform_8, window_bounds = array<i64: 1, 128>}, {pipeline_mode = #tpu.pipeline_mode<synchronous>, transform_indices = @transform_9, window_bounds = array<i64: 128, 128>}, {pipeline_mode = #tpu.pipeline_mode<synchronous>, transform_indices = @transform_10, window_bounds = array<i64: 1, 128>}, {transform_indices = @transform_11, window_bounds = array<i64: 1, 16, 128>}]} {
    %c0 = arith.constant 0 : index
    %c0_0 = arith.constant 0 : index
    %c0_1 = arith.constant 0 : index
    %0 = vector.load %arg1[%c0, %c0_0, %c0_1] : memref<1x16x128xbf16, #tpu.memory_space<vmem>>, vector<1x16x128xbf16>
    %1 = vector.shape_cast %0 : vector<1x16x128xbf16> to vector<16x128xbf16>
    %c0_2 = arith.constant 0 : index
    %c0_3 = arith.constant 0 : index
    %c0_4 = arith.constant 0 : index
    %2 = vector.load %arg2[%c0_2, %c0_3, %c0_4] : memref<1x16x16xbf16, #tpu.memory_space<vmem>>, vector<1x16x16xbf16>
    %3 = vector.shape_cast %2 : vector<1x16x16xbf16> to vector<16x16xbf16>
    %c0_5 = arith.constant 0 : index
    %c0_6 = arith.constant 0 : index
    %c0_7 = arith.constant 0 : index
    %4 = vector.load %arg3[%c0_5, %c0_6, %c0_7] : memref<1x16x128xbf16, #tpu.memory_space<vmem>>, vector<1x16x128xbf16>
    %5 = vector.shape_cast %4 : vector<1x16x128xbf16> to vector<16x128xbf16>
    %c0_8 = arith.constant 0 : index
    %c0_9 = arith.constant 0 : index
    %6 = vector.load %arg4[%c0_8, %c0_9] : memref<128x128xbf16, #tpu.memory_space<vmem>>, vector<128x128xbf16>
    %cst = arith.constant dense<0.000000e+00> : vector<16x128xf32>
    %7 = tpu.matmul %5, %6, %cst {dimension_numbers = #tpu.dot_dimension_numbers<[1], [0], [0], [1], [0, 0, 1, 1], [], []>} : vector<16x128xbf16>, vector<128x128xbf16>, vector<16x128xf32> -> vector<16x128xf32>
    %8 = arith.extf %1 : vector<16x128xbf16> to vector<16x128xf32>
    %cst_10 = arith.constant 1.000000e+00 : f32
    %9 = vector.broadcast %cst_10 : f32 to vector<16x128xf32>
    %10 = arith.mulf %9, %8 : vector<16x128xf32>
    %cst_11 = arith.constant dense<0.000000e+00> : vector<16x128xf32>
    %11 = tpu.matmul %3, %1, %cst_11 {dimension_numbers = #tpu.dot_dimension_numbers<[1], [0], [0], [1], [0, 0, 1, 1], [], []>} : vector<16x16xbf16>, vector<16x128xbf16>, vector<16x128xf32> -> vector<16x128xf32>
    %12 = arith.addf %10, %11 : vector<16x128xf32>
    %13 = arith.addf %12, %7 : vector<16x128xf32>
    %14 = arith.truncf %13 : vector<16x128xf32> to vector<16x128xbf16>
    %c0_12 = arith.constant 0 : index
    %c0_13 = arith.constant 0 : index
    %15 = vector.load %arg5[%c0_12, %c0_13] : memref<128x128xbf16, #tpu.memory_space<vmem>>, vector<128x128xbf16>
    %cst_14 = arith.constant dense<0.000000e+00> : vector<16x128xf32>
    %16 = tpu.matmul %14, %15, %cst_14 {dimension_numbers = #tpu.dot_dimension_numbers<[1], [0], [0], [1], [0, 0, 1, 1], [], []>} : vector<16x128xbf16>, vector<128x128xbf16>, vector<16x128xf32> -> vector<16x128xf32>
    %c0_15 = arith.constant 0 : index
    %c0_16 = arith.constant 0 : index
    %17 = vector.load %arg6[%c0_15, %c0_16] : memref<1x128xf32, #tpu.memory_space<vmem>>, vector<1x128xf32>
    %18 = vector.broadcast %17 : vector<1x128xf32> to vector<16x128xf32>
    %19 = arith.addf %16, %18 : vector<16x128xf32>
    %cst_17 = arith.constant 0.000000e+00 : f32
    %20 = vector.broadcast %cst_17 : f32 to vector<16x128xf32>
    %21 = arith.maximumf %19, %20 : vector<16x128xf32>
    %22 = arith.truncf %21 : vector<16x128xf32> to vector<16x128xbf16>
    %c0_18 = arith.constant 0 : index
    %c0_19 = arith.constant 0 : index
    %23 = vector.load %arg7[%c0_18, %c0_19] : memref<128x128xbf16, #tpu.memory_space<vmem>>, vector<128x128xbf16>
    %cst_20 = arith.constant dense<0.000000e+00> : vector<16x128xf32>
    %24 = tpu.matmul %5, %23, %cst_20 {dimension_numbers = #tpu.dot_dimension_numbers<[1], [0], [0], [1], [0, 0, 1, 1], [], []>} : vector<16x128xbf16>, vector<128x128xbf16>, vector<16x128xf32> -> vector<16x128xf32>
    %25 = arith.extf %22 : vector<16x128xbf16> to vector<16x128xf32>
    %cst_21 = arith.constant 1.000000e+00 : f32
    %26 = vector.broadcast %cst_21 : f32 to vector<16x128xf32>
    %27 = arith.mulf %26, %25 : vector<16x128xf32>
    %cst_22 = arith.constant dense<0.000000e+00> : vector<16x128xf32>
    %28 = tpu.matmul %3, %22, %cst_22 {dimension_numbers = #tpu.dot_dimension_numbers<[1], [0], [0], [1], [0, 0, 1, 1], [], []>} : vector<16x16xbf16>, vector<16x128xbf16>, vector<16x128xf32> -> vector<16x128xf32>
    %29 = arith.addf %27, %28 : vector<16x128xf32>
    %30 = arith.addf %29, %24 : vector<16x128xf32>
    %31 = arith.truncf %30 : vector<16x128xf32> to vector<16x128xbf16>
    %c0_23 = arith.constant 0 : index
    %c0_24 = arith.constant 0 : index
    %32 = vector.load %arg8[%c0_23, %c0_24] : memref<128x128xbf16, #tpu.memory_space<vmem>>, vector<128x128xbf16>
    %cst_25 = arith.constant dense<0.000000e+00> : vector<16x128xf32>
    %33 = tpu.matmul %31, %32, %cst_25 {dimension_numbers = #tpu.dot_dimension_numbers<[1], [0], [0], [1], [0, 0, 1, 1], [], []>} : vector<16x128xbf16>, vector<128x128xbf16>, vector<16x128xf32> -> vector<16x128xf32>
    %c0_26 = arith.constant 0 : index
    %c0_27 = arith.constant 0 : index
    %34 = vector.load %arg9[%c0_26, %c0_27] : memref<1x128xf32, #tpu.memory_space<vmem>>, vector<1x128xf32>
    %35 = vector.broadcast %34 : vector<1x128xf32> to vector<16x128xf32>
    %36 = arith.addf %33, %35 : vector<16x128xf32>
    %cst_28 = arith.constant 0.000000e+00 : f32
    %37 = vector.broadcast %cst_28 : f32 to vector<16x128xf32>
    %38 = arith.maximumf %36, %37 : vector<16x128xf32>
    %39 = arith.truncf %38 : vector<16x128xf32> to vector<16x128xbf16>
    %c0_29 = arith.constant 0 : index
    %c0_30 = arith.constant 0 : index
    %40 = vector.load %arg10[%c0_29, %c0_30] : memref<128x128xbf16, #tpu.memory_space<vmem>>, vector<128x128xbf16>
    %cst_31 = arith.constant dense<0.000000e+00> : vector<16x128xf32>
    %41 = tpu.matmul %39, %40, %cst_31 {dimension_numbers = #tpu.dot_dimension_numbers<[1], [0], [0], [1], [0, 0, 1, 1], [], []>} : vector<16x128xbf16>, vector<128x128xbf16>, vector<16x128xf32> -> vector<16x128xf32>
    %c0_32 = arith.constant 0 : index
    %c0_33 = arith.constant 0 : index
    %42 = vector.load %arg11[%c0_32, %c0_33] : memref<1x128xf32, #tpu.memory_space<vmem>>, vector<1x128xf32>
    %43 = vector.broadcast %42 : vector<1x128xf32> to vector<16x128xf32>
    %44 = arith.addf %41, %43 : vector<16x128xf32>
    %45 = arith.truncf %44 : vector<16x128xf32> to vector<16x128xbf16>
    %c0_34 = arith.constant 0 : index
    %c0_35 = arith.constant 0 : index
    %c0_36 = arith.constant 0 : index
    %46 = vector.load %arg12[%c0_34, %c0_35, %c0_36] : memref<1x16x128xbf16, #tpu.memory_space<vmem>>, vector<1x16x128xbf16>
    %47 = vector.shape_cast %46 : vector<1x16x128xbf16> to vector<16x128xbf16>
    %48 = vector.shape_cast %45 : vector<16x128xbf16> to vector<1x16x128xbf16>
    tpu.vector_store %arg12[%c0_34, %c0_35, %c0_36], %48 {strides = array<i32>} : memref<1x16x128xbf16, #tpu.memory_space<vmem>>, vector<1x16x128xbf16>,
    return
  }
  func.func @transform_0(%arg0: i32) -> (i32, i32, i32) {
    %c0_i32 = arith.constant 0 : i32
    %c0_i32_0 = arith.constant 0 : i32
    %c0_i32_1 = arith.constant 0 : i32
    return %arg0, %c0_i32, %c0_i32_0 : i32, i32, i32
  }
  func.func @transform_1(%arg0: i32) -> (i32, i32, i32) {
    %c0_i32 = arith.constant 0 : i32
    %c0_i32_0 = arith.constant 0 : i32
    %c0_i32_1 = arith.constant 0 : i32
    return %arg0, %c0_i32, %c0_i32_0 : i32, i32, i32
  }
  func.func @transform_2(%arg0: i32) -> (i32, i32, i32) {
    %c0_i32 = arith.constant 0 : i32
    %c0_i32_0 = arith.constant 0 : i32
    %c0_i32_1 = arith.constant 0 : i32
    return %arg0, %c0_i32, %c0_i32_0 : i32, i32, i32
  }
  func.func @transform_3(%arg0: i32) -> (i32, i32) {
    %c0_i32 = arith.constant 0 : i32
    %c0_i32_0 = arith.constant 0 : i32
    %c0_i32_1 = arith.constant 0 : i32
    return %c0_i32, %c0_i32_0 : i32, i32
  }
  func.func @transform_4(%arg0: i32) -> (i32, i32) {
    %c0_i32 = arith.constant 0 : i32
    %c0_i32_0 = arith.constant 0 : i32
    %c0_i32_1 = arith.constant 0 : i32
    return %c0_i32, %c0_i32_0 : i32, i32
  }
  func.func @transform_5(%arg0: i32) -> (i32, i32) {
    %c0_i32 = arith.constant 0 : i32
    %c0_i32_0 = arith.constant 0 : i32
    %c0_i32_1 = arith.constant 0 : i32
    return %c0_i32, %c0_i32_0 : i32, i32
  }
  func.func @transform_6(%arg0: i32) -> (i32, i32) {
    %c0_i32 = arith.constant 0 : i32
    %c0_i32_0 = arith.constant 0 : i32
    %c0_i32_1 = arith.constant 0 : i32
    return %c0_i32, %c0_i32_0 : i32, i32
  }
  func.func @transform_7(%arg0: i32) -> (i32, i32) {
    %c0_i32 = arith.constant 0 : i32
    %c0_i32_0 = arith.constant 0 : i32
    %c0_i32_1 = arith.constant 0 : i32
    return %c0_i32, %c0_i32_0 : i32, i32
  }
  func.func @transform_8(%arg0: i32) -> (i32, i32) {
    %c0_i32 = arith.constant 0 : i32
    %c0_i32_0 = arith.constant 0 : i32
    %c0_i32_1 = arith.constant 0 : i32
    return %c0_i32, %c0_i32_0 : i32, i32
  }
  func.func @transform_9(%arg0: i32) -> (i32, i32) {
    %c0_i32 = arith.constant 0 : i32
    %c0_i32_0 = arith.constant 0 : i32
    %c0_i32_1 = arith.constant 0 : i32
    return %c0_i32, %c0_i32_0 : i32, i32
  }
  func.func @transform_10(%arg0: i32) -> (i32, i32) {
    %c0_i32 = arith.constant 0 : i32
    %c0_i32_0 = arith.constant 0 : i32
    %c0_i32_1 = arith.constant 0 : i32
    return %c0_i32, %c0_i32_0 : i32, i32
  }
  func.func @transform_11(%arg0: i32) -> (i32, i32, i32) {
    %c0_i32 = arith.constant 0 : i32
    %c0_i32_0 = arith.constant 0 : i32
    %c0_i32_1 = arith.constant 0 : i32
    return %arg0, %c0_i32, %c0_i32_0 : i32, i32, i32
  }
}

module attributes {stable_mosaic.version = 11 : i64} {
  func.func @_gru_decoder_kernel(%arg0: i32, %arg1: memref<1x16x128xbf16, #tpu.memory_space<vmem>>, %arg2: memref<2x16x128xf32, #tpu.memory_space<vmem>>, %arg3: memref<128x384xbf16, #tpu.memory_space<vmem>>, %arg4: memref<128x384xbf16, #tpu.memory_space<vmem>>, %arg5: memref<1x384xf32, #tpu.memory_space<vmem>>, %arg6: memref<1x384xf32, #tpu.memory_space<vmem>>, %arg7: memref<128x384xbf16, #tpu.memory_space<vmem>>, %arg8: memref<128x384xbf16, #tpu.memory_space<vmem>>, %arg9: memref<1x384xf32, #tpu.memory_space<vmem>>, %arg10: memref<1x384xf32, #tpu.memory_space<vmem>>, %arg11: memref<128x128xbf16, #tpu.memory_space<vmem>>, %arg12: memref<1x128xf32, #tpu.memory_space<vmem>>, %arg13: memref<16x128xf32, #tpu.memory_space<vmem>>, %arg14: memref<16x128xf32, #tpu.memory_space<vmem>>, %arg15: memref<16x128xf32, #tpu.memory_space<vmem>>, %arg16: memref<16x128xf32, #tpu.memory_space<vmem>>) attributes {dimension_semantics = [#tpu.dimension_semantics<arbitrary>], iteration_bounds = array<i64: 3>, scalar_prefetch = 0 : i64, scratch_operands = 2 : i64, tpu.core_type = #tpu.core_type<tc>, window_params = [{transform_indices = @transform_0, window_bounds = array<i64: 1, 16, 128>}, {pipeline_mode = #tpu.pipeline_mode<synchronous>, transform_indices = @transform_1, window_bounds = array<i64: 2, 16, 128>}, {pipeline_mode = #tpu.pipeline_mode<synchronous>, transform_indices = @transform_2, window_bounds = array<i64: 128, 384>}, {pipeline_mode = #tpu.pipeline_mode<synchronous>, transform_indices = @transform_3, window_bounds = array<i64: 128, 384>}, {pipeline_mode = #tpu.pipeline_mode<synchronous>, transform_indices = @transform_4, window_bounds = array<i64: 1, 384>}, {pipeline_mode = #tpu.pipeline_mode<synchronous>, transform_indices = @transform_5, window_bounds = array<i64: 1, 384>}, {pipeline_mode = #tpu.pipeline_mode<synchronous>, transform_indices = @transform_6, window_bounds = array<i64: 128, 384>}, {pipeline_mode = #tpu.pipeline_mode<synchronous>, transform_indices = @transform_7, window_bounds = array<i64: 128, 384>}, {pipeline_mode = #tpu.pipeline_mode<synchronous>, transform_indices = @transform_8, window_bounds = array<i64: 1, 384>}, {pipeline_mode = #tpu.pipeline_mode<synchronous>, transform_indices = @transform_9, window_bounds = array<i64: 1, 384>}, {pipeline_mode = #tpu.pipeline_mode<synchronous>, transform_indices = @transform_10, window_bounds = array<i64: 128, 128>}, {pipeline_mode = #tpu.pipeline_mode<synchronous>, transform_indices = @transform_11, window_bounds = array<i64: 1, 128>}, {pipeline_mode = #tpu.pipeline_mode<synchronous>, transform_indices = @transform_12, window_bounds = array<i64: 16, 128>}, {pipeline_mode = #tpu.pipeline_mode<synchronous>, transform_indices = @transform_13, window_bounds = array<i64: 16, 128>}]} {
    %c0_i32 = arith.constant 0 : i32
    %0 = arith.cmpi eq, %arg0, %c0_i32 : i32
    %1 = arith.extui %0 : i1 to i32
    %c0_i32_0 = arith.constant 0 : i32
    %2 = arith.cmpi ne, %1, %c0_i32_0 : i32
    scf.if %2 {
      %c0_39 = arith.constant 0 : index
      %c0_40 = arith.constant 0 : index
      %c0_41 = arith.constant 0 : index
      %90 = vector.load %arg2[%c0_39, %c0_40, %c0_41] : memref<2x16x128xf32, #tpu.memory_space<vmem>>, vector<1x16x128xf32>
      %91 = vector.shape_cast %90 : vector<1x16x128xf32> to vector<16x128xf32>
      %c0_42 = arith.constant 0 : index
      %c0_43 = arith.constant 0 : index
      %92 = vector.load %arg15[%c0_42, %c0_43] : memref<16x128xf32, #tpu.memory_space<vmem>>, vector<16x128xf32>
      tpu.vector_store %arg15[%c0_42, %c0_43], %91 {strides = array<i32>} : memref<16x128xf32, #tpu.memory_space<vmem>>, vector<16x128xf32>,
      %c1 = arith.constant 1 : index
      %c0_44 = arith.constant 0 : index
      %c0_45 = arith.constant 0 : index
      %93 = vector.load %arg2[%c1, %c0_44, %c0_45] : memref<2x16x128xf32, #tpu.memory_space<vmem>>, vector<1x16x128xf32>
      %94 = vector.shape_cast %93 : vector<1x16x128xf32> to vector<16x128xf32>
      %c0_46 = arith.constant 0 : index
      %c0_47 = arith.constant 0 : index
      %95 = vector.load %arg16[%c0_46, %c0_47] : memref<16x128xf32, #tpu.memory_space<vmem>>, vector<16x128xf32>
      tpu.vector_store %arg16[%c0_46, %c0_47], %94 {strides = array<i32>} : memref<16x128xf32, #tpu.memory_space<vmem>>, vector<16x128xf32>,
    } else {
    }
    %c0 = arith.constant 0 : index
    %c0_1 = arith.constant 0 : index
    %c0_2 = arith.constant 0 : index
    %3 = vector.load %arg1[%c0, %c0_1, %c0_2] : memref<1x16x128xbf16, #tpu.memory_space<vmem>>, vector<1x16x128xbf16>
    %4 = vector.shape_cast %3 : vector<1x16x128xbf16> to vector<16x128xbf16>
    %c0_3 = arith.constant 0 : index
    %c0_4 = arith.constant 0 : index
    %5 = vector.load %arg15[%c0_3, %c0_4] : memref<16x128xf32, #tpu.memory_space<vmem>>, vector<16x128xf32>
    %c0_5 = arith.constant 0 : index
    %c0_6 = arith.constant 0 : index
    %6 = vector.load %arg3[%c0_5, %c0_6] : memref<128x384xbf16, #tpu.memory_space<vmem>>, vector<128x384xbf16>
    %cst = arith.constant dense<0.000000e+00> : vector<16x384xf32>
    %7 = tpu.matmul %4, %6, %cst {dimension_numbers = #tpu.dot_dimension_numbers<[1], [0], [0], [1], [0, 0, 1, 1], [], []>} : vector<16x128xbf16>, vector<128x384xbf16>, vector<16x384xf32> -> vector<16x384xf32>
    %c0_7 = arith.constant 0 : index
    %c0_8 = arith.constant 0 : index
    %8 = vector.load %arg5[%c0_7, %c0_8] : memref<1x384xf32, #tpu.memory_space<vmem>>, vector<1x384xf32>
    %9 = vector.broadcast %8 : vector<1x384xf32> to vector<16x384xf32>
    %10 = arith.addf %7, %9 : vector<16x384xf32>
    %11 = arith.truncf %5 : vector<16x128xf32> to vector<16x128xbf16>
    %c0_9 = arith.constant 0 : index
    %c0_10 = arith.constant 0 : index
    %12 = vector.load %arg4[%c0_9, %c0_10] : memref<128x384xbf16, #tpu.memory_space<vmem>>, vector<128x384xbf16>
    %cst_11 = arith.constant dense<0.000000e+00> : vector<16x384xf32>
    %13 = tpu.matmul %11, %12, %cst_11 {dimension_numbers = #tpu.dot_dimension_numbers<[1], [0], [0], [1], [0, 0, 1, 1], [], []>} : vector<16x128xbf16>, vector<128x384xbf16>, vector<16x384xf32> -> vector<16x384xf32>
    %c0_12 = arith.constant 0 : index
    %c0_13 = arith.constant 0 : index
    %14 = vector.load %arg6[%c0_12, %c0_13] : memref<1x384xf32, #tpu.memory_space<vmem>>, vector<1x384xf32>
    %15 = vector.broadcast %14 : vector<1x384xf32> to vector<16x384xf32>
    %16 = arith.addf %13, %15 : vector<16x384xf32>
    %17 = vector.extract_strided_slice %10 {offsets = [0, 0], sizes = [16, 128], strides = [1, 1]} : vector<16x384xf32> to vector<16x128xf32>
    %18 = vector.extract_strided_slice %16 {offsets = [0, 0], sizes = [16, 128], strides = [1, 1]} : vector<16x384xf32> to vector<16x128xf32>
    %19 = arith.addf %17, %18 : vector<16x128xf32>
    %20 = arith.negf %19 : vector<16x128xf32>
    %21 = math.exp %20 : vector<16x128xf32>
    %cst_14 = arith.constant 1.000000e+00 : f32
    %22 = vector.broadcast %cst_14 : f32 to vector<16x128xf32>
    %23 = arith.addf %22, %21 : vector<16x128xf32>
    %24 = arith.divf %22, %23 : vector<16x128xf32>
    %25 = vector.extract_strided_slice %10 {offsets = [0, 128], sizes = [16, 128], strides = [1, 1]} : vector<16x384xf32> to vector<16x128xf32>
    %26 = vector.extract_strided_slice %16 {offsets = [0, 128], sizes = [16, 128], strides = [1, 1]} : vector<16x384xf32> to vector<16x128xf32>
    %27 = arith.addf %25, %26 : vector<16x128xf32>
    %28 = arith.negf %27 : vector<16x128xf32>
    %29 = math.exp %28 : vector<16x128xf32>
    %cst_15 = arith.constant 1.000000e+00 : f32
    %30 = vector.broadcast %cst_15 : f32 to vector<16x128xf32>
    %31 = arith.addf %30, %29 : vector<16x128xf32>
    %32 = arith.divf %30, %31 : vector<16x128xf32>
    %33 = vector.extract_strided_slice %10 {offsets = [0, 256], sizes = [16, 128], strides = [1, 1]} : vector<16x384xf32> to vector<16x128xf32>
    %34 = vector.extract_strided_slice %16 {offsets = [0, 256], sizes = [16, 128], strides = [1, 1]} : vector<16x384xf32> to vector<16x128xf32>
    %35 = arith.mulf %24, %34 : vector<16x128xf32>
    %36 = arith.addf %33, %35 : vector<16x128xf32>
    %37 = math.tanh %36 : vector<16x128xf32>
    %cst_16 = arith.constant 1.000000e+00 : f32
    %38 = vector.broadcast %cst_16 : f32 to vector<16x128xf32>
    %39 = arith.subf %38, %32 : vector<16x128xf32>
    %40 = arith.mulf %39, %37 : vector<16x128xf32>
    %41 = arith.mulf %32, %5 : vector<16x128xf32>
    %42 = arith.addf %40, %41 : vector<16x128xf32>
    %c0_17 = arith.constant 0 : index
    %c0_18 = arith.constant 0 : index
    %43 = vector.load %arg15[%c0_17, %c0_18] : memref<16x128xf32, #tpu.memory_space<vmem>>, vector<16x128xf32>
    tpu.vector_store %arg15[%c0_17, %c0_18], %42 {strides = array<i32>} : memref<16x128xf32, #tpu.memory_space<vmem>>, vector<16x128xf32>,
    %44 = arith.truncf %42 : vector<16x128xf32> to vector<16x128xbf16>
    %c0_19 = arith.constant 0 : index
    %c0_20 = arith.constant 0 : index
    %45 = vector.load %arg16[%c0_19, %c0_20] : memref<16x128xf32, #tpu.memory_space<vmem>>, vector<16x128xf32>
    %c0_21 = arith.constant 0 : index
    %c0_22 = arith.constant 0 : index
    %46 = vector.load %arg7[%c0_21, %c0_22] : memref<128x384xbf16, #tpu.memory_space<vmem>>, vector<128x384xbf16>
    %cst_23 = arith.constant dense<0.000000e+00> : vector<16x384xf32>
    %47 = tpu.matmul %44, %46, %cst_23 {dimension_numbers = #tpu.dot_dimension_numbers<[1], [0], [0], [1], [0, 0, 1, 1], [], []>} : vector<16x128xbf16>, vector<128x384xbf16>, vector<16x384xf32> -> vector<16x384xf32>
    %c0_24 = arith.constant 0 : index
    %c0_25 = arith.constant 0 : index
    %48 = vector.load %arg9[%c0_24, %c0_25] : memref<1x384xf32, #tpu.memory_space<vmem>>, vector<1x384xf32>
    %49 = vector.broadcast %48 : vector<1x384xf32> to vector<16x384xf32>
    %50 = arith.addf %47, %49 : vector<16x384xf32>
    %51 = arith.truncf %45 : vector<16x128xf32> to vector<16x128xbf16>
    %c0_26 = arith.constant 0 : index
    %c0_27 = arith.constant 0 : index
    %52 = vector.load %arg8[%c0_26, %c0_27] : memref<128x384xbf16, #tpu.memory_space<vmem>>, vector<128x384xbf16>
    %cst_28 = arith.constant dense<0.000000e+00> : vector<16x384xf32>
    %53 = tpu.matmul %51, %52, %cst_28 {dimension_numbers = #tpu.dot_dimension_numbers<[1], [0], [0], [1], [0, 0, 1, 1], [], []>} : vector<16x128xbf16>, vector<128x384xbf16>, vector<16x384xf32> -> vector<16x384xf32>
    %c0_29 = arith.constant 0 : index
    %c0_30 = arith.constant 0 : index
    %54 = vector.load %arg10[%c0_29, %c0_30] : memref<1x384xf32, #tpu.memory_space<vmem>>, vector<1x384xf32>
    %55 = vector.broadcast %54 : vector<1x384xf32> to vector<16x384xf32>
    %56 = arith.addf %53, %55 : vector<16x384xf32>
    %57 = vector.extract_strided_slice %50 {offsets = [0, 0], sizes = [16, 128], strides = [1, 1]} : vector<16x384xf32> to vector<16x128xf32>
    %58 = vector.extract_strided_slice %56 {offsets = [0, 0], sizes = [16, 128], strides = [1, 1]} : vector<16x384xf32> to vector<16x128xf32>
    %59 = arith.addf %57, %58 : vector<16x128xf32>
    %60 = arith.negf %59 : vector<16x128xf32>
    %61 = math.exp %60 : vector<16x128xf32>
    %cst_31 = arith.constant 1.000000e+00 : f32
    %62 = vector.broadcast %cst_31 : f32 to vector<16x128xf32>
    %63 = arith.addf %62, %61 : vector<16x128xf32>
    %64 = arith.divf %62, %63 : vector<16x128xf32>
    %65 = vector.extract_strided_slice %50 {offsets = [0, 128], sizes = [16, 128], strides = [1, 1]} : vector<16x384xf32> to vector<16x128xf32>
    %66 = vector.extract_strided_slice %56 {offsets = [0, 128], sizes = [16, 128], strides = [1, 1]} : vector<16x384xf32> to vector<16x128xf32>
    %67 = arith.addf %65, %66 : vector<16x128xf32>
    %68 = arith.negf %67 : vector<16x128xf32>
    %69 = math.exp %68 : vector<16x128xf32>
    %cst_32 = arith.constant 1.000000e+00 : f32
    %70 = vector.broadcast %cst_32 : f32 to vector<16x128xf32>
    %71 = arith.addf %70, %69 : vector<16x128xf32>
    %72 = arith.divf %70, %71 : vector<16x128xf32>
    %73 = vector.extract_strided_slice %50 {offsets = [0, 256], sizes = [16, 128], strides = [1, 1]} : vector<16x384xf32> to vector<16x128xf32>
    %74 = vector.extract_strided_slice %56 {offsets = [0, 256], sizes = [16, 128], strides = [1, 1]} : vector<16x384xf32> to vector<16x128xf32>
    %75 = arith.mulf %64, %74 : vector<16x128xf32>
    %76 = arith.addf %73, %75 : vector<16x128xf32>
    %77 = math.tanh %76 : vector<16x128xf32>
    %cst_33 = arith.constant 1.000000e+00 : f32
    %78 = vector.broadcast %cst_33 : f32 to vector<16x128xf32>
    %79 = arith.subf %78, %72 : vector<16x128xf32>
    %80 = arith.mulf %79, %77 : vector<16x128xf32>
    %81 = arith.mulf %72, %45 : vector<16x128xf32>
    %82 = arith.addf %80, %81 : vector<16x128xf32>
    %c0_34 = arith.constant 0 : index
    %c0_35 = arith.constant 0 : index
    %83 = vector.load %arg16[%c0_34, %c0_35] : memref<16x128xf32, #tpu.memory_space<vmem>>, vector<16x128xf32>
    tpu.vector_store %arg16[%c0_34, %c0_35], %82 {strides = array<i32>} : memref<16x128xf32, #tpu.memory_space<vmem>>, vector<16x128xf32>,
    %c0_i32_36 = arith.constant 0 : i32
    %84 = arith.cmpi eq, %arg0, %c0_i32_36 : i32
    %85 = arith.extui %84 : i1 to i32
    %c0_i32_37 = arith.constant 0 : i32
    %86 = arith.cmpi ne, %85, %c0_i32_37 : i32
    scf.if %86 {
      %c0_39 = arith.constant 0 : index
      %c0_40 = arith.constant 0 : index
      %90 = vector.load %arg15[%c0_39, %c0_40] : memref<16x128xf32, #tpu.memory_space<vmem>>, vector<16x128xf32>
      %c0_41 = arith.constant 0 : index
      %c0_42 = arith.constant 0 : index
      %91 = vector.load %arg14[%c0_41, %c0_42] : memref<16x128xf32, #tpu.memory_space<vmem>>, vector<16x128xf32>
      tpu.vector_store %arg14[%c0_41, %c0_42], %90 {strides = array<i32>} : memref<16x128xf32, #tpu.memory_space<vmem>>, vector<16x128xf32>,
    } else {
    }
    %c2_i32 = arith.constant 2 : i32
    %87 = arith.cmpi eq, %arg0, %c2_i32 : i32
    %88 = arith.extui %87 : i1 to i32
    %c0_i32_38 = arith.constant 0 : i32
    %89 = arith.cmpi ne, %88, %c0_i32_38 : i32
    scf.if %89 {
      %c0_39 = arith.constant 0 : index
      %c0_40 = arith.constant 0 : index
      %90 = vector.load %arg16[%c0_39, %c0_40] : memref<16x128xf32, #tpu.memory_space<vmem>>, vector<16x128xf32>
      %91 = arith.truncf %90 : vector<16x128xf32> to vector<16x128xbf16>
      %c0_41 = arith.constant 0 : index
      %c0_42 = arith.constant 0 : index
      %92 = vector.load %arg11[%c0_41, %c0_42] : memref<128x128xbf16, #tpu.memory_space<vmem>>, vector<128x128xbf16>
      %cst_43 = arith.constant dense<0.000000e+00> : vector<16x128xf32>
      %93 = tpu.matmul %91, %92, %cst_43 {dimension_numbers = #tpu.dot_dimension_numbers<[1], [0], [0], [1], [0, 0, 1, 1], [], []>} : vector<16x128xbf16>, vector<128x128xbf16>, vector<16x128xf32> -> vector<16x128xf32>
      %c0_44 = arith.constant 0 : index
      %c0_45 = arith.constant 0 : index
      %94 = vector.load %arg12[%c0_44, %c0_45] : memref<1x128xf32, #tpu.memory_space<vmem>>, vector<1x128xf32>
      %95 = vector.broadcast %94 : vector<1x128xf32> to vector<16x128xf32>
      %96 = arith.addf %93, %95 : vector<16x128xf32>
      %c0_46 = arith.constant 0 : index
      %c0_47 = arith.constant 0 : index
      %97 = vector.load %arg13[%c0_46, %c0_47] : memref<16x128xf32, #tpu.memory_space<vmem>>, vector<16x128xf32>
      tpu.vector_store %arg13[%c0_46, %c0_47], %96 {strides = array<i32>} : memref<16x128xf32, #tpu.memory_space<vmem>>, vector<16x128xf32>,
    } else {
    }
    return
  }
  func.func @transform_0(%arg0: i32) -> (i32, i32, i32) {
    %c0_i32 = arith.constant 0 : i32
    %c0_i32_0 = arith.constant 0 : i32
    %c0_i32_1 = arith.constant 0 : i32
    return %arg0, %c0_i32, %c0_i32_0 : i32, i32, i32
  }
  func.func @transform_1(%arg0: i32) -> (i32, i32, i32) {
    %c0_i32 = arith.constant 0 : i32
    %c0_i32_0 = arith.constant 0 : i32
    %c0_i32_1 = arith.constant 0 : i32
    %c0_i32_2 = arith.constant 0 : i32
    return %c0_i32, %c0_i32_0, %c0_i32_1 : i32, i32, i32
  }
  func.func @transform_2(%arg0: i32) -> (i32, i32) {
    %c0_i32 = arith.constant 0 : i32
    %c0_i32_0 = arith.constant 0 : i32
    %c0_i32_1 = arith.constant 0 : i32
    return %c0_i32, %c0_i32_0 : i32, i32
  }
  func.func @transform_3(%arg0: i32) -> (i32, i32) {
    %c0_i32 = arith.constant 0 : i32
    %c0_i32_0 = arith.constant 0 : i32
    %c0_i32_1 = arith.constant 0 : i32
    return %c0_i32, %c0_i32_0 : i32, i32
  }
  func.func @transform_4(%arg0: i32) -> (i32, i32) {
    %c0_i32 = arith.constant 0 : i32
    %c0_i32_0 = arith.constant 0 : i32
    %c0_i32_1 = arith.constant 0 : i32
    return %c0_i32, %c0_i32_0 : i32, i32
  }
  func.func @transform_5(%arg0: i32) -> (i32, i32) {
    %c0_i32 = arith.constant 0 : i32
    %c0_i32_0 = arith.constant 0 : i32
    %c0_i32_1 = arith.constant 0 : i32
    return %c0_i32, %c0_i32_0 : i32, i32
  }
  func.func @transform_6(%arg0: i32) -> (i32, i32) {
    %c0_i32 = arith.constant 0 : i32
    %c0_i32_0 = arith.constant 0 : i32
    %c0_i32_1 = arith.constant 0 : i32
    return %c0_i32, %c0_i32_0 : i32, i32
  }
  func.func @transform_7(%arg0: i32) -> (i32, i32) {
    %c0_i32 = arith.constant 0 : i32
    %c0_i32_0 = arith.constant 0 : i32
    %c0_i32_1 = arith.constant 0 : i32
    return %c0_i32, %c0_i32_0 : i32, i32
  }
  func.func @transform_8(%arg0: i32) -> (i32, i32) {
    %c0_i32 = arith.constant 0 : i32
    %c0_i32_0 = arith.constant 0 : i32
    %c0_i32_1 = arith.constant 0 : i32
    return %c0_i32, %c0_i32_0 : i32, i32
  }
  func.func @transform_9(%arg0: i32) -> (i32, i32) {
    %c0_i32 = arith.constant 0 : i32
    %c0_i32_0 = arith.constant 0 : i32
    %c0_i32_1 = arith.constant 0 : i32
    return %c0_i32, %c0_i32_0 : i32, i32
  }
  func.func @transform_10(%arg0: i32) -> (i32, i32) {
    %c0_i32 = arith.constant 0 : i32
    %c0_i32_0 = arith.constant 0 : i32
    %c0_i32_1 = arith.constant 0 : i32
    return %c0_i32, %c0_i32_0 : i32, i32
  }
  func.func @transform_11(%arg0: i32) -> (i32, i32) {
    %c0_i32 = arith.constant 0 : i32
    %c0_i32_0 = arith.constant 0 : i32
    %c0_i32_1 = arith.constant 0 : i32
    return %c0_i32, %c0_i32_0 : i32, i32
  }
  func.func @transform_12(%arg0: i32) -> (i32, i32) {
    %c0_i32 = arith.constant 0 : i32
    %c0_i32_0 = arith.constant 0 : i32
    %c0_i32_1 = arith.constant 0 : i32
    return %c0_i32, %c0_i32_0 : i32, i32
  }
  func.func @transform_13(%arg0: i32) -> (i32, i32) {
    %c0_i32 = arith.constant 0 : i32
    %c0_i32_0 = arith.constant 0 : i32
    %c0_i32_1 = arith.constant 0 : i32
    return %c0_i32, %c0_i32_0 : i32, i32
  }
}

</mosaic_0001>

<bundles_post_ra>
// kernel: rnn_gnn_forward.2
= control target key start
LH: loop header
LB: loop body
LE: loop exit
PB: predicated region body
PF: predicated region fallthrough
CT: control target
= control target key end

     0   :  { %s1563_s17 = smov 0   ;;  %s1793_s0 = inlined_call_operand.vmem [shape: bf16[3,16,128], index: 0, kind: input, shape index: {}]   ;;  %s1794_s1 = inlined_call_operand.vmem [shape: bf16[3,16,16], index: 1, kind: input, shape index: {}]   ;;  %s1795_s2 = inlined_call_operand.vmem [shape: bf16[3,16,128], index: 2, kind: input, shape index: {}]   ;;  %s1796_s3 = inlined_call_operand.vmem [shape: bf16[128,128], index: 3, kind: input, shape index: {}]   ;;  %s1797_s4 = inlined_call_operand.vmem [shape: bf16[128,128], index: 4, kind: input, shape index: {}]   ;;  %s1798_s5 = inlined_call_operand.vmem [shape: f32[1,128], index: 5, kind: input, shape index: {}]   ;;  %s1799_s6 = inlined_call_operand.vmem [shape: bf16[128,128], index: 6, kind: input, shape index: {}]   ;;  %s1800_s7 = inlined_call_operand.vmem [shape: bf16[128,128], index: 7, kind: input, shape index: {}]   ;;  %s1801_s8 = inlined_call_operand.vmem [shape: f32[1,128], index: 8, kind: input, shape index: {}]   ;;  %s1802_s9 = inlined_call_operand.vmem [shape: bf16[128,128], index: 9, kind: input, shape index: {}]   ;;  %s1803_s10 = inlined_call_operand.vmem [shape: f32[1,128], index: 10, kind: input, shape index: {}]   ;;  %s1804_s11 = inlined_call_operand.vmem [shape: bf16[3,16,128], index: 11, kind: output, shape index: {}]  }
   0x1 LB: > { %s1192_s18 = sadd.s32 4294967295, %s1499_s17   ;;  %p1196_p0 = scmp.ge.s32.totalorder %s1499_s17, 1  ;;  %s1499_s17 = sphi %s1563_s17, %s21_s17  }
   0x2   : > { %p357_p1 = scmp.lt.s32.totalorder %s1499_s17, 4 }
   0x4   : > { %p358_p2 = pnand %p1196_p0, %p357_p1 }
   0x5   : > { %v1449_v0 = vld [vmem:[%s1796_s3] sm:$0xff] (!%p358_p2)   ;;  %v1501_v1 = vmov (!%p358_p2), 0.0   ;;  %p407_p3 = scmp.lt.s32.totalorder (!%p358_p2), %s1192_s18, 2  ;;  %v1450_v2 = vld [vmem:[%s1796_s3 + $0x8] sm:$0xff] (!%p358_p2)   ;;  %vm1502_vm0 = vmmov (!%p358_p2), 0   ;;  %v1451_v3 = vld [vmem:[%s1796_s3 + $0x10] sm:$0xff] (!%p358_p2)  }
   0x6   : > { %361 = sbr.rel (%p358_p2) target bundleno = 1138 (0x472), region = 64  ;;  %1317 = vmatprep.subr.bf16.mxu0 (!%p358_p2), %v1501_v1  ;;  %1337 = vmatprep.subr.bf16.mxu1 (!%p358_p2), %v1501_v1  ;;  %v1452_v6 = vld [vmem:[%s1796_s3 + $0x18] sm:$0xff] (!%p358_p2)   ;;  %vm558_vm1 = vcmask (!%p358_p2), 130048   ;;  %v1460_v7 = vld [vmem:[%s1797_s4] sm:$0xff] (!%p358_p2)   ;;  %v1461_v9 = vld [vmem:[%s1797_s4 + $0x8] sm:$0xff] (!%p358_p2)  }
   0x7   : > { %1318 = vmatpush3.bf16.msra.mxu0 (!%p358_p2), %v1449_v0  ;;  %1339 = vmatprep.mubr.msk.bf16.mxu1 (!%p358_p2), %vm1502_vm0, %v1501_v1  ;;  %v1453_v8 = vld [vmem:[%s1796_s3 + $0x20] sm:$0xff] (!%p358_p2)   ;;  %v1454_v10 = vld [vmem:[%s1796_s3 + $0x28] sm:$0xff] (!%p358_p2)   ;;  %v1462_v11 = vld [vmem:[%s1797_s4 + $0x10] sm:$0xff] (!%p358_p2)  }
   0x8   : > { %1319 = vmatprep.subr.bf16.mxu0 (!%p358_p2), %v1501_v1  ;;  %1333 = vmatprep.mubr.msk.bf16.mxu0 (!%p358_p2), %vm1502_vm0, %v1501_v1  ;;  %v1455_v12 = vld [vmem:[%s1796_s3 + $0x30] sm:$0xff] (!%p358_p2)   ;;  %v1463_v13 = vld [vmem:[%s1797_s4 + $0x18] sm:$0xff] (!%p358_p2)   ;;  %v1464_v15 = vld [vmem:[%s1797_s4 + $0x20] sm:$0xff] (!%p358_p2)  }
   0x9   : > { %v1457_v14 = vld [vmem:[%s1796_s3 + $0x38] sm:$0xff] (!%p358_p2)   ;;  %v1465_v17 = vld [vmem:[%s1797_s4 + $0x28] sm:$0xff] (!%p358_p2)   ;;  %v1466_v18 = vld [vmem:[%s1797_s4 + $0x30] sm:$0xff] (!%p358_p2)  }
   0xa   : > { %v1467_v19 = vld [vmem:[%s1797_s4 + $0x38] sm:$0xff] (!%p358_p2)   ;;  %v1468_v34 = vld [vmem:[%s1799_s6] sm:$0xff] (!%p358_p2)   ;;  %v1469_v36 = vld [vmem:[%s1799_s6 + $0x8] sm:$0xff] (!%p358_p2)  }
   0xb   : > { %1320 = vmatpush3.bf16.msra.mxu0 (!%p358_p2), %v1450_v2  ;;  %v1470_v37 = vld [vmem:[%s1799_s6 + $0x10] sm:$0xff] (!%p358_p2)   ;;  %v1471_v38 = vld [vmem:[%s1799_s6 + $0x18] sm:$0xff] (!%p358_p2)   ;;  %v1472_v39 = vld [vmem:[%s1799_s6 + $0x20] sm:$0xff] (!%p358_p2)  }
   0xc   : > { %1321 = vmatprep.subr.bf16.mxu0 (!%p358_p2), %v1501_v1  ;;  %v1473_v40 = vld [vmem:[%s1799_s6 + $0x28] sm:$0xff] (!%p358_p2)   ;;  %v1474_v41 = vld [vmem:[%s1799_s6 + $0x30] sm:$0xff] (!%p358_p2)   ;;  %v1475_v42 = vld [vmem:[%s1799_s6 + $0x38] sm:$0xff] (!%p358_p2)  }
   0xd   : > { %s1806_s18 = smov (!%p407_p3, %s1192_s18), 2  ;;  %v1476_v43 = vld [vmem:[%s1800_s7] sm:$0xff]   ;;  %v1477_v44 = vld [vmem:[%s1800_s7 + $0x8] sm:$0xff]   ;;  %v1478_v45 = vld [vmem:[%s1800_s7 + $0x10] sm:$0xff]  }
   0xe   : > { %s1584_s23 = sshll.u32 %s1806_s18, 3  ;;  %v1479_v46 = vld [vmem:[%s1800_s7 + $0x18] sm:$0xff]   ;;  %v1480_v47 = vld [vmem:[%s1800_s7 + $0x20] sm:$0xff]   ;;  %v1481_v48 = vld [vmem:[%s1800_s7 + $0x28] sm:$0xff]  }
   0xf   : > { %s411_s28 = scalar_lea.vmem %s1793_s0, %s1584_s23  ;;  %s416_s12 = scalar_lea.vmem %s1794_s1, %s1584_s23  ;;  %1322 = vmatpush3.bf16.msra.mxu0 %v1451_v3  ;;  %v1217_v49 = vld [vmem:[%s1798_s5] ss:$0 sm:$0xff]  ;;  %v1482_v59 = vld [vmem:[%s1800_s7 + $0x30] sm:$0xff]   ;;  %v1483_v60 = vld [vmem:[%s1800_s7 + $0x38] sm:$0xff]  }
  0x10   : > { %v1598_v4 = vld [vmem:[%s411_s28] sm:$0xff]   ;;  %s421_s15 = scalar_lea.vmem %s1795_s2, %s1584_s23  ;;  %1323 = vmatprep.subr.bf16.mxu0 %v1501_v1  ;;  %s426_s16 = scalar_lea.vmem %s1804_s11, %s1584_s23 }
  0x11   : > { %v1604_v5 = vld [vmem:[%s416_s12] sm:$0xff]   ;;  %1338 = vmatpush3.bf16.msra.mxu1 %v1598_v4  ;;  %v545_v24 = vunpack.c.l.bf16 %v1598_v4  ;;  %v546_v25 = vunpack.c.h.bf16 %v1598_v4 }
  0x12   : > { %1343 = vmatprep.subr.bf16.mxu1 %v1501_v1  ;;  %v1459_v16 = vld [vmem:[%s421_s15] sm:$0xff]  }
  0x13   : > { %1324 = vmatpush3.bf16.msra.mxu0 %v1452_v6  ;;  %v1484_v6 = vld [vmem:[%s1802_s9] sm:$0xff]  }
  0x14   : > { %1340 = vmatmul.mubr.msk.bf16.vlgmr.msra.gmra.mrb[0].mxu1 %vm558_vm1, %v1604_v5  ;;  %1325 = vmatprep.subr.bf16.mxu0 %v1501_v1 }
  0x15   : > { %1344 = vmatpush3.bf16.msra.mxu1 %v1460_v7  ;;  %1359 = vmatprep.mubr.msk.bf16.mxu1 %vm1502_vm0, %v1501_v1 }
  0x16   : > { %1345 = vmatprep.subr.bf16.mxu1 %v1501_v1 }
  0x17   : > { %1326 = vmatpush3.bf16.msra.mxu0 %v1453_v8  ;;  %v1485_v8 = vld [vmem:[%s1802_s9 + $0x8] sm:$0xff]  }
  0x18   : > { %1327 = vmatprep.subr.bf16.mxu0 %v1501_v1 }
  0x19   : > { %1346 = vmatpush3.bf16.msra.mxu1 %v1461_v9  ;;  %v1486_v9 = vld [vmem:[%s1802_s9 + $0x10] sm:$0xff]  }
  0x1a   : > { %1347 = vmatprep.subr.bf16.mxu1 %v1501_v1 }
  0x1b   : > { %1328 = vmatpush3.bf16.msra.mxu0 %v1454_v10  ;;  %v1487_v10 = vld [vmem:[%s1802_s9 + $0x18] sm:$0xff]  }
  0x1c   : > { %1329 = vmatprep.subr.bf16.mxu0 %v1501_v1 }
  0x1d   : > { %1348 = vmatpush3.bf16.msra.mxu1 %v1462_v11  ;;  %v1488_v11 = vld [vmem:[%s1802_s9 + $0x20] sm:$0xff]  }
  0x1e   : > { %1349 = vmatprep.subr.bf16.mxu1 %v1501_v1 }
  0x1f   : > { %1330 = vmatpush3.bf16.msra.mxu0 %v1455_v12  ;;  %v1489_v12 = vld [vmem:[%s1802_s9 + $0x28] sm:$0xff]  }
  0x20   : > { %1331 = vmatprep.subr.bf16.mxu0 %v1501_v1 }
  0x21   : > { %1350 = vmatpush3.bf16.msra.mxu1 %v1463_v13  ;;  %v1490_v13 = vld [vmem:[%s1802_s9 + $0x30] sm:$0xff]  }
  0x22   : > { %1351 = vmatprep.subr.bf16.mxu1 %v1501_v1 }
  0x23   : > { %1332 = vmatpush3.bf16.msra.mxu0 %v1457_v14  ;;  %v1491_v14 = vld [vmem:[%s1802_s9 + $0x38] sm:$0xff]  }
  0x24   : > { %1389 = vmatprep.subr.bf16.mxu0 %v1501_v1 }
  0x25   : > { %1352 = vmatpush3.bf16.msra.mxu1 %v1464_v15  ;;  %v1235_v15 = vld [vmem:[%s1801_s8] ss:$0 sm:$0xff] }
  0x26   : > { %1353 = vmatprep.subr.bf16.mxu1 %v1501_v1  ;;  %1334 = vmatmul.mubr.bf16.vlgmr.msra.gmra.mrb[0].mxu0 %v1459_v16 }
  0x27   : > { %1405 = vmatprep.mubr.msk.bf16.mxu0 %vm1502_vm0, %v1501_v1  ;;  %1390 = vmatpush3.bf16.msra.mxu0 %v1476_v43 }
  0x28   : > { %1391 = vmatprep.subr.bf16.mxu0 %v1501_v1 }
  0x29   : > { %1354 = vmatpush3.bf16.msra.mxu1 %v1465_v17 }
  0x2a   : > { %1355 = vmatprep.subr.bf16.mxu1 %v1501_v1 }
  0x2b   : > { %1392 = vmatpush3.bf16.msra.mxu0 %v1477_v44 }
  0x2c   : > { %1393 = vmatprep.subr.bf16.mxu0 %v1501_v1 }
  0x2d   : > { %1356 = vmatpush3.bf16.msra.mxu1 %v1466_v18 }
  0x2e   : > { %1357 = vmatprep.subr.bf16.mxu1 %v1501_v1 }
  0x2f   : > { %1394 = vmatpush3.bf16.msra.mxu0 %v1478_v45 }
  0x30   : > { %1395 = vmatprep.subr.bf16.mxu0 %v1501_v1 }
  0x31   : > { %1358 = vmatpush3.bf16.msra.mxu1 %v1467_v19 }
  0x32   : > { %1363 = vmatprep.subr.bf16.mxu1 %v1501_v1 }
  0x33   : > { %1396 = vmatpush3.bf16.msra.mxu0 %v1479_v46 }
  0x34   : > { %1397 = vmatprep.subr.bf16.mxu0 %v1501_v1 }
  0x37   : > { %1398 = vmatpush3.bf16.msra.mxu0 %v1480_v47 }
  0x38   : > { %1399 = vmatprep.subr.bf16.mxu0 %v1501_v1 }
  0x3b   : > { %1400 = vmatpush3.bf16.msra.mxu0 %v1481_v48 }
  0x3c   : > { %1401 = vmatprep.subr.bf16.mxu0 %v1501_v1 }
  0x3f   : > { %1402 = vmatpush3.bf16.msra.mxu0 %v1482_v59 }
  0x40   : > { %1403 = vmatprep.subr.bf16.mxu0 %v1501_v1 }
  0x43   : > { %1404 = vmatpush3.bf16.msra.mxu0 %v1483_v60 }
  0x44   : > { %1409 = vmatprep.subr.bf16.mxu0 %v1501_v1 }
  0xe7   : > { %v596_v20 = vpop.f32.mrb[0].mxu1 }
  0xe8   : > { %v1341_v21 = vpop.f32.mrb[1].mxu1 }
  0xe9   : > { %v599_v22 = vpop.f32.mrb[2].mxu1 }
  0xea   : > { %v1342_v23 = vpop.f32.mrb[3].mxu1 }
  0xf9   : > { %v538_v26 = vpop.f32.mrb[0].mxu0 }
  0xfa   : > { %v1429_v27 = vadd.f32 %v545_v24, %v538_v26  ;;  %v1335_v28 = vpop.f32.mrb[1].mxu0 }
  0xfb   : > { %v541_v29 = vpop.f32.mrb[2].mxu0 }
  0xfc   : > { %v1430_v30 = vadd.f32 %v1429_v27, %v596_v20  ;;  %v1431_v31 = vadd.f32 %v546_v25, %v541_v29  ;;  %v1336_v32 = vpop.f32.mrb[3].mxu0 }
  0xfe   : > { %v1432_v33 = vadd.f32 %v1431_v31, %v599_v22 }
 0x100   : > { %v607_v35 = vpack.c.bf16 %v1432_v33, %v1430_v30 }
 0x102   : > { %1360 = vmatmul.mubr.bf16.vlgmr.msra.gmra.mrb[4].mxu1 %v607_v35 }
 0x103   : > { %1364 = vmatpush3.bf16.msra.mxu1 %v1468_v34  ;;  %1379 = vmatprep.mubr.msk.bf16.mxu1 %vm1502_vm0, %v1501_v1 }
 0x104   : > { %1365 = vmatprep.subr.bf16.mxu1 %v1501_v1 }
 0x107   : > { %1366 = vmatpush3.bf16.msra.mxu1 %v1469_v36 }
 0x108   : > { %1367 = vmatprep.subr.bf16.mxu1 %v1501_v1 }
 0x10b   : > { %1368 = vmatpush3.bf16.msra.mxu1 %v1470_v37 }
 0x10c   : > { %1369 = vmatprep.subr.bf16.mxu1 %v1501_v1 }
 0x10f   : > { %1370 = vmatpush3.bf16.msra.mxu1 %v1471_v38 }
 0x110   : > { %1371 = vmatprep.subr.bf16.mxu1 %v1501_v1 }
 0x113   : > { %1372 = vmatpush3.bf16.msra.mxu1 %v1472_v39 }
 0x114   : > { %1373 = vmatprep.subr.bf16.mxu1 %v1501_v1 }
 0x117   : > { %1374 = vmatpush3.bf16.msra.mxu1 %v1473_v40 }
 0x118   : > { %1375 = vmatprep.subr.bf16.mxu1 %v1501_v1 }
 0x11b   : > { %1376 = vmatpush3.bf16.msra.mxu1 %v1474_v41 }
 0x11c   : > { %1377 = vmatprep.subr.bf16.mxu1 %v1501_v1 }
 0x11f   : > { %1378 = vmatpush3.bf16.msra.mxu1 %v1475_v42 }
 0x120   : > { %1383 = vmatprep.subr.bf16.mxu1 %v1501_v1 }
 0x122   : > { %1380 = vmatmul.mubr.bf16.vlgmr.msra.gmra.mrb[8].mxu1 %v1459_v16 }
 0x123   : > { %1385 = vmatprep.mubr.msk.bf16.mxu1 %vm1502_vm0, %v1501_v1 }
 0x1d5   : > { %v713_v50 = vpop.f32.mrb[4].mxu1 }
 0x1d6   : > { %v714_v51 = vadd.f32 %v1217_v49, %v713_v50  ;;  %v1361_v52 = vpop.f32.mrb[5].mxu1 }
 0x1d7   : > { %v716_v53 = vpop.f32.mrb[6].mxu1 }
 0x1d8   : > { %v717_v54 = vadd.f32 %v1217_v49, %v716_v53  ;;  %v1362_v55 = vpop.f32.mrb[7].mxu1  ;;  %v720_v56 = vmax.f32 %v714_v51, 0.0 }
 0x1da   : > { %v721_v57 = vmax.f32 %v717_v54, 0.0 }
 0x1dc   : > { %v722_v58 = vpack.c.bf16 %v721_v57, %v720_v56 }
 0x1de   : > { %1384 = vmatpush3.bf16.msra.mxu1 %v722_v58  ;;  %v828_v61 = vunpack.c.l.bf16 %v722_v58  ;;  %v829_v2 = vunpack.c.h.bf16 %v722_v58 }
 0x1e1   : > { %1386 = vmatmul.mubr.msk.bf16.vlgmr.msra.gmra.mrb[8].mxu1 %vm558_vm1, %v1604_v5 }
 0x2b4   : > { %v864_v62 = vpop.f32.mrb[8].mxu1 }
 0x2b5   : > { %v871_v63 = vadd.f32 %v864_v62, %v828_v61  ;;  %v1387_v0 = vpop.f32.mrb[9].mxu1 }
 0x2b6   : > { %v867_v3 = vpop.f32.mrb[10].mxu1 }
 0x2b7   : > { %v872_v4 = vadd.f32 %v867_v3, %v829_v2  ;;  %v1388_v5 = vpop.f32.mrb[11].mxu1 }
 0x2b9   : > { %v875_v7 = vpack.c.bf16 %v872_v4, %v871_v63 }
 0x2bb   : > { %1406 = vmatmul.mubr.bf16.vlgmr.msra.gmra.mrb[4].mxu0 %v875_v7 }
 0x2bc   : > { %1410 = vmatpush3.bf16.msra.mxu0 %v1484_v6  ;;  %1425 = vmatprep.mubr.msk.bf16.mxu0 %vm1502_vm0, %v1501_v1 }
 0x2bd   : > { %1411 = vmatprep.subr.bf16.mxu0 %v1501_v1 }
 0x2c0   : > { %1412 = vmatpush3.bf16.msra.mxu0 %v1485_v8 }
 0x2c1   : > { %1413 = vmatprep.subr.bf16.mxu0 %v1501_v1 }
 0x2c4   : > { %1414 = vmatpush3.bf16.msra.mxu0 %v1486_v9 }
 0x2c5   : > { %1415 = vmatprep.subr.bf16.mxu0 %v1501_v1 }
 0x2c8   : > { %1416 = vmatpush3.bf16.msra.mxu0 %v1487_v10 }
 0x2c9   : > { %1417 = vmatprep.subr.bf16.mxu0 %v1501_v1 }
 0x2cc   : > { %1418 = vmatpush3.bf16.msra.mxu0 %v1488_v11 }
 0x2cd   : > { %1419 = vmatprep.subr.bf16.mxu0 %v1501_v1 }
 0x2d0   : > { %1420 = vmatpush3.bf16.msra.mxu0 %v1489_v12 }
 0x2d1   : > { %1421 = vmatprep.subr.bf16.mxu0 %v1501_v1 }
 0x2d4   : > { %1422 = vmatpush3.bf16.msra.mxu0 %v1490_v13 }
 0x2d5   : > { %1423 = vmatprep.subr.bf16.mxu0 %v1501_v1  ;;  %v1244_v1 = vld [vmem:[%s1803_s10] ss:$0 sm:$0xff] }
 0x2d8   : > { %1424 = vmatpush3.bf16.msra.mxu0 %v1491_v14 }
 0x38e   : > { %v981_v16 = vpop.f32.mrb[4].mxu0 }
 0x38f   : > { %v982_v17 = vadd.f32 %v1235_v15, %v981_v16  ;;  %v1407_v18 = vpop.f32.mrb[5].mxu0 }
 0x390   : > { %v984_v19 = vpop.f32.mrb[6].mxu0 }
 0x391   : > { %v985_v20 = vadd.f32 %v1235_v15, %v984_v19  ;;  %v1408_v21 = vpop.f32.mrb[7].mxu0  ;;  %v988_v22 = vmax.f32 %v982_v17, 0.0 }
 0x393   : > { %v989_v23 = vmax.f32 %v985_v20, 0.0 }
 0x395   : > { %v990_v24 = vpack.c.bf16 %v989_v23, %v988_v22 }
 0x397   : > { %1426 = vmatmul.mubr.bf16.vlgmr.msra.gmra.mrb[8].mxu0 %v990_v24 }
 0x46a   : > { %v1096_v25 = vpop.f32.mrb[8].mxu0 }
 0x46b   : > { %v1427_v26 = vpop.f32.mrb[9].mxu0  ;;  %v1097_v28 = vadd.f32 %v1244_v1, %v1096_v25 }
 0x46c   : > { %v1099_v27 = vpop.f32.mrb[10].mxu0 }
 0x46d   : > { %v1100_v29 = vadd.f32 %v1244_v1, %v1099_v27  ;;  %v1428_v30 = vpop.f32.mrb[11].mxu0 }
 0x46f   : > { %v1266_v31 = vpack.c.bf16 %v1100_v29, %v1097_v28 }
 0x471   : > { %1267 = vst [vmem:[%s426_s16] sm:$0xff] %v1266_v31  }
 0x472 PF: > { %s21_s17 = sadd.s32 1, %s1499_s17  }
 0x473   : > { %p18_p4 = scmp.ge.s32.totalorder %s21_s17, 5  }
 0x475   :  { %20 = sbr.rel (!%p18_p4) target bundleno = 1 (0x1), region = 100 }

// kernel: rnn_gnn_forward.3
= control target key start
LH: loop header
LB: loop body
LE: loop exit
PB: predicated region body
PF: predicated region fallthrough
CT: control target
= control target key end

     0   :  { %19 = vsyncpa [#allocation5], 0  ;;  %s2382_s25 = smov 0   ;;  %s2855_s0 = inlined_call_operand.vmem [shape: bf16[3,16,128], index: 0, kind: input, shape index: {}]   ;;  %s2856_s1 = inlined_call_operand.vmem [shape: f32[2,16,128], index: 1, kind: input, shape index: {}]   ;;  %s2857_s2 = inlined_call_operand.vmem [shape: bf16[128,384], index: 2, kind: input, shape index: {}]   ;;  %s2858_s3 = inlined_call_operand.vmem [shape: bf16[128,384], index: 3, kind: input, shape index: {}]   ;;  %s2859_s4 = inlined_call_operand.vmem [shape: f32[1,384], index: 4, kind: input, shape index: {}]   ;;  %s2860_s5 = inlined_call_operand.vmem [shape: f32[1,384], index: 5, kind: input, shape index: {}]   ;;  %s2861_s6 = inlined_call_operand.vmem [shape: bf16[128,384], index: 6, kind: input, shape index: {}]   ;;  %s2862_s7 = inlined_call_operand.vmem [shape: bf16[128,384], index: 7, kind: input, shape index: {}]   ;;  %s2863_s8 = inlined_call_operand.vmem [shape: f32[1,384], index: 8, kind: input, shape index: {}]   ;;  %s2864_s9 = inlined_call_operand.vmem [shape: f32[1,384], index: 9, kind: input, shape index: {}]   ;;  %s2865_s10 = inlined_call_operand.vmem [shape: bf16[128,128], index: 10, kind: input, shape index: {}]   ;;  %s2866_s11 = inlined_call_operand.vmem [shape: f32[1,128], index: 11, kind: input, shape index: {}]   ;;  %s2867_s12 = inlined_call_operand.vmem [shape: f32[16,128], index: 12, kind: output, shape index: {0}]   ;;  %s2868_s13 = inlined_call_operand.hbm [shape: f32[16,128], index: 13, kind: output, shape index: {1}]  }
   0x1 LB: > { %s2388_s26 = sadd.s32 4294967295, %s2302_s25   ;;  %p1771_p0 = scmp.ge.s32.totalorder %s2302_s25, 1  ;;  %s2302_s25 = sphi %s2382_s25, %s25_s25  }
   0x2   : > { %p381_p1 = scmp.lt.s32.totalorder %s2302_s25, 4 }
   0x4   : > { %p382_p2 = pnand %p1771_p0, %p381_p1 }
   0x5   : > { %p420_p3 = scmp.lt.s32.totalorder (!%p382_p2), %s2388_s26, 2  ;;  %p1774_p4 = scmp.ne.s32.totalorder (!%p382_p2), %s2388_s26, 0 }
   0x6   : > { %385 = sbr.rel (%p382_p2) target bundleno = 921 (0x399), region = 68 }
   0xd   : > { %s421_s27 = scalar_select %p420_p3, %s2388_s26, 2 }
   0xe   : > { %429 = sbr.rel (%p1774_p4) target bundleno = 21 (0x15), region = 72  ;;  %v430_v0 = vld [vmem:[%s2856_s1] sm:$0xff] (!%p1774_p4)  ;;  %v431_v1 = vld [vmem:[%s2856_s1 + $0x8] sm:$0xff] (!%p1774_p4)  ;;  %v1775_v2 = vld [vmem:[%s2856_s1 + $0x10] sm:$0xff] (!%p1774_p4) }
   0xf   : > { %s1897_s28 = sshll.u32 %s421_s27, 3  ;;  %432 = vst [vmem:[#allocation2] sm:$0xff] (!%p1774_p4), %v430_v0  ;;  %433 = vst [vmem:[#allocation2 + $0x8] sm:$0xff] (!%p1774_p4), %v431_v1  ;;  %v1776_v3 = vld [vmem:[%s2856_s1 + $0x18] sm:$0xff] (!%p1774_p4) }
  0x10   : > { %s2397_s14 = scalar_lea.vmem %s2855_s0, %s1897_s28  ;;  %437 = vst [vmem:[#allocation3] sm:$0xff] (!%p1774_p4), %v1775_v2  ;;  %438 = vst [vmem:[#allocation3 + $0x8] sm:$0xff] (!%p1774_p4), %v1776_v3 }
  0x15 PF: > { %v2089_v4 = vld [vmem:[%s2857_s2 + $0x4] ss:$12 sps:$4 sm:$0xff]   ;;  %v2091_v5 = vld [vmem:[%s2857_s2] ss:$12 sps:$4 sm:$0xff]   ;;  %v2304_v6 = vmov 0.0   ;;  %v2305_v7 = vmov 0  }
  0x16   : > { %1943 = vmatprep.subr.bf16.mxu1 %v2304_v6  ;;  %658 = vmatprep.mubr.bf16.mxu0 %v2305_v7  ;;  %v2092_v8 = vld [vmem:[%s2857_s2 + $0x1c] ss:$12 sps:$4 sm:$0xff]   ;;  %vm2306_vm0 = vmmov 0   ;;  %v2094_v9 = vld [vmem:[%s2857_s2 + $0x18] ss:$12 sps:$4 sm:$0xff]  }
  0x17   : > { %626 = vmatprep.subr.bf16.mxu0 %v2089_v4  ;;  %1959 = vmatprep.mubr.msk.bf16.mxu1 %vm2306_vm0, %v2304_v6  ;;  %v2095_v10 = vld [vmem:[%s2857_s2 + $0x34] ss:$12 sps:$4 sm:$0xff]   ;;  %v2097_v11 = vld [vmem:[%s2857_s2 + $0x30] ss:$12 sps:$4 sm:$0xff]   ;;  %v2098_v12 = vld [vmem:[%s2857_s2 + $0x4c] ss:$12 sps:$4 sm:$0xff]  }
  0x18   : > { %627 = vmatpush1.bf16.msra.mxu0 %v2091_v5  ;;  %v2109_v13 = vld [vmem:[%s2857_s2 + $0x8] ss:$12 sps:$4 sm:$0xff]   ;;  %v2101_v15 = vld [vmem:[%s2857_s2 + $0x64] ss:$12 sps:$4 sm:$0xff]   ;;  %v2113_v16 = vld [vmem:[%s2857_s2 + $0x20] ss:$12 sps:$4 sm:$0xff]  }
  0x19   : > { %628 = vmatprep.subr.bf16.mxu0 %v2092_v8  ;;  %v2100_v14 = vld [vmem:[%s2857_s2 + $0x48] ss:$12 sps:$4 sm:$0xff]   ;;  %1944 = vmatpush3.bf16.msra.mxu1 %v2109_v13  ;;  %v2103_v17 = vld [vmem:[%s2857_s2 + $0x60] ss:$12 sps:$4 sm:$0xff]   ;;  %v2115_v18 = vld [vmem:[%s2857_s2 + $0x38] ss:$12 sps:$4 sm:$0xff]  }
  0x1a   : > { %1945 = vmatprep.subr.bf16.mxu1 %v2304_v6  ;;  %v2104_v19 = vld [vmem:[%s2857_s2 + $0x7c] ss:$12 sps:$4 sm:$0xff]   ;;  %v2106_v20 = vld [vmem:[%s2857_s2 + $0x78] ss:$12 sps:$4 sm:$0xff]   ;;  %v2107_v22 = vld [vmem:[%s2857_s2 + $0x94] ss:$12 sps:$4 sm:$0xff]  }
  0x1b   : > { %v2120_v21 = vld [vmem:[%s2857_s2 + $0x50] ss:$12 sps:$4 sm:$0xff]   ;;  %v2124_v24 = vld [vmem:[%s2857_s2 + $0x68] ss:$12 sps:$4 sm:$0xff]   ;;  %v2111_v25 = vld [vmem:[%s2857_s2 + $0xac] ss:$12 sps:$4 sm:$0xff]  }
  0x1c   : > { %629 = vmatpush1.bf16.msra.mxu0 %v2094_v9  ;;  %v2110_v23 = vld [vmem:[%s2857_s2 + $0x90] ss:$12 sps:$4 sm:$0xff]   ;;  %v2114_v26 = vld [vmem:[%s2857_s2 + $0xa8] ss:$12 sps:$4 sm:$0xff]   ;;  %v2128_v27 = vld [vmem:[%s2857_s2 + $0x80] ss:$12 sps:$4 sm:$0xff]  }
  0x1d   : > { %630 = vmatprep.subr.bf16.mxu0 %v2095_v10  ;;  %1946 = vmatpush3.bf16.msra.mxu1 %v2113_v16  ;;  %v2118_v28 = vld [vmem:[%s2858_s3 + $0x4] ss:$12 sps:$4 sm:$0xff]   ;;  %v2116_v29 = vld [vmem:[%s2858_s3] ss:$12 sps:$4 sm:$0xff]   ;;  %v2123_v32 = vld [vmem:[%s2858_s3 + $0x1c] ss:$12 sps:$4 sm:$0xff]  }
  0x1e   : > { %1947 = vmatprep.subr.bf16.mxu1 %v2304_v6  ;;  %v2119_v30 = vld [vmem:[%s2397_s14] sm:$0xff]   ;;  %v2136_v34 = vld [vmem:[%s2857_s2 + $0xb0] ss:$12 sps:$4 sm:$0xff]   ;;  %v2131_v37 = vld [vmem:[%s2858_s3 + $0x4c] ss:$12 sps:$4 sm:$0xff]  }
  0x1f   : > { %v2132_v31 = vld [vmem:[%s2857_s2 + $0x98] ss:$12 sps:$4 sm:$0xff]   ;;  %v2127_v35 = vld [vmem:[%s2858_s3 + $0x34] ss:$12 sps:$4 sm:$0xff]   ;;  %v2125_v36 = vld [vmem:[%s2858_s3 + $0x30] ss:$12 sps:$4 sm:$0xff]  }
  0x20   : > { %631 = vmatpush1.bf16.msra.mxu0 %v2097_v11  ;;  %v2121_v33 = vld [vmem:[%s2858_s3 + $0x18] ss:$12 sps:$4 sm:$0xff]   ;;  %v2143_v38 = vld [vmem:[%s2858_s3 + $0x8] ss:$12 sps:$4 sm:$0xff]   ;;  %v2147_v40 = vld [vmem:[%s2858_s3 + $0x20] ss:$12 sps:$4 sm:$0xff]  }
  0x21   : > { %632 = vmatprep.subr.bf16.mxu0 %v2098_v12  ;;  %1948 = vmatpush3.bf16.msra.mxu1 %v2115_v18  ;;  %v2129_v39 = vld [vmem:[%s2858_s3 + $0x48] ss:$12 sps:$4 sm:$0xff]   ;;  %v2135_v41 = vld [vmem:[%s2858_s3 + $0x64] ss:$12 sps:$4 sm:$0xff]   ;;  %v2133_v42 = vld [vmem:[%s2858_s3 + $0x60] ss:$12 sps:$4 sm:$0xff]  }
  0x22   : > { %1949 = vmatprep.subr.bf16.mxu1 %v2304_v6  ;;  %v2148_v43 = vld [vmem:[%s2858_s3 + $0x38] ss:$12 sps:$4 sm:$0xff]   ;;  %v2139_v44 = vld [vmem:[%s2858_s3 + $0x7c] ss:$12 sps:$4 sm:$0xff]   ;;  %v2142_v47 = vld [vmem:[%s2858_s3 + $0x94] ss:$12 sps:$4 sm:$0xff]  }
  0x23   : > { %v2137_v45 = vld [vmem:[%s2858_s3 + $0x78] ss:$12 sps:$4 sm:$0xff]   ;;  %v2149_v46 = vld [vmem:[%s2858_s3 + $0x50] ss:$12 sps:$4 sm:$0xff]   ;;  %v2150_v49 = vld [vmem:[%s2858_s3 + $0x68] ss:$12 sps:$4 sm:$0xff]  }
  0x24   : > { %633 = vmatpush1.bf16.msra.mxu0 %v2100_v14  ;;  %v2140_v48 = vld [vmem:[%s2858_s3 + $0x90] ss:$12 sps:$4 sm:$0xff]   ;;  %v2146_v50 = vld [vmem:[%s2858_s3 + $0xac] ss:$12 sps:$4 sm:$0xff]   ;;  %v2144_v51 = vld [vmem:[%s2858_s3 + $0xa8] ss:$12 sps:$4 sm:$0xff]  }
  0x25   : > { %634 = vmatprep.subr.bf16.mxu0 %v2101_v15  ;;  %1950 = vmatpush3.bf16.msra.mxu1 %v2120_v21  ;;  %v2569_v52 = vld [vmem:[#allocation2] sm:$0xff]  ;;  %v2571_v53 = vld [vmem:[#allocation2 + $0x8] sm:$0xff]  ;;  %v2153_v57 = vld [vmem:[%s2858_s3 + $0xb0] ss:$12 sps:$4 sm:$0xff]  }
  0x26   : > { %1951 = vmatprep.subr.bf16.mxu1 %v2304_v6  ;;  %v2151_v54 = vld [vmem:[%s2858_s3 + $0x80] ss:$12 sps:$4 sm:$0xff]   ;;  %v710_v55 = vpack.c.bf16 %v2571_v53, %v2569_v52  ;;  %v2152_v56 = vld [vmem:[%s2858_s3 + $0x98] ss:$12 sps:$4 sm:$0xff]   ;;  %v2157_v60 = vld [vmem:[%s2861_s6 + $0x8] ss:$12 sps:$4 sm:$0xff]  }
  0x27   : > { %v2156_v58 = vld [vmem:[%s2861_s6 + $0x4] ss:$12 sps:$4 sm:$0xff]   ;;  %v2154_v59 = vld [vmem:[%s2861_s6] ss:$12 sps:$4 sm:$0xff]   ;;  %v2160_v61 = vld [vmem:[%s2861_s6 + $0x1c] ss:$12 sps:$4 sm:$0xff]  }
  0x28   : > { %635 = vmatpush1.bf16.msra.mxu0 %v2103_v17  ;;  %v2158_v62 = vld [vmem:[%s2861_s6 + $0x18] ss:$12 sps:$4 sm:$0xff]   ;;  %v2161_v63 = vld [vmem:[%s2861_s6 + $0x20] ss:$12 sps:$4 sm:$0xff]   ;;  %v2162_v1 = vld [vmem:[%s2861_s6 + $0x30] ss:$12 sps:$4 sm:$0xff]  }
  0x29   : > { %636 = vmatprep.subr.bf16.mxu0 %v2104_v19  ;;  %1952 = vmatpush3.bf16.msra.mxu1 %v2124_v24  ;;  %v2164_v0 = vld [vmem:[%s2861_s6 + $0x34] ss:$12 sps:$4 sm:$0xff]   ;;  %v2165_v2 = vld [vmem:[%s2861_s6 + $0x38] ss:$12 sps:$4 sm:$0xff]   ;;  %v2169_v5 = vld [vmem:[%s2861_s6 + $0x50] ss:$12 sps:$4 sm:$0xff]  }
  0x2a   : > { %1953 = vmatprep.subr.bf16.mxu1 %v2304_v6  ;;  %v2168_v3 = vld [vmem:[%s2861_s6 + $0x4c] ss:$12 sps:$4 sm:$0xff]   ;;  %v2166_v4 = vld [vmem:[%s2861_s6 + $0x48] ss:$12 sps:$4 sm:$0xff]   ;;  %v2172_v8 = vld [vmem:[%s2861_s6 + $0x64] ss:$12 sps:$4 sm:$0xff]  }
  0x2b   : > { %v2170_v9 = vld [vmem:[%s2861_s6 + $0x60] ss:$12 sps:$4 sm:$0xff]   ;;  %v2173_v10 = vld [vmem:[%s2861_s6 + $0x68] ss:$12 sps:$4 sm:$0xff]   ;;  %v2174_v12 = vld [vmem:[%s2861_s6 + $0x78] ss:$12 sps:$4 sm:$0xff]  }
  0x2c   : > { %637 = vmatpush1.bf16.msra.mxu0 %v2106_v20  ;;  %v2176_v11 = vld [vmem:[%s2861_s6 + $0x7c] ss:$12 sps:$4 sm:$0xff]   ;;  %v2177_v13 = vld [vmem:[%s2861_s6 + $0x80] ss:$12 sps:$4 sm:$0xff]   ;;  %v2181_v16 = vld [vmem:[%s2861_s6 + $0x98] ss:$12 sps:$4 sm:$0xff]  }
  0x2d   : > { %638 = vmatprep.subr.bf16.mxu0 %v2107_v22  ;;  %1954 = vmatpush3.bf16.msra.mxu1 %v2128_v27  ;;  %v2180_v14 = vld [vmem:[%s2861_s6 + $0x94] ss:$12 sps:$4 sm:$0xff]   ;;  %v2178_v15 = vld [vmem:[%s2861_s6 + $0x90] ss:$12 sps:$4 sm:$0xff]   ;;  %v2184_v17 = vld [vmem:[%s2861_s6 + $0xac] ss:$12 sps:$4 sm:$0xff]  }
  0x2e   : > { %1955 = vmatprep.subr.bf16.mxu1 %v2304_v6  ;;  %v2182_v18 = vld [vmem:[%s2861_s6 + $0xa8] ss:$12 sps:$4 sm:$0xff]   ;;  %v2185_v19 = vld [vmem:[%s2861_s6 + $0xb0] ss:$12 sps:$4 sm:$0xff]  }
  0x2f   : > { %v2188_v20 = vld [vmem:[%s2862_s7 + $0x4] ss:$12 sps:$4 sm:$0xff]  }
  0x30   : > { %639 = vmatpush1.bf16.msra.mxu0 %v2110_v23 }
  0x31   : > { %640 = vmatprep.subr.bf16.mxu0 %v2111_v25  ;;  %1956 = vmatpush3.bf16.msra.mxu1 %v2132_v31  ;;  %v477_v25 = vlaneseq }
  0x32   : > { %1957 = vmatprep.subr.bf16.mxu1 %v2304_v6 }
  0x34   : > { %641 = vmatpush1.bf16.msra.mxu0 %v2114_v26  ;;  %v478_v26 = vshrl.u32 %v477_v25, 7 }
  0x35   : > { %888 = vmatprep.subr.bf16.mxu0 %v2118_v28  ;;  %1958 = vmatpush3.bf16.msra.mxu1 %v2136_v34  ;;  %v743_v28 = vld [vmem:[%s2860_s5] sm:$0x7] }
  0x36   : > { %1963 = vmatprep.subr.bf16.mxu1 %v2304_v6  ;;  %v2674_v27 = vsub.s32 0, %v478_v26 }
  0x37   : > { %659 = vmatmul.mubr.bf16.vlgmr.msra.gmra.mrb[0].mxu0 %v2119_v30 }
  0x38   : > { %889 = vmatpush1.bf16.msra.mxu0 %v2116_v29  ;;  %920 = vmatprep.mubr.bf16.mxu0 %v2305_v7  ;;  %v475_v29 = vld [vmem:[%s2859_s4] sm:$0x7] }
  0x39   : > { %890 = vmatprep.subr.bf16.mxu0 %v2123_v32  ;;  %1960 = vmatmul.mubr.bf16.vlgmr.msra.gmra.mrb[0].mxu1 %v2119_v30  ;;  %v2682_v30 = vsub.s32 1, %v478_v26  ;;  %v480_v31 = vrot.slane %v475_v29, %v2674_v27  ;;  %v748_v32 = vrot.slane %v743_v28, %v2674_v27 }
  0x3a   : > { %1964 = vmatpush3.bf16.msra.mxu1 %v2143_v38  ;;  %1979 = vmatprep.mubr.msk.bf16.mxu1 %vm2306_vm0, %v2304_v6 }
  0x3b   : > { %1965 = vmatprep.subr.bf16.mxu1 %v2304_v6  ;;  %v752_v34 = vrot.slane %v743_v28, %v2682_v30 }
  0x3c   : > { %891 = vmatpush1.bf16.msra.mxu0 %v2121_v33  ;;  %v484_v33 = vrot.slane %v475_v29, %v2682_v30 }
  0x3d   : > { %892 = vmatprep.subr.bf16.mxu0 %v2127_v35  ;;  %v2043_v35 = vadd.f32 %v748_v32, %v480_v31  ;;  %v2211_v31 = vld [vmem:[%s2862_s7 + $0x20] ss:$12 sps:$4 sm:$0xff]  }
  0x3e   : > { %1966 = vmatpush3.bf16.msra.mxu1 %v2147_v40  ;;  %v2194_v32 = vld [vmem:[%s2862_s7 + $0x34] ss:$12 sps:$4 sm:$0xff]  }
  0x3f   : > { %1967 = vmatprep.subr.bf16.mxu1 %v2304_v6 }
  0x40   : > { %893 = vmatpush1.bf16.msra.mxu0 %v2125_v36 }
  0x41   : > { %894 = vmatprep.subr.bf16.mxu0 %v2131_v37  ;;  %v2045_v37 = vadd.f32 %v752_v34, %v484_v33  ;;  %v2192_v33 = vld [vmem:[%s2862_s7 + $0x30] ss:$12 sps:$4 sm:$0xff]   ;;  %v2212_v34 = vld [vmem:[%s2862_s7 + $0x38] ss:$12 sps:$4 sm:$0xff]  }
  0x42   : > { %1968 = vmatpush3.bf16.msra.mxu1 %v2148_v43 }
  0x43   : > { %1969 = vmatprep.subr.bf16.mxu1 %v2304_v6 }
  0x44   : > { %895 = vmatpush1.bf16.msra.mxu0 %v2129_v39 }
  0x45   : > { %896 = vmatprep.subr.bf16.mxu0 %v2135_v41 }
  0x46   : > { %1970 = vmatpush3.bf16.msra.mxu1 %v2149_v46 }
  0x47   : > { %1971 = vmatprep.subr.bf16.mxu1 %v2304_v6 }
  0x48   : > { %897 = vmatpush1.bf16.msra.mxu0 %v2133_v42 }
  0x49   : > { %898 = vmatprep.subr.bf16.mxu0 %v2139_v44 }
  0x4a   : > { %1972 = vmatpush3.bf16.msra.mxu1 %v2150_v49 }
  0x4b   : > { %1973 = vmatprep.subr.bf16.mxu1 %v2304_v6 }
  0x4c   : > { %899 = vmatpush1.bf16.msra.mxu0 %v2137_v45 }
  0x4d   : > { %900 = vmatprep.subr.bf16.mxu0 %v2142_v47 }
  0x4e   : > { %1974 = vmatpush3.bf16.msra.mxu1 %v2151_v54 }
  0x4f   : > { %1975 = vmatprep.subr.bf16.mxu1 %v2304_v6 }
  0x50   : > { %901 = vmatpush1.bf16.msra.mxu0 %v2140_v48 }
  0x51   : > { %902 = vmatprep.subr.bf16.mxu0 %v2146_v50 }
  0x52   : > { %1976 = vmatpush3.bf16.msra.mxu1 %v2152_v56 }
  0x53   : > { %1977 = vmatprep.subr.bf16.mxu1 %v2304_v6 }
  0x54   : > { %903 = vmatpush1.bf16.msra.mxu0 %v2144_v51 }
  0x55   : > { %1196 = vmatprep.subr.bf16.mxu0 %v2156_v58 }
  0x56   : > { %1978 = vmatpush3.bf16.msra.mxu1 %v2153_v57 }
  0x57   : > { %921 = vmatmul.mubr.bf16.vlgmr.msra.gmra.mrb[0].mxu0 %v710_v55  ;;  %1983 = vmatprep.subr.bf16.mxu1 %v2304_v6 }
  0x58   : > { %1228 = vmatprep.mubr.bf16.mxu0 %v2305_v7  ;;  %1197 = vmatpush1.bf16.msra.mxu0 %v2154_v59  ;;  %v2688_v59 = vsub.s32 2, %v478_v26  ;;  %v2186_v26 = vld [vmem:[%s2862_s7] ss:$12 sps:$4 sm:$0xff]  }
  0x59   : > { %1980 = vmatmul.mubr.bf16.vlgmr.msra.gmra.mrb[4].mxu1 %v710_v55  ;;  %1198 = vmatprep.subr.bf16.mxu0 %v2160_v61 }
  0x5a   : > { %1999 = vmatprep.mubr.msk.bf16.mxu1 %vm2306_vm0, %v2304_v6  ;;  %1984 = vmatpush3.bf16.msra.mxu1 %v2157_v60  ;;  %v756_v60 = vrot.slane %v743_v28, %v2688_v59  ;;  %v2207_v28 = vld [vmem:[%s2862_s7 + $0x8] ss:$12 sps:$4 sm:$0xff]  }
  0x5b   : > { %1985 = vmatprep.subr.bf16.mxu1 %v2304_v6 }
  0x5c   : > { %1199 = vmatpush1.bf16.msra.mxu0 %v2158_v62 }
  0x5d   : > { %1200 = vmatprep.subr.bf16.mxu0 %v2164_v0 }
  0x5e   : > { %1986 = vmatpush3.bf16.msra.mxu1 %v2161_v63  ;;  %v488_v63 = vrot.slane %v475_v29, %v2688_v59 }
  0x5f   : > { %1987 = vmatprep.subr.bf16.mxu1 %v2304_v6 }
  0x60   : > { %1201 = vmatpush1.bf16.msra.mxu0 %v2162_v1 }
  0x61   : > { %1202 = vmatprep.subr.bf16.mxu0 %v2168_v3 }
  0x62   : > { %1988 = vmatpush3.bf16.msra.mxu1 %v2165_v2 }
  0x63   : > { %1989 = vmatprep.subr.bf16.mxu1 %v2304_v6 }
  0x64   : > { %1203 = vmatpush1.bf16.msra.mxu0 %v2166_v4 }
  0x65   : > { %1204 = vmatprep.subr.bf16.mxu0 %v2172_v8 }
  0x66   : > { %1990 = vmatpush3.bf16.msra.mxu1 %v2169_v5 }
  0x67   : > { %1991 = vmatprep.subr.bf16.mxu1 %v2304_v6 }
  0x68   : > { %1205 = vmatpush1.bf16.msra.mxu0 %v2170_v9 }
  0x69   : > { %1206 = vmatprep.subr.bf16.mxu0 %v2176_v11 }
  0x6a   : > { %1992 = vmatpush3.bf16.msra.mxu1 %v2173_v10 }
  0x6b   : > { %1993 = vmatprep.subr.bf16.mxu1 %v2304_v6 }
  0x6c   : > { %1207 = vmatpush1.bf16.msra.mxu0 %v2174_v12 }
  0x6d   : > { %1208 = vmatprep.subr.bf16.mxu0 %v2180_v14 }
  0x6e   : > { %1994 = vmatpush3.bf16.msra.mxu1 %v2177_v13 }
  0x6f   : > { %1995 = vmatprep.subr.bf16.mxu1 %v2304_v6 }
  0x70   : > { %1209 = vmatpush1.bf16.msra.mxu0 %v2178_v15 }
  0x71   : > { %1210 = vmatprep.subr.bf16.mxu0 %v2184_v17 }
  0x72   : > { %1996 = vmatpush3.bf16.msra.mxu1 %v2181_v16 }
  0x73   : > { %1997 = vmatprep.subr.bf16.mxu1 %v2304_v6 }
  0x74   : > { %1211 = vmatpush1.bf16.msra.mxu0 %v2182_v18 }
  0x75   : > { %1458 = vmatprep.subr.bf16.mxu0 %v2188_v20 }
  0x76   : > { %1998 = vmatpush3.bf16.msra.mxu1 %v2185_v19 }
  0x77   : > { %2003 = vmatprep.subr.bf16.mxu1 %v2304_v6 }
 0x10c   : > { %v703_v21 = vpop.f32.mrb[0].mxu1 }
 0x10d   : > { %v1961_v22 = vpop.f32.mrb[1].mxu1  ;;  %v704_v4 = vadd.f32 %v703_v21, %v488_v63 }
 0x10e   : > { %v706_v23 = vpop.f32.mrb[2].mxu1 }
 0x10f   : > { %v1962_v24 = vpop.f32.mrb[3].mxu1  ;;  %v707_v10 = vadd.f32 %v706_v23, %v488_v63 }
 0x12a   : > { %v922_v36 = vpop.f32.mrb[0].mxu0 }
 0x12b   : > { %v2044_v38 = vadd.f32 %v2043_v35, %v922_v36  ;;  %v924_v39 = vpop.f32.mrb[1].mxu0  ;;  %v2213_v36 = vld [vmem:[%s2862_s7 + $0x50] ss:$12 sps:$4 sm:$0xff]  }
 0x12c   : > { %v926_v40 = vpop.f32.mrb[2].mxu0  ;;  %v2046_v44 = vadd.f32 %v2045_v37, %v924_v39  ;;  %v965_v48 = vpop.f32.mrb[4].mxu1  ;;  %v2214_v39 = vld [vmem:[%s2862_s7 + $0x68] ss:$12 sps:$4 sm:$0xff]  }
 0x12d   : > { %v1826_v41 = vmul.f32 -1.442695, %v2044_v38  ;;  %v2048_v42 = vadd.f32 %v2043_v35, %v926_v40  ;;  %v928_v43 = vpop.f32.mrb[3].mxu0  ;;  %v1981_v49 = vpop.f32.mrb[5].mxu1  ;;  %v966_v1 = vadd.f32 %v965_v48, %v756_v60  ;;  %v2197_v35 = vld [vmem:[%s2862_s7 + $0x4c] ss:$12 sps:$4 sm:$0xff]  }
 0x12e   : > { %v2050_v46 = vadd.f32 %v2045_v37, %v928_v43  ;;  %v1828_v47 = vmul.f32 -1.442695, %v2046_v44  ;;  %v968_v51 = vpop.f32.mrb[6].mxu1  ;;  %v2200_v37 = vld [vmem:[%s2862_s7 + $0x64] ss:$12 sps:$4 sm:$0xff]   ;;  %v2771_v49 = vld [vmem:[#allocation3 + $0x8] sm:$0xff] }
 0x12f   : > { %2218 = vpow2.f32 %v1826_v41  ;;  %v1827_v45 = vmul.f32 -1.442695, %v2048_v42  ;;  %v1982_v54 = vpop.f32.mrb[7].mxu1  ;;  %v969_v8 = vadd.f32 %v968_v51, %v756_v60  ;;  %v2198_v38 = vld [vmem:[%s2862_s7 + $0x60] ss:$12 sps:$4 sm:$0xff]   ;;  %v2769_v48 = vld [vmem:[#allocation3] sm:$0xff] }
 0x130   : > { %v1829_v50 = vmul.f32 -1.442695, %v2050_v46  ;;  %v2203_v40 = vld [vmem:[%s2862_s7 + $0x7c] ss:$12 sps:$4 sm:$0xff]   ;;  %v2201_v41 = vld [vmem:[%s2862_s7 + $0x78] ss:$12 sps:$4 sm:$0xff]   ;;  %v1280_v51 = vpack.c.bf16 %v2771_v49, %v2769_v48 }
 0x131   : > { %2220 = vpow2.f32 %v1827_v45  ;;  %v2215_v42 = vld [vmem:[%s2862_s7 + $0x80] ss:$12 sps:$4 sm:$0xff]   ;;  %v2204_v44 = vld [vmem:[%s2862_s7 + $0x90] ss:$12 sps:$4 sm:$0xff]   ;;  %v2216_v45 = vld [vmem:[%s2862_s7 + $0x98] ss:$12 sps:$4 sm:$0xff]  }
 0x132   : > { %2222 = vpow2.f32 %v1828_v47  ;;  %v2206_v43 = vld [vmem:[%s2862_s7 + $0x94] ss:$12 sps:$4 sm:$0xff]   ;;  %v2210_v46 = vld [vmem:[%s2862_s7 + $0xac] ss:$12 sps:$4 sm:$0xff]  }
 0x133   : > { %2224 = vpow2.f32 %v1829_v50  ;;  %v2208_v47 = vld [vmem:[%s2862_s7 + $0xa8] ss:$12 sps:$4 sm:$0xff]   ;;  %v2217_v50 = vld [vmem:[%s2862_s7 + $0xb0] ss:$12 sps:$4 sm:$0xff]   ;;  %v1051_v60 = vld [vmem:[%s2863_s8] sm:$0x7] }
 0x139   : > { %v2219_v55 = vpop.eup %2218 }
 0x13a   : > { %v980_v56 = vadd.f32 1.0, %v2219_v55 }
 0x13b   : > { %v2221_v57 = vpop.eup %2220 }
 0x13c   : > { %2226 = vrcp.f32 %v980_v56  ;;  %v981_v58 = vadd.f32 1.0, %v2221_v57  ;;  %v2223_v61 = vpop.eup %2222 }
 0x13d   : > { %v2225_v62 = vpop.eup %2224  ;;  %v994_v0 = vadd.f32 1.0, %v2223_v61 }
 0x13e   : > { %2228 = vrcp.f32 %v981_v58  ;;  %v995_v2 = vadd.f32 1.0, %v2225_v62  ;;  %v1313_v58 = vld [vmem:[%s2864_s9] sm:$0x7]  ;;  %v1060_v62 = vrot.slane %v1051_v60, %v2682_v30 }
 0x13f   : > { %2230 = vrcp.f32 %v994_v0  ;;  %v1318_v61 = vrot.slane %v1313_v58, %v2674_v27  ;;  %v1322_v63 = vrot.slane %v1313_v58, %v2682_v30 }
 0x140   : > { %2232 = vrcp.f32 %v995_v2 }
 0x141   : > { %v2053_v2 = vadd.f32 %v1322_v63, %v1060_v62 }
 0x146   : > { %v2227_v3 = vpop.eup %2226 }
 0x147   : > { %v1000_v5 = vmul.f32 %v2227_v3, %v966_v1 }
 0x148   : > { %v2229_v9 = vpop.eup %2228 }
 0x149   : > { %v1002_v11 = vadd.f32 %v1000_v5, %v704_v4  ;;  %v1001_v12 = vmul.f32 %v2229_v9, %v969_v8  ;;  %v2231_v14 = vpop.eup %2230 }
 0x14a   : > { %v2233_v15 = vpop.eup %2232  ;;  %v1006_v16 = vsub.f32 1.0, %v2231_v14  ;;  %v1010_v20 = vmul.f32 %v2231_v14, %v2569_v52  ;;  %v2191_v52 = vld [vmem:[%s2862_s7 + $0x1c] ss:$12 sps:$4 sm:$0xff]  }
 0x14b   : > { %2234 = vtanh.f32 %v1002_v11  ;;  %v1003_v13 = vadd.f32 %v1001_v12, %v707_v10  ;;  %v1007_v18 = vsub.f32 1.0, %v2233_v15  ;;  %v1011_v24 = vmul.f32 %v2233_v15, %v2571_v53  ;;  %v2189_v53 = vld [vmem:[%s2862_s7 + $0x18] ss:$12 sps:$4 sm:$0xff]  }
 0x14d   : > { %2236 = vtanh.f32 %v1003_v13 }
 0x155   : > { %v2235_v17 = vpop.eup %2234 }
 0x156   : > { %v1008_v19 = vmul.f32 %v2235_v17, %v1006_v16 }
 0x157   : > { %v2237_v21 = vpop.eup %2236 }
 0x158   : > { %v1009_v22 = vmul.f32 %v2237_v21, %v1007_v18  ;;  %v1012_v25 = vadd.f32 %v1010_v20, %v1008_v19 }
 0x15a   : > { %v1013_v23 = vadd.f32 %v1011_v24, %v1009_v22  ;;  %1014 = vst [vmem:[#allocation2] sm:$0xff] %v1012_v25  ;;  %v1326_v22 = vrot.slane %v1313_v58, %v2688_v59 }
 0x15c   : > { %1015 = vst [vmem:[#allocation2 + $0x8] sm:$0xff] %v1013_v23  ;;  %v1016_v29 = vpack.c.bf16 %v1013_v23, %v1012_v25  ;;  %v1064_v23 = vrot.slane %v1051_v60, %v2688_v59 }
 0x15e   : > { %1229 = vmatmul.mubr.bf16.vlgmr.msra.gmra.mrb[4].mxu0 %v1016_v29  ;;  %2000 = vmatmul.mubr.bf16.vlgmr.msra.gmra.mrb[8].mxu1 %v1016_v29 }
 0x15f   : > { %1459 = vmatpush1.bf16.msra.mxu0 %v2186_v26  ;;  %2004 = vmatpush3.bf16.msra.mxu1 %v2207_v28 }
 0x160   : > { %1460 = vmatprep.subr.bf16.mxu0 %v2191_v52  ;;  %2005 = vmatprep.subr.bf16.mxu1 %v2304_v6 }
 0x161   : > { %1490 = vmatprep.mubr.bf16.mxu0 %v2305_v7  ;;  %2019 = vmatprep.mubr.msk.bf16.mxu1 %vm2306_vm0, %v2304_v6  ;;  %v2195_v7 = vld [vmem:[%s2862_s7 + $0x48] ss:$12 sps:$4 sm:$0xff]  }
 0x163   : > { %1461 = vmatpush1.bf16.msra.mxu0 %v2189_v53  ;;  %2006 = vmatpush3.bf16.msra.mxu1 %v2211_v31 }
 0x164   : > { %1462 = vmatprep.subr.bf16.mxu0 %v2194_v32  ;;  %2007 = vmatprep.subr.bf16.mxu1 %v2304_v6 }
 0x167   : > { %1463 = vmatpush1.bf16.msra.mxu0 %v2192_v33  ;;  %2008 = vmatpush3.bf16.msra.mxu1 %v2212_v34 }
 0x168   : > { %1464 = vmatprep.subr.bf16.mxu0 %v2197_v35  ;;  %2009 = vmatprep.subr.bf16.mxu1 %v2304_v6 }
 0x16b   : > { %1465 = vmatpush1.bf16.msra.mxu0 %v2195_v7  ;;  %2010 = vmatpush3.bf16.msra.mxu1 %v2213_v36 }
 0x16c   : > { %1466 = vmatprep.subr.bf16.mxu0 %v2200_v37  ;;  %2011 = vmatprep.subr.bf16.mxu1 %v2304_v6 }
 0x16f   : > { %1467 = vmatpush1.bf16.msra.mxu0 %v2198_v38  ;;  %2012 = vmatpush3.bf16.msra.mxu1 %v2214_v39 }
 0x170   : > { %1468 = vmatprep.subr.bf16.mxu0 %v2203_v40  ;;  %2013 = vmatprep.subr.bf16.mxu1 %v2304_v6 }
 0x173   : > { %1469 = vmatpush1.bf16.msra.mxu0 %v2201_v41  ;;  %2014 = vmatpush3.bf16.msra.mxu1 %v2215_v42 }
 0x174   : > { %1470 = vmatprep.subr.bf16.mxu0 %v2206_v43  ;;  %2015 = vmatprep.subr.bf16.mxu1 %v2304_v6 }
 0x177   : > { %1471 = vmatpush1.bf16.msra.mxu0 %v2204_v44  ;;  %2016 = vmatpush3.bf16.msra.mxu1 %v2216_v45 }
 0x178   : > { %1472 = vmatprep.subr.bf16.mxu0 %v2210_v46  ;;  %2017 = vmatprep.subr.bf16.mxu1 %v2304_v6  ;;  %v1056_v6 = vrot.slane %v1051_v60, %v2674_v27 }
 0x17a   : > { %v2051_v0 = vadd.f32 %v1318_v61, %v1056_v6 }
 0x17b   : > { %1473 = vmatpush1.bf16.msra.mxu0 %v2208_v47  ;;  %2018 = vmatpush3.bf16.msra.mxu1 %v2217_v50  ;;  %v1589_v50 = vld [vmem:[#allocation2] sm:$0xff] (!%p1774_p4) }
 0x17c   : > { %1591 = vst [vmem:[#allocation4] sm:$0xff] (!%p1774_p4), %v1589_v50 }
 0x17e   : > { %1491 = vmatmul.mubr.bf16.vlgmr.msra.gmra.mrb[4].mxu0 %v1280_v51  ;;  %2020 = vmatmul.mubr.bf16.vlgmr.msra.gmra.mrb[12].mxu1 %v1280_v51  ;;  %v1590_v51 = vld [vmem:[#allocation2 + $0x8] sm:$0xff] (!%p1774_p4) }
 0x17f   : > { %1592 = vst [vmem:[#allocation4 + $0x8] sm:$0xff] (!%p1774_p4), %v1590_v51 }
 0x231   : > { %v1273_v54 = vpop.f32.mrb[8].mxu1 }
 0x232   : > { %v2001_v55 = vpop.f32.mrb[9].mxu1  ;;  %v1274_v53 = vadd.f32 %v1273_v54, %v1064_v23 }
 0x233   : > { %v1276_v56 = vpop.f32.mrb[10].mxu1 }
 0x234   : > { %v2002_v57 = vpop.f32.mrb[11].mxu1  ;;  %v1277_v34 = vadd.f32 %v1276_v56, %v1064_v23 }
 0x251   : > { %v1492_v1 = vpop.f32.mrb[4].mxu0  ;;  %v1535_v3 = vpop.f32.mrb[12].mxu1 }
 0x252   : > { %v2052_v4 = vadd.f32 %v2051_v0, %v1492_v1  ;;  %v1494_v5 = vpop.f32.mrb[5].mxu0  ;;  %v2021_v8 = vpop.f32.mrb[13].mxu1  ;;  %v1536_v28 = vadd.f32 %v1535_v3, %v1326_v22 }
 0x253   : > { %v1496_v9 = vpop.f32.mrb[6].mxu0  ;;  %v1538_v10 = vpop.f32.mrb[14].mxu1  ;;  %v2054_v15 = vadd.f32 %v2053_v2, %v1494_v5 }
 0x254   : > { %v1878_v11 = vmul.f32 -1.442695, %v2052_v4  ;;  %v2056_v12 = vadd.f32 %v2051_v0, %v1496_v9  ;;  %v1498_v13 = vpop.f32.mrb[7].mxu0  ;;  %v2022_v14 = vpop.f32.mrb[15].mxu1  ;;  %v1539_v32 = vadd.f32 %v1538_v10, %v1326_v22 }
 0x255   : > { %v2058_v16 = vadd.f32 %v2053_v2, %v1498_v13  ;;  %v1880_v17 = vmul.f32 -1.442695, %v2054_v15 }
 0x256   : > { %2238 = vpow2.f32 %v1878_v11  ;;  %v1879_v27 = vmul.f32 -1.442695, %v2056_v12 }
 0x257   : > { %v1881_v30 = vmul.f32 -1.442695, %v2058_v16 }
 0x258   : > { %2240 = vpow2.f32 %v1879_v27 }
 0x259   : > { %2242 = vpow2.f32 %v1880_v17 }
 0x25a   : > { %2244 = vpow2.f32 %v1881_v30 }
 0x260   : > { %v2239_v18 = vpop.eup %2238 }
 0x261   : > { %v1550_v19 = vadd.f32 1.0, %v2239_v18 }
 0x262   : > { %v2241_v20 = vpop.eup %2240 }
 0x263   : > { %2246 = vrcp.f32 %v1550_v19  ;;  %v1551_v21 = vadd.f32 1.0, %v2241_v20  ;;  %v2243_v24 = vpop.eup %2242 }
 0x264   : > { %v2245_v25 = vpop.eup %2244  ;;  %v1564_v26 = vadd.f32 1.0, %v2243_v24 }
 0x265   : > { %2248 = vrcp.f32 %v1551_v21  ;;  %v1565_v29 = vadd.f32 1.0, %v2245_v25 }
 0x266   : > { %2250 = vrcp.f32 %v1564_v26 }
 0x267   : > { %2252 = vrcp.f32 %v1565_v29 }
 0x26d   : > { %v2247_v52 = vpop.eup %2246 }
 0x26e   : > { %v1570_v31 = vmul.f32 %v2247_v52, %v1536_v28 }
 0x26f   : > { %v2249_v33 = vpop.eup %2248 }
 0x270   : > { %v1572_v35 = vadd.f32 %v1570_v31, %v1274_v53  ;;  %v1571_v7 = vmul.f32 %v2249_v33, %v1539_v32  ;;  %v2251_v37 = vpop.eup %2250 }
 0x271   : > { %v2253_v38 = vpop.eup %2252  ;;  %v1576_v39 = vsub.f32 1.0, %v2251_v37  ;;  %v1580_v40 = vmul.f32 %v2251_v37, %v2769_v48 }
 0x272   : > { %2254 = vtanh.f32 %v1572_v35  ;;  %v1573_v36 = vadd.f32 %v1571_v7, %v1277_v34  ;;  %v1577_v41 = vsub.f32 1.0, %v2253_v38  ;;  %v1581_v44 = vmul.f32 %v2253_v38, %v2771_v49 }
 0x274   : > { %2256 = vtanh.f32 %v1573_v36 }
 0x27c   : > { %v2255_v59 = vpop.eup %2254 }
 0x27d   : > { %v1578_v42 = vmul.f32 %v2255_v59, %v1576_v39  ;;  %1588 = sbr.rel (%p1774_p4) target bundleno = 644 (0x284), region = 76 }
 0x27e   : > { %v2257_v43 = vpop.eup %2256 }
 0x27f   : > { %v1582_v45 = vadd.f32 %v1580_v40, %v1578_v42  ;;  %v1579_v46 = vmul.f32 %v2257_v43, %v1577_v41 }
 0x281   : > { %1584 = vst [vmem:[#allocation3] sm:$0xff] %v1582_v45  ;;  %v1583_v47 = vadd.f32 %v1581_v44, %v1579_v46 }
 0x283   : > { %1585 = vst [vmem:[#allocation3 + $0x8] sm:$0xff] %v1583_v47 }
 0x284 PF: > { %p1883_p5 = scmp.ne.s32.totalorder %s2388_s26, 2 }
 0x285   : > { %v2258_v48 = vld [vmem:[%s2865_s10] sm:$0xff] (!%p1883_p5)   ;;  %v2307_v49 = vmov (!%p1883_p5), 0.0   ;;  %v2259_v54 = vld [vmem:[%s2865_s10 + $0x8] sm:$0xff] (!%p1883_p5)   ;;  %vm2308_vm1 = vmmov (!%p1883_p5), 0   ;;  %v2260_v55 = vld [vmem:[%s2865_s10 + $0x10] sm:$0xff] (!%p1883_p5)  }
 0x286   : > { %1596 = sbr.rel (%p1883_p5) target bundleno = 895 (0x37f), region = 80  ;;  %2023 = vmatprep.subr.bf16.mxu0 (!%p1883_p5), %v2307_v49  ;;  %2039 = vmatprep.mubr.msk.bf16.mxu0 (!%p1883_p5), %vm2308_vm1, %v2307_v49  ;;  %v2261_v56 = vld [vmem:[%s2865_s10 + $0x18] sm:$0xff] (!%p1883_p5)   ;;  %v2262_v57 = vld [vmem:[%s2865_s10 + $0x20] sm:$0xff] (!%p1883_p5)   ;;  %v2263_v58 = vld [vmem:[%s2865_s10 + $0x28] sm:$0xff] (!%p1883_p5)  }
 0x287   : > { %2024 = vmatpush3.bf16.msra.mxu0 (!%p1883_p5), %v2258_v48  ;;  %v2264_v60 = vld [vmem:[%s2865_s10 + $0x30] sm:$0xff] (!%p1883_p5)   ;;  %v2265_v6 = vld [vmem:[%s2865_s10 + $0x38] sm:$0xff] (!%p1883_p5)   ;;  %v1884_v0 = vld [vmem:[%s2866_s11] ss:$0 sm:$0xff] (!%p1883_p5) }
 0x288   : > { %2025 = vmatprep.subr.bf16.mxu0 (!%p1883_p5), %v2307_v49  ;;  %v1597_v61 = vld [vmem:[#allocation3] sm:$0xff] (!%p1883_p5) }
 0x28a   : > { %v1598_v62 = vld [vmem:[#allocation3 + $0x8] sm:$0xff] (!%p1883_p5) }
 0x28b   : > { %2026 = vmatpush3.bf16.msra.mxu0 (!%p1883_p5), %v2259_v54  ;;  %v1599_v63 = vpack.c.bf16 (!%p1883_p5), %v1598_v62, %v1597_v61 }
 0x28c   : > { %2027 = vmatprep.subr.bf16.mxu0 (!%p1883_p5), %v2307_v49 }
 0x28f   : > { %2028 = vmatpush3.bf16.msra.mxu0 %v2260_v55 }
 0x290   : > { %2029 = vmatprep.subr.bf16.mxu0 %v2307_v49 }
 0x293   : > { %2030 = vmatpush3.bf16.msra.mxu0 %v2261_v56 }
 0x294   : > { %2031 = vmatprep.subr.bf16.mxu0 %v2307_v49 }
 0x297   : > { %2032 = vmatpush3.bf16.msra.mxu0 %v2262_v57 }
 0x298   : > { %2033 = vmatprep.subr.bf16.mxu0 %v2307_v49 }
 0x29b   : > { %2034 = vmatpush3.bf16.msra.mxu0 %v2263_v58 }
 0x29c   : > { %2035 = vmatprep.subr.bf16.mxu0 %v2307_v49 }
 0x29f   : > { %2036 = vmatpush3.bf16.msra.mxu0 %v2264_v60 }
 0x2a0   : > { %2037 = vmatprep.subr.bf16.mxu0 %v2307_v49 }
 0x2a3   : > { %2038 = vmatpush3.bf16.msra.mxu0 %v2265_v6 }
 0x2a6   : > { %2040 = vmatmul.mubr.bf16.vlgmr.msra.gmra.mrb[0].mxu0 %v1599_v63 }
 0x379   : > { %v1705_v1 = vpop.f32.mrb[0].mxu0 }
 0x37a   : > { %v1706_v2 = vadd.f32 %v1884_v0, %v1705_v1  ;;  %v2041_v3 = vpop.f32.mrb[1].mxu0 }
 0x37b   : > { %v1708_v4 = vpop.f32.mrb[2].mxu0 }
 0x37c   : > { %1712 = vst [vmem:[%s2867_s12] sm:$0xff] %v1706_v2  ;;  %v1709_v5 = vadd.f32 %v1884_v0, %v1708_v4  ;;  %v2042_v8 = vpop.f32.mrb[3].mxu0 }
 0x37e   : > { %1713 = vst [vmem:[%s2867_s12 + $0x8] sm:$0xff] %v1709_v5 }
 0x37f PF: > { %p2071_p6 = scmp.eq.s32.totalorder %s2388_s26, 2  ;;  %s2309_s23 = smov [#allocation4]  }
 0x380   : > { %s1723_s24 = sshll.u32 %s2309_s23, 4  ;;  %s1724_s24 = int_to_ptr.vmem [resolvable:$true] %s1723_s24 }
 0x381   : > { %s2266_s27 = scalar_lea.vmem %s1724_s24, 256  ;;  %p2273_p10 = scmp.lt.s32.totalorder %s1724_s24, %s1724_s24 }
 0x382   : > { %p2267_p7 = scmp.ne.s32.totalorder %s1724_s24, %s2266_s27  ;;  %p2274_p11 = scmp.lt.s32.totalorder %s2266_s27, %s2266_s27 }
 0x384   : > { %p2268_p8 = pnand %p2267_p7, %p2071_p6  ;;  %p2275_p12 = por %p2274_p11, %p2273_p10 }
 0x386   : > { %p2269_p9 = pneg %p2268_p8 }
 0x388   : > { %p2276_p13 = pnand %p2275_p12, %p2269_p9 }
 0x38a   : > { %2279 = shalt.err (!%p2276_p13)
}
 0x38b   : > { %s2280_s30 = scalar_lea.hbm %s2868_s13, 256 }
 0x38c   : > { %p2281_p0 = scmp.ne.s32.totalorder %s2868_s13, %s2280_s30  ;;  %p2286_p3 = scmp.lt.u32.totalorder %s2280_s30, %s2868_s13 }
 0x38e   : > { %p2282_p1 = pnand %p2281_p0, %p2071_p6 }
 0x390   : > { %p2283_p2 = pneg %p2282_p1 }
 0x392   : > { %p2288_p4 = pnand %p2286_p3, %p2283_p2 }
 0x394   : > { %2291 = shalt.err (!%p2288_p4)
}
 0x395   : > { %s2310_s19 = smov 128   ;;  %s2311_s20 = smov 8  }
 0x396   : > { %2068 = dma.vmem_to_hbm [thread:$0]  (%p2071_p6), %s1724_s24, 256, %s2868_s13, [#allocation5], %s2310_s19, %s2310_s19, %s2311_s20  }
 0x397   : > { %2297 = dma.done.wait (%p2071_p6), [#allocation5], 256  }
 0x398   : > { %2299 = vsyncadd (%p2071_p6), [#allocation5], 4294967040 }
 0x399 PF: > { %s25_s25 = sadd.s32 1, %s2302_s25  }
 0x39a   : > { %p22_p5 = scmp.ge.s32.totalorder %s25_s25, 5  }
 0x39c   :  { %24 = sbr.rel (!%p22_p5) target bundleno = 1 (0x1), region = 116 }
 0x3a3   :  { %1742 = vsyncpa [#allocation5], 1 }
 0x3a4   :  { %1744 = vsyncpa [#allocation5 + $0x1], 1 }

// kernel: rnn_gnn_forward.2
= control target key start
LH: loop header
LB: loop body
LE: loop exit
PB: predicated region body
PF: predicated region fallthrough
CT: control target
= control target key end

     0   :  { %s1563_s17 = smov 0   ;;  %s1793_s0 = inlined_call_operand.vmem [shape: bf16[3,16,128], index: 0, kind: input, shape index: {}]   ;;  %s1794_s1 = inlined_call_operand.vmem [shape: bf16[3,16,16], index: 1, kind: input, shape index: {}]   ;;  %s1795_s2 = inlined_call_operand.vmem [shape: bf16[3,16,128], index: 2, kind: input, shape index: {}]   ;;  %s1796_s3 = inlined_call_operand.vmem [shape: bf16[128,128], index: 3, kind: input, shape index: {}]   ;;  %s1797_s4 = inlined_call_operand.vmem [shape: bf16[128,128], index: 4, kind: input, shape index: {}]   ;;  %s1798_s5 = inlined_call_operand.vmem [shape: f32[1,128], index: 5, kind: input, shape index: {}]   ;;  %s1799_s6 = inlined_call_operand.vmem [shape: bf16[128,128], index: 6, kind: input, shape index: {}]   ;;  %s1800_s7 = inlined_call_operand.vmem [shape: bf16[128,128], index: 7, kind: input, shape index: {}]   ;;  %s1801_s8 = inlined_call_operand.vmem [shape: f32[1,128], index: 8, kind: input, shape index: {}]   ;;  %s1802_s9 = inlined_call_operand.vmem [shape: bf16[128,128], index: 9, kind: input, shape index: {}]   ;;  %s1803_s10 = inlined_call_operand.vmem [shape: f32[1,128], index: 10, kind: input, shape index: {}]   ;;  %s1804_s11 = inlined_call_operand.vmem [shape: bf16[3,16,128], index: 11, kind: output, shape index: {}]  }
   0x1 LB: > { %s1192_s18 = sadd.s32 4294967295, %s1499_s17   ;;  %p1196_p0 = scmp.ge.s32.totalorder %s1499_s17, 1  ;;  %s1499_s17 = sphi %s1563_s17, %s21_s17  }
   0x2   : > { %p357_p1 = scmp.lt.s32.totalorder %s1499_s17, 4 }
   0x4   : > { %p358_p2 = pnand %p1196_p0, %p357_p1 }
   0x5   : > { %v1449_v0 = vld [vmem:[%s1796_s3] sm:$0xff] (!%p358_p2)   ;;  %v1501_v1 = vmov (!%p358_p2), 0.0   ;;  %p407_p3 = scmp.lt.s32.totalorder (!%p358_p2), %s1192_s18, 2  ;;  %v1450_v2 = vld [vmem:[%s1796_s3 + $0x8] sm:$0xff] (!%p358_p2)   ;;  %vm1502_vm0 = vmmov (!%p358_p2), 0   ;;  %v1451_v3 = vld [vmem:[%s1796_s3 + $0x10] sm:$0xff] (!%p358_p2)  }
   0x6   : > { %361 = sbr.rel (%p358_p2) target bundleno = 1138 (0x472), region = 64  ;;  %1317 = vmatprep.subr.bf16.mxu0 (!%p358_p2), %v1501_v1  ;;  %1337 = vmatprep.subr.bf16.mxu1 (!%p358_p2), %v1501_v1  ;;  %v1452_v6 = vld [vmem:[%s1796_s3 + $0x18] sm:$0xff] (!%p358_p2)   ;;  %vm558_vm1 = vcmask (!%p358_p2), 130048   ;;  %v1460_v7 = vld [vmem:[%s1797_s4] sm:$0xff] (!%p358_p2)   ;;  %v1461_v9 = vld [vmem:[%s1797_s4 + $0x8] sm:$0xff] (!%p358_p2)  }
   0x7   : > { %1318 = vmatpush3.bf16.msra.mxu0 (!%p358_p2), %v1449_v0  ;;  %1339 = vmatprep.mubr.msk.bf16.mxu1 (!%p358_p2), %vm1502_vm0, %v1501_v1  ;;  %v1453_v8 = vld [vmem:[%s1796_s3 + $0x20] sm:$0xff] (!%p358_p2)   ;;  %v1454_v10 = vld [vmem:[%s1796_s3 + $0x28] sm:$0xff] (!%p358_p2)   ;;  %v1462_v11 = vld [vmem:[%s1797_s4 + $0x10] sm:$0xff] (!%p358_p2)  }
   0x8   : > { %1319 = vmatprep.subr.bf16.mxu0 (!%p358_p2), %v1501_v1  ;;  %1333 = vmatprep.mubr.msk.bf16.mxu0 (!%p358_p2), %vm1502_vm0, %v1501_v1  ;;  %v1455_v12 = vld [vmem:[%s1796_s3 + $0x30] sm:$0xff] (!%p358_p2)   ;;  %v1463_v13 = vld [vmem:[%s1797_s4 + $0x18] sm:$0xff] (!%p358_p2)   ;;  %v1464_v15 = vld [vmem:[%s1797_s4 + $0x20] sm:$0xff] (!%p358_p2)  }
   0x9   : > { %v1457_v14 = vld [vmem:[%s1796_s3 + $0x38] sm:$0xff] (!%p358_p2)   ;;  %v1465_v17 = vld [vmem:[%s1797_s4 + $0x28] sm:$0xff] (!%p358_p2)   ;;  %v1466_v18 = vld [vmem:[%s1797_s4 + $0x30] sm:$0xff] (!%p358_p2)  }
   0xa   : > { %v1467_v19 = vld [vmem:[%s1797_s4 + $0x38] sm:$0xff] (!%p358_p2)   ;;  %v1468_v34 = vld [vmem:[%s1799_s6] sm:$0xff] (!%p358_p2)   ;;  %v1469_v36 = vld [vmem:[%s1799_s6 + $0x8] sm:$0xff] (!%p358_p2)  }
   0xb   : > { %1320 = vmatpush3.bf16.msra.mxu0 (!%p358_p2), %v1450_v2  ;;  %v1470_v37 = vld [vmem:[%s1799_s6 + $0x10] sm:$0xff] (!%p358_p2)   ;;  %v1471_v38 = vld [vmem:[%s1799_s6 + $0x18] sm:$0xff] (!%p358_p2)   ;;  %v1472_v39 = vld [vmem:[%s1799_s6 + $0x20] sm:$0xff] (!%p358_p2)  }
   0xc   : > { %1321 = vmatprep.subr.bf16.mxu0 (!%p358_p2), %v1501_v1  ;;  %v1473_v40 = vld [vmem:[%s1799_s6 + $0x28] sm:$0xff] (!%p358_p2)   ;;  %v1474_v41 = vld [vmem:[%s1799_s6 + $0x30] sm:$0xff] (!%p358_p2)   ;;  %v1475_v42 = vld [vmem:[%s1799_s6 + $0x38] sm:$0xff] (!%p358_p2)  }
   0xd   : > { %s1806_s18 = smov (!%p407_p3, %s1192_s18), 2  ;;  %v1476_v43 = vld [vmem:[%s1800_s7] sm:$0xff]   ;;  %v1477_v44 = vld [vmem:[%s1800_s7 + $0x8] sm:$0xff]   ;;  %v1478_v45 = vld [vmem:[%s1800_s7 + $0x10] sm:$0xff]  }
   0xe   : > { %s1584_s23 = sshll.u32 %s1806_s18, 3  ;;  %v1479_v46 = vld [vmem:[%s1800_s7 + $0x18] sm:$0xff]   ;;  %v1480_v47 = vld [vmem:[%s1800_s7 + $0x20] sm:$0xff]   ;;  %v1481_v48 = vld [vmem:[%s1800_s7 + $0x28] sm:$0xff]  }
   0xf   : > { %s411_s28 = scalar_lea.vmem %s1793_s0, %s1584_s23  ;;  %s416_s12 = scalar_lea.vmem %s1794_s1, %s1584_s23  ;;  %1322 = vmatpush3.bf16.msra.mxu0 %v1451_v3  ;;  %v1217_v49 = vld [vmem:[%s1798_s5] ss:$0 sm:$0xff]  ;;  %v1482_v59 = vld [vmem:[%s1800_s7 + $0x30] sm:$0xff]   ;;  %v1483_v60 = vld [vmem:[%s1800_s7 + $0x38] sm:$0xff]  }
  0x10   : > { %v1598_v4 = vld [vmem:[%s411_s28] sm:$0xff]   ;;  %s421_s15 = scalar_lea.vmem %s1795_s2, %s1584_s23  ;;  %1323 = vmatprep.subr.bf16.mxu0 %v1501_v1  ;;  %s426_s16 = scalar_lea.vmem %s1804_s11, %s1584_s23 }
  0x11   : > { %v1604_v5 = vld [vmem:[%s416_s12] sm:$0xff]   ;;  %1338 = vmatpush3.bf16.msra.mxu1 %v1598_v4  ;;  %v545_v24 = vunpack.c.l.bf16 %v1598_v4  ;;  %v546_v25 = vunpack.c.h.bf16 %v1598_v4 }
  0x12   : > { %1343 = vmatprep.subr.bf16.mxu1 %v1501_v1  ;;  %v1459_v16 = vld [vmem:[%s421_s15] sm:$0xff]  }
  0x13   : > { %1324 = vmatpush3.bf16.msra.mxu0 %v1452_v6  ;;  %v1484_v6 = vld [vmem:[%s1802_s9] sm:$0xff]  }
  0x14   : > { %1340 = vmatmul.mubr.msk.bf16.vlgmr.msra.gmra.mrb[0].mxu1 %vm558_vm1, %v1604_v5  ;;  %1325 = vmatprep.subr.bf16.mxu0 %v1501_v1 }
  0x15   : > { %1344 = vmatpush3.bf16.msra.mxu1 %v1460_v7  ;;  %1359 = vmatprep.mubr.msk.bf16.mxu1 %vm1502_vm0, %v1501_v1 }
  0x16   : > { %1345 = vmatprep.subr.bf16.mxu1 %v1501_v1 }
  0x17   : > { %1326 = vmatpush3.bf16.msra.mxu0 %v1453_v8  ;;  %v1485_v8 = vld [vmem:[%s1802_s9 + $0x8] sm:$0xff]  }
  0x18   : > { %1327 = vmatprep.subr.bf16.mxu0 %v1501_v1 }
  0x19   : > { %1346 = vmatpush3.bf16.msra.mxu1 %v1461_v9  ;;  %v1486_v9 = vld [vmem:[%s1802_s9 + $0x10] sm:$0xff]  }
  0x1a   : > { %1347 = vmatprep.subr.bf16.mxu1 %v1501_v1 }
  0x1b   : > { %1328 = vmatpush3.bf16.msra.mxu0 %v1454_v10  ;;  %v1487_v10 = vld [vmem:[%s1802_s9 + $0x18] sm:$0xff]  }
  0x1c   : > { %1329 = vmatprep.subr.bf16.mxu0 %v1501_v1 }
  0x1d   : > { %1348 = vmatpush3.bf16.msra.mxu1 %v1462_v11  ;;  %v1488_v11 = vld [vmem:[%s1802_s9 + $0x20] sm:$0xff]  }
  0x1e   : > { %1349 = vmatprep.subr.bf16.mxu1 %v1501_v1 }
  0x1f   : > { %1330 = vmatpush3.bf16.msra.mxu0 %v1455_v12  ;;  %v1489_v12 = vld [vmem:[%s1802_s9 + $0x28] sm:$0xff]  }
  0x20   : > { %1331 = vmatprep.subr.bf16.mxu0 %v1501_v1 }
  0x21   : > { %1350 = vmatpush3.bf16.msra.mxu1 %v1463_v13  ;;  %v1490_v13 = vld [vmem:[%s1802_s9 + $0x30] sm:$0xff]  }
  0x22   : > { %1351 = vmatprep.subr.bf16.mxu1 %v1501_v1 }
  0x23   : > { %1332 = vmatpush3.bf16.msra.mxu0 %v1457_v14  ;;  %v1491_v14 = vld [vmem:[%s1802_s9 + $0x38] sm:$0xff]  }
  0x24   : > { %1389 = vmatprep.subr.bf16.mxu0 %v1501_v1 }
  0x25   : > { %1352 = vmatpush3.bf16.msra.mxu1 %v1464_v15  ;;  %v1235_v15 = vld [vmem:[%s1801_s8] ss:$0 sm:$0xff] }
  0x26   : > { %1353 = vmatprep.subr.bf16.mxu1 %v1501_v1  ;;  %1334 = vmatmul.mubr.bf16.vlgmr.msra.gmra.mrb[0].mxu0 %v1459_v16 }
  0x27   : > { %1405 = vmatprep.mubr.msk.bf16.mxu0 %vm1502_vm0, %v1501_v1  ;;  %1390 = vmatpush3.bf16.msra.mxu0 %v1476_v43 }
  0x28   : > { %1391 = vmatprep.subr.bf16.mxu0 %v1501_v1 }
  0x29   : > { %1354 = vmatpush3.bf16.msra.mxu1 %v1465_v17 }
  0x2a   : > { %1355 = vmatprep.subr.bf16.mxu1 %v1501_v1 }
  0x2b   : > { %1392 = vmatpush3.bf16.msra.mxu0 %v1477_v44 }
  0x2c   : > { %1393 = vmatprep.subr.bf16.mxu0 %v1501_v1 }
  0x2d   : > { %1356 = vmatpush3.bf16.msra.mxu1 %v1466_v18 }
  0x2e   : > { %1357 = vmatprep.subr.bf16.mxu1 %v1501_v1 }
  0x2f   : > { %1394 = vmatpush3.bf16.msra.mxu0 %v1478_v45 }
  0x30   : > { %1395 = vmatprep.subr.bf16.mxu0 %v1501_v1 }
  0x31   : > { %1358 = vmatpush3.bf16.msra.mxu1 %v1467_v19 }
  0x32   : > { %1363 = vmatprep.subr.bf16.mxu1 %v1501_v1 }
  0x33   : > { %1396 = vmatpush3.bf16.msra.mxu0 %v1479_v46 }
  0x34   : > { %1397 = vmatprep.subr.bf16.mxu0 %v1501_v1 }
  0x37   : > { %1398 = vmatpush3.bf16.msra.mxu0 %v1480_v47 }
  0x38   : > { %1399 = vmatprep.subr.bf16.mxu0 %v1501_v1 }
  0x3b   : > { %1400 = vmatpush3.bf16.msra.mxu0 %v1481_v48 }
  0x3c   : > { %1401 = vmatprep.subr.bf16.mxu0 %v1501_v1 }
  0x3f   : > { %1402 = vmatpush3.bf16.msra.mxu0 %v1482_v59 }
  0x40   : > { %1403 = vmatprep.subr.bf16.mxu0 %v1501_v1 }
  0x43   : > { %1404 = vmatpush3.bf16.msra.mxu0 %v1483_v60 }
  0x44   : > { %1409 = vmatprep.subr.bf16.mxu0 %v1501_v1 }
  0xe7   : > { %v596_v20 = vpop.f32.mrb[0].mxu1 }
  0xe8   : > { %v1341_v21 = vpop.f32.mrb[1].mxu1 }
  0xe9   : > { %v599_v22 = vpop.f32.mrb[2].mxu1 }
  0xea   : > { %v1342_v23 = vpop.f32.mrb[3].mxu1 }
  0xf9   : > { %v538_v26 = vpop.f32.mrb[0].mxu0 }
  0xfa   : > { %v1429_v27 = vadd.f32 %v545_v24, %v538_v26  ;;  %v1335_v28 = vpop.f32.mrb[1].mxu0 }
  0xfb   : > { %v541_v29 = vpop.f32.mrb[2].mxu0 }
  0xfc   : > { %v1430_v30 = vadd.f32 %v1429_v27, %v596_v20  ;;  %v1431_v31 = vadd.f32 %v546_v25, %v541_v29  ;;  %v1336_v32 = vpop.f32.mrb[3].mxu0 }
  0xfe   : > { %v1432_v33 = vadd.f32 %v1431_v31, %v599_v22 }
 0x100   : > { %v607_v35 = vpack.c.bf16 %v1432_v33, %v1430_v30 }
 0x102   : > { %1360 = vmatmul.mubr.bf16.vlgmr.msra.gmra.mrb[4].mxu1 %v607_v35 }
 0x103   : > { %1364 = vmatpush3.bf16.msra.mxu1 %v1468_v34  ;;  %1379 = vmatprep.mubr.msk.bf16.mxu1 %vm1502_vm0, %v1501_v1 }
 0x104   : > { %1365 = vmatprep.subr.bf16.mxu1 %v1501_v1 }
 0x107   : > { %1366 = vmatpush3.bf16.msra.mxu1 %v1469_v36 }
 0x108   : > { %1367 = vmatprep.subr.bf16.mxu1 %v1501_v1 }
 0x10b   : > { %1368 = vmatpush3.bf16.msra.mxu1 %v1470_v37 }
 0x10c   : > { %1369 = vmatprep.subr.bf16.mxu1 %v1501_v1 }
 0x10f   : > { %1370 = vmatpush3.bf16.msra.mxu1 %v1471_v38 }
 0x110   : > { %1371 = vmatprep.subr.bf16.mxu1 %v1501_v1 }
 0x113   : > { %1372 = vmatpush3.bf16.msra.mxu1 %v1472_v39 }
 0x114   : > { %1373 = vmatprep.subr.bf16.mxu1 %v1501_v1 }
 0x117   : > { %1374 = vmatpush3.bf16.msra.mxu1 %v1473_v40 }
 0x118   : > { %1375 = vmatprep.subr.bf16.mxu1 %v1501_v1 }
 0x11b   : > { %1376 = vmatpush3.bf16.msra.mxu1 %v1474_v41 }
 0x11c   : > { %1377 = vmatprep.subr.bf16.mxu1 %v1501_v1 }
 0x11f   : > { %1378 = vmatpush3.bf16.msra.mxu1 %v1475_v42 }
 0x120   : > { %1383 = vmatprep.subr.bf16.mxu1 %v1501_v1 }
 0x122   : > { %1380 = vmatmul.mubr.bf16.vlgmr.msra.gmra.mrb[8].mxu1 %v1459_v16 }
 0x123   : > { %1385 = vmatprep.mubr.msk.bf16.mxu1 %vm1502_vm0, %v1501_v1 }
 0x1d5   : > { %v713_v50 = vpop.f32.mrb[4].mxu1 }
 0x1d6   : > { %v714_v51 = vadd.f32 %v1217_v49, %v713_v50  ;;  %v1361_v52 = vpop.f32.mrb[5].mxu1 }
 0x1d7   : > { %v716_v53 = vpop.f32.mrb[6].mxu1 }
 0x1d8   : > { %v717_v54 = vadd.f32 %v1217_v49, %v716_v53  ;;  %v1362_v55 = vpop.f32.mrb[7].mxu1  ;;  %v720_v56 = vmax.f32 %v714_v51, 0.0 }
 0x1da   : > { %v721_v57 = vmax.f32 %v717_v54, 0.0 }
 0x1dc   : > { %v722_v58 = vpack.c.bf16 %v721_v57, %v720_v56 }
 0x1de   : > { %1384 = vmatpush3.bf16.msra.mxu1 %v722_v58  ;;  %v828_v61 = vunpack.c.l.bf16 %v722_v58  ;;  %v829_v2 = vunpack.c.h.bf16 %v722_v58 }
 0x1e1   : > { %1386 = vmatmul.mubr.msk.bf16.vlgmr.msra.gmra.mrb[8].mxu1 %vm558_vm1, %v1604_v5 }
 0x2b4   : > { %v864_v62 = vpop.f32.mrb[8].mxu1 }
 0x2b5   : > { %v871_v63 = vadd.f32 %v864_v62, %v828_v61  ;;  %v1387_v0 = vpop.f32.mrb[9].mxu1 }
 0x2b6   : > { %v867_v3 = vpop.f32.mrb[10].mxu1 }
 0x2b7   : > { %v872_v4 = vadd.f32 %v867_v3, %v829_v2  ;;  %v1388_v5 = vpop.f32.mrb[11].mxu1 }
 0x2b9   : > { %v875_v7 = vpack.c.bf16 %v872_v4, %v871_v63 }
 0x2bb   : > { %1406 = vmatmul.mubr.bf16.vlgmr.msra.gmra.mrb[4].mxu0 %v875_v7 }
 0x2bc   : > { %1410 = vmatpush3.bf16.msra.mxu0 %v1484_v6  ;;  %1425 = vmatprep.mubr.msk.bf16.mxu0 %vm1502_vm0, %v1501_v1 }
 0x2bd   : > { %1411 = vmatprep.subr.bf16.mxu0 %v1501_v1 }
 0x2c0   : > { %1412 = vmatpush3.bf16.msra.mxu0 %v1485_v8 }
 0x2c1   : > { %1413 = vmatprep.subr.bf16.mxu0 %v1501_v1 }
 0x2c4   : > { %1414 = vmatpush3.bf16.msra.mxu0 %v1486_v9 }
 0x2c5   : > { %1415 = vmatprep.subr.bf16.mxu0 %v1501_v1 }
 0x2c8   : > { %1416 = vmatpush3.bf16.msra.mxu0 %v1487_v10 }
 0x2c9   : > { %1417 = vmatprep.subr.bf16.mxu0 %v1501_v1 }
 0x2cc   : > { %1418 = vmatpush3.bf16.msra.mxu0 %v1488_v11 }
 0x2cd   : > { %1419 = vmatprep.subr.bf16.mxu0 %v1501_v1 }
 0x2d0   : > { %1420 = vmatpush3.bf16.msra.mxu0 %v1489_v12 }
 0x2d1   : > { %1421 = vmatprep.subr.bf16.mxu0 %v1501_v1 }
 0x2d4   : > { %1422 = vmatpush3.bf16.msra.mxu0 %v1490_v13 }
 0x2d5   : > { %1423 = vmatprep.subr.bf16.mxu0 %v1501_v1  ;;  %v1244_v1 = vld [vmem:[%s1803_s10] ss:$0 sm:$0xff] }
 0x2d8   : > { %1424 = vmatpush3.bf16.msra.mxu0 %v1491_v14 }
 0x38e   : > { %v981_v16 = vpop.f32.mrb[4].mxu0 }
 0x38f   : > { %v982_v17 = vadd.f32 %v1235_v15, %v981_v16  ;;  %v1407_v18 = vpop.f32.mrb[5].mxu0 }
 0x390   : > { %v984_v19 = vpop.f32.mrb[6].mxu0 }
 0x391   : > { %v985_v20 = vadd.f32 %v1235_v15, %v984_v19  ;;  %v1408_v21 = vpop.f32.mrb[7].mxu0  ;;  %v988_v22 = vmax.f32 %v982_v17, 0.0 }
 0x393   : > { %v989_v23 = vmax.f32 %v985_v20, 0.0 }
 0x395   : > { %v990_v24 = vpack.c.bf16 %v989_v23, %v988_v22 }
 0x397   : > { %1426 = vmatmul.mubr.bf16.vlgmr.msra.gmra.mrb[8].mxu0 %v990_v24 }
 0x46a   : > { %v1096_v25 = vpop.f32.mrb[8].mxu0 }
 0x46b   : > { %v1427_v26 = vpop.f32.mrb[9].mxu0  ;;  %v1097_v28 = vadd.f32 %v1244_v1, %v1096_v25 }
 0x46c   : > { %v1099_v27 = vpop.f32.mrb[10].mxu0 }
 0x46d   : > { %v1100_v29 = vadd.f32 %v1244_v1, %v1099_v27  ;;  %v1428_v30 = vpop.f32.mrb[11].mxu0 }
 0x46f   : > { %v1266_v31 = vpack.c.bf16 %v1100_v29, %v1097_v28 }
 0x471   : > { %1267 = vst [vmem:[%s426_s16] sm:$0xff] %v1266_v31  }
 0x472 PF: > { %s21_s17 = sadd.s32 1, %s1499_s17  }
 0x473   : > { %p18_p4 = scmp.ge.s32.totalorder %s21_s17, 5  }
 0x475   :  { %20 = sbr.rel (!%p18_p4) target bundleno = 1 (0x1), region = 100 }

// kernel: rnn_gnn_forward.3
= control target key start
LH: loop header
LB: loop body
LE: loop exit
PB: predicated region body
PF: predicated region fallthrough
CT: control target
= control target key end

     0   :  { %19 = vsyncpa [#allocation5], 0  ;;  %s2382_s25 = smov 0   ;;  %s2855_s0 = inlined_call_operand.vmem [shape: bf16[3,16,128], index: 0, kind: input, shape index: {}]   ;;  %s2856_s1 = inlined_call_operand.vmem [shape: f32[2,16,128], index: 1, kind: input, shape index: {}]   ;;  %s2857_s2 = inlined_call_operand.vmem [shape: bf16[128,384], index: 2, kind: input, shape index: {}]   ;;  %s2858_s3 = inlined_call_operand.vmem [shape: bf16[128,384], index: 3, kind: input, shape index: {}]   ;;  %s2859_s4 = inlined_call_operand.vmem [shape: f32[1,384], index: 4, kind: input, shape index: {}]   ;;  %s2860_s5 = inlined_call_operand.vmem [shape: f32[1,384], index: 5, kind: input, shape index: {}]   ;;  %s2861_s6 = inlined_call_operand.vmem [shape: bf16[128,384], index: 6, kind: input, shape index: {}]   ;;  %s2862_s7 = inlined_call_operand.vmem [shape: bf16[128,384], index: 7, kind: input, shape index: {}]   ;;  %s2863_s8 = inlined_call_operand.vmem [shape: f32[1,384], index: 8, kind: input, shape index: {}]   ;;  %s2864_s9 = inlined_call_operand.vmem [shape: f32[1,384], index: 9, kind: input, shape index: {}]   ;;  %s2865_s10 = inlined_call_operand.vmem [shape: bf16[128,128], index: 10, kind: input, shape index: {}]   ;;  %s2866_s11 = inlined_call_operand.vmem [shape: f32[1,128], index: 11, kind: input, shape index: {}]   ;;  %s2867_s12 = inlined_call_operand.vmem [shape: f32[16,128], index: 12, kind: output, shape index: {0}]   ;;  %s2868_s13 = inlined_call_operand.hbm [shape: f32[16,128], index: 13, kind: output, shape index: {1}]  }
   0x1 LB: > { %s2388_s26 = sadd.s32 4294967295, %s2302_s25   ;;  %p1771_p0 = scmp.ge.s32.totalorder %s2302_s25, 1  ;;  %s2302_s25 = sphi %s2382_s25, %s25_s25  }
   0x2   : > { %p381_p1 = scmp.lt.s32.totalorder %s2302_s25, 4 }
   0x4   : > { %p382_p2 = pnand %p1771_p0, %p381_p1 }
   0x5   : > { %p420_p3 = scmp.lt.s32.totalorder (!%p382_p2), %s2388_s26, 2  ;;  %p1774_p4 = scmp.ne.s32.totalorder (!%p382_p2), %s2388_s26, 0 }
   0x6   : > { %385 = sbr.rel (%p382_p2) target bundleno = 921 (0x399), region = 68 }
   0xd   : > { %s421_s27 = scalar_select %p420_p3, %s2388_s26, 2 }
   0xe   : > { %429 = sbr.rel (%p1774_p4) target bundleno = 21 (0x15), region = 72  ;;  %v430_v0 = vld [vmem:[%s2856_s1] sm:$0xff] (!%p1774_p4)  ;;  %v431_v1 = vld [vmem:[%s2856_s1 + $0x8] sm:$0xff] (!%p1774_p4)  ;;  %v1775_v2 = vld [vmem:[%s2856_s1 + $0x10] sm:$0xff] (!%p1774_p4) }
   0xf   : > { %s1897_s28 = sshll.u32 %s421_s27, 3  ;;  %432 = vst [vmem:[#allocation2] sm:$0xff] (!%p1774_p4), %v430_v0  ;;  %433 = vst [vmem:[#allocation2 + $0x8] sm:$0xff] (!%p1774_p4), %v431_v1  ;;  %v1776_v3 = vld [vmem:[%s2856_s1 + $0x18] sm:$0xff] (!%p1774_p4) }
  0x10   : > { %s2397_s14 = scalar_lea.vmem %s2855_s0, %s1897_s28  ;;  %437 = vst [vmem:[#allocation3] sm:$0xff] (!%p1774_p4), %v1775_v2  ;;  %438 = vst [vmem:[#allocation3 + $0x8] sm:$0xff] (!%p1774_p4), %v1776_v3 }
  0x15 PF: > { %v2089_v4 = vld [vmem:[%s2857_s2 + $0x4] ss:$12 sps:$4 sm:$0xff]   ;;  %v2091_v5 = vld [vmem:[%s2857_s2] ss:$12 sps:$4 sm:$0xff]   ;;  %v2304_v6 = vmov 0.0   ;;  %v2305_v7 = vmov 0  }
  0x16   : > { %1943 = vmatprep.subr.bf16.mxu1 %v2304_v6  ;;  %658 = vmatprep.mubr.bf16.mxu0 %v2305_v7  ;;  %v2092_v8 = vld [vmem:[%s2857_s2 + $0x1c] ss:$12 sps:$4 sm:$0xff]   ;;  %vm2306_vm0 = vmmov 0   ;;  %v2094_v9 = vld [vmem:[%s2857_s2 + $0x18] ss:$12 sps:$4 sm:$0xff]  }
  0x17   : > { %626 = vmatprep.subr.bf16.mxu0 %v2089_v4  ;;  %1959 = vmatprep.mubr.msk.bf16.mxu1 %vm2306_vm0, %v2304_v6  ;;  %v2095_v10 = vld [vmem:[%s2857_s2 + $0x34] ss:$12 sps:$4 sm:$0xff]   ;;  %v2097_v11 = vld [vmem:[%s2857_s2 + $0x30] ss:$12 sps:$4 sm:$0xff]   ;;  %v2098_v12 = vld [vmem:[%s2857_s2 + $0x4c] ss:$12 sps:$4 sm:$0xff]  }
  0x18   : > { %627 = vmatpush1.bf16.msra.mxu0 %v2091_v5  ;;  %v2109_v13 = vld [vmem:[%s2857_s2 + $0x8] ss:$12 sps:$4 sm:$0xff]   ;;  %v2101_v15 = vld [vmem:[%s2857_s2 + $0x64] ss:$12 sps:$4 sm:$0xff]   ;;  %v2113_v16 = vld [vmem:[%s2857_s2 + $0x20] ss:$12 sps:$4 sm:$0xff]  }
  0x19   : > { %628 = vmatprep.subr.bf16.mxu0 %v2092_v8  ;;  %v2100_v14 = vld [vmem:[%s2857_s2 + $0x48] ss:$12 sps:$4 sm:$0xff]   ;;  %1944 = vmatpush3.bf16.msra.mxu1 %v2109_v13  ;;  %v2103_v17 = vld [vmem:[%s2857_s2 + $0x60] ss:$12 sps:$4 sm:$0xff]   ;;  %v2115_v18 = vld [vmem:[%s2857_s2 + $0x38] ss:$12 sps:$4 sm:$0xff]  }
  0x1a   : > { %1945 = vmatprep.subr.bf16.mxu1 %v2304_v6  ;;  %v2104_v19 = vld [vmem:[%s2857_s2 + $0x7c] ss:$12 sps:$4 sm:$0xff]   ;;  %v2106_v20 = vld [vmem:[%s2857_s2 + $0x78] ss:$12 sps:$4 sm:$0xff]   ;;  %v2107_v22 = vld [vmem:[%s2857_s2 + $0x94] ss:$12 sps:$4 sm:$0xff]  }
  0x1b   : > { %v2120_v21 = vld [vmem:[%s2857_s2 + $0x50] ss:$12 sps:$4 sm:$0xff]   ;;  %v2124_v24 = vld [vmem:[%s2857_s2 + $0x68] ss:$12 sps:$4 sm:$0xff]   ;;  %v2111_v25 = vld [vmem:[%s2857_s2 + $0xac] ss:$12 sps:$4 sm:$0xff]  }
  0x1c   : > { %629 = vmatpush1.bf16.msra.mxu0 %v2094_v9  ;;  %v2110_v23 = vld [vmem:[%s2857_s2 + $0x90] ss:$12 sps:$4 sm:$0xff]   ;;  %v2114_v26 = vld [vmem:[%s2857_s2 + $0xa8] ss:$12 sps:$4 sm:$0xff]   ;;  %v2128_v27 = vld [vmem:[%s2857_s2 + $0x80] ss:$12 sps:$4 sm:$0xff]  }
  0x1d   : > { %630 = vmatprep.subr.bf16.mxu0 %v2095_v10  ;;  %1946 = vmatpush3.bf16.msra.mxu1 %v2113_v16  ;;  %v2118_v28 = vld [vmem:[%s2858_s3 + $0x4] ss:$12 sps:$4 sm:$0xff]   ;;  %v2116_v29 = vld [vmem:[%s2858_s3] ss:$12 sps:$4 sm:$0xff]   ;;  %v2123_v32 = vld [vmem:[%s2858_s3 + $0x1c] ss:$12 sps:$4 sm:$0xff]  }
  0x1e   : > { %1947 = vmatprep.subr.bf16.mxu1 %v2304_v6  ;;  %v2119_v30 = vld [vmem:[%s2397_s14] sm:$0xff]   ;;  %v2136_v34 = vld [vmem:[%s2857_s2 + $0xb0] ss:$12 sps:$4 sm:$0xff]   ;;  %v2131_v37 = vld [vmem:[%s2858_s3 + $0x4c] ss:$12 sps:$4 sm:$0xff]  }
  0x1f   : > { %v2132_v31 = vld [vmem:[%s2857_s2 + $0x98] ss:$12 sps:$4 sm:$0xff]   ;;  %v2127_v35 = vld [vmem:[%s2858_s3 + $0x34] ss:$12 sps:$4 sm:$0xff]   ;;  %v2125_v36 = vld [vmem:[%s2858_s3 + $0x30] ss:$12 sps:$4 sm:$0xff]  }
  0x20   : > { %631 = vmatpush1.bf16.msra.mxu0 %v2097_v11  ;;  %v2121_v33 = vld [vmem:[%s2858_s3 + $0x18] ss:$12 sps:$4 sm:$0xff]   ;;  %v2143_v38 = vld [vmem:[%s2858_s3 + $0x8] ss:$12 sps:$4 sm:$0xff]   ;;  %v2147_v40 = vld [vmem:[%s2858_s3 + $0x20] ss:$12 sps:$4 sm:$0xff]  }
  0x21   : > { %632 = vmatprep.subr.bf16.mxu0 %v2098_v12  ;;  %1948 = vmatpush3.bf16.msra.mxu1 %v2115_v18  ;;  %v2129_v39 = vld [vmem:[%s2858_s3 + $0x48] ss:$12 sps:$4 sm:$0xff]   ;;  %v2135_v41 = vld [vmem:[%s2858_s3 + $0x64] ss:$12 sps:$4 sm:$0xff]   ;;  %v2133_v42 = vld [vmem:[%s2858_s3 + $0x60] ss:$12 sps:$4 sm:$0xff]  }
  0x22   : > { %1949 = vmatprep.subr.bf16.mxu1 %v2304_v6  ;;  %v2148_v43 = vld [vmem:[%s2858_s3 + $0x38] ss:$12 sps:$4 sm:$0xff]   ;;  %v2139_v44 = vld [vmem:[%s2858_s3 + $0x7c] ss:$12 sps:$4 sm:$0xff]   ;;  %v2142_v47 = vld [vmem:[%s2858_s3 + $0x94] ss:$12 sps:$4 sm:$0xff]  }
  0x23   : > { %v2137_v45 = vld [vmem:[%s2858_s3 + $0x78] ss:$12 sps:$4 sm:$0xff]   ;;  %v2149_v46 = vld [vmem:[%s2858_s3 + $0x50] ss:$12 sps:$4 sm:$0xff]   ;;  %v2150_v49 = vld [vmem:[%s2858_s3 + $0x68] ss:$12 sps:$4 sm:$0xff]  }
  0x24   : > { %633 = vmatpush1.bf16.msra.mxu0 %v2100_v14  ;;  %v2140_v48 = vld [vmem:[%s2858_s3 + $0x90] ss:$12 sps:$4 sm:$0xff]   ;;  %v2146_v50 = vld [vmem:[%s2858_s3 + $0xac] ss:$12 sps:$4 sm:$0xff]   ;;  %v2144_v51 = vld [vmem:[%s2858_s3 + $0xa8] ss:$12 sps:$4 sm:$0xff]  }
  0x25   : > { %634 = vmatprep.subr.bf16.mxu0 %v2101_v15  ;;  %1950 = vmatpush3.bf16.msra.mxu1 %v2120_v21  ;;  %v2569_v52 = vld [vmem:[#allocation2] sm:$0xff]  ;;  %v2571_v53 = vld [vmem:[#allocation2 + $0x8] sm:$0xff]  ;;  %v2153_v57 = vld [vmem:[%s2858_s3 + $0xb0] ss:$12 sps:$4 sm:$0xff]  }
  0x26   : > { %1951 = vmatprep.subr.bf16.mxu1 %v2304_v6  ;;  %v2151_v54 = vld [vmem:[%s2858_s3 + $0x80] ss:$12 sps:$4 sm:$0xff]   ;;  %v710_v55 = vpack.c.bf16 %v2571_v53, %v2569_v52  ;;  %v2152_v56 = vld [vmem:[%s2858_s3 + $0x98] ss:$12 sps:$4 sm:$0xff]   ;;  %v2157_v60 = vld [vmem:[%s2861_s6 + $0x8] ss:$12 sps:$4 sm:$0xff]  }
  0x27   : > { %v2156_v58 = vld [vmem:[%s2861_s6 + $0x4] ss:$12 sps:$4 sm:$0xff]   ;;  %v2154_v59 = vld [vmem:[%s2861_s6] ss:$12 sps:$4 sm:$0xff]   ;;  %v2160_v61 = vld [vmem:[%s2861_s6 + $0x1c] ss:$12 sps:$4 sm:$0xff]  }
  0x28   : > { %635 = vmatpush1.bf16.msra.mxu0 %v2103_v17  ;;  %v2158_v62 = vld [vmem:[%s2861_s6 + $0x18] ss:$12 sps:$4 sm:$0xff]   ;;  %v2161_v63 = vld [vmem:[%s2861_s6 + $0x20] ss:$12 sps:$4 sm:$0xff]   ;;  %v2162_v1 = vld [vmem:[%s2861_s6 + $0x30] ss:$12 sps:$4 sm:$0xff]  }
  0x29   : > { %636 = vmatprep.subr.bf16.mxu0 %v2104_v19  ;;  %1952 = vmatpush3.bf16.msra.mxu1 %v2124_v24  ;;  %v2164_v0 = vld [vmem:[%s2861_s6 + $0x34] ss:$12 sps:$4 sm:$0xff]   ;;  %v2165_v2 = vld [vmem:[%s2861_s6 + $0x38] ss:$12 sps:$4 sm:$0xff]   ;;  %v2169_v5 = vld [vmem:[%s2861_s6 + $0x50] ss:$12 sps:$4 sm:$0xff]  }
  0x2a   : > { %1953 = vmatprep.subr.bf16.mxu1 %v2304_v6  ;;  %v2168_v3 = vld [vmem:[%s2861_s6 + $0x4c] ss:$12 sps:$4 sm:$0xff]   ;;  %v2166_v4 = vld [vmem:[%s2861_s6 + $0x48] ss:$12 sps:$4 sm:$0xff]   ;;  %v2172_v8 = vld [vmem:[%s2861_s6 + $0x64] ss:$12 sps:$4 sm:$0xff]  }
  0x2b   : > { %v2170_v9 = vld [vmem:[%s2861_s6 + $0x60] ss:$12 sps:$4 sm:$0xff]   ;;  %v2173_v10 = vld [vmem:[%s2861_s6 + $0x68] ss:$12 sps:$4 sm:$0xff]   ;;  %v2174_v12 = vld [vmem:[%s2861_s6 + $0x78] ss:$12 sps:$4 sm:$0xff]  }
  0x2c   : > { %637 = vmatpush1.bf16.msra.mxu0 %v2106_v20  ;;  %v2176_v11 = vld [vmem:[%s2861_s6 + $0x7c] ss:$12 sps:$4 sm:$0xff]   ;;  %v2177_v13 = vld [vmem:[%s2861_s6 + $0x80] ss:$12 sps:$4 sm:$0xff]   ;;  %v2181_v16 = vld [vmem:[%s2861_s6 + $0x98] ss:$12 sps:$4 sm:$0xff]  }
  0x2d   : > { %638 = vmatprep.subr.bf16.mxu0 %v2107_v22  ;;  %1954 = vmatpush3.bf16.msra.mxu1 %v2128_v27  ;;  %v2180_v14 = vld [vmem:[%s2861_s6 + $0x94] ss:$12 sps:$4 sm:$0xff]   ;;  %v2178_v15 = vld [vmem:[%s2861_s6 + $0x90] ss:$12 sps:$4 sm:$0xff]   ;;  %v2184_v17 = vld [vmem:[%s2861_s6 + $0xac] ss:$12 sps:$4 sm:$0xff]  }
  0x2e   : > { %1955 = vmatprep.subr.bf16.mxu1 %v2304_v6  ;;  %v2182_v18 = vld [vmem:[%s2861_s6 + $0xa8] ss:$12 sps:$4 sm:$0xff]   ;;  %v2185_v19 = vld [vmem:[%s2861_s6 + $0xb0] ss:$12 sps:$4 sm:$0xff]  }
  0x2f   : > { %v2188_v20 = vld [vmem:[%s2862_s7 + $0x4] ss:$12 sps:$4 sm:$0xff]  }
  0x30   : > { %639 = vmatpush1.bf16.msra.mxu0 %v2110_v23 }
  0x31   : > { %640 = vmatprep.subr.bf16.mxu0 %v2111_v25  ;;  %1956 = vmatpush3.bf16.msra.mxu1 %v2132_v31  ;;  %v477_v25 = vlaneseq }
  0x32   : > { %1957 = vmatprep.subr.bf16.mxu1 %v2304_v6 }
  0x34   : > { %641 = vmatpush1.bf16.msra.mxu0 %v2114_v26  ;;  %v478_v26 = vshrl.u32 %v477_v25, 7 }
  0x35   : > { %888 = vmatprep.subr.bf16.mxu0 %v2118_v28  ;;  %1958 = vmatpush3.bf16.msra.mxu1 %v2136_v34  ;;  %v743_v28 = vld [vmem:[%s2860_s5] sm:$0x7] }
  0x36   : > { %1963 = vmatprep.subr.bf16.mxu1 %v2304_v6  ;;  %v2674_v27 = vsub.s32 0, %v478_v26 }
  0x37   : > { %659 = vmatmul.mubr.bf16.vlgmr.msra.gmra.mrb[0].mxu0 %v2119_v30 }
  0x38   : > { %889 = vmatpush1.bf16.msra.mxu0 %v2116_v29  ;;  %920 = vmatprep.mubr.bf16.mxu0 %v2305_v7  ;;  %v475_v29 = vld [vmem:[%s2859_s4] sm:$0x7] }
  0x39   : > { %890 = vmatprep.subr.bf16.mxu0 %v2123_v32  ;;  %1960 = vmatmul.mubr.bf16.vlgmr.msra.gmra.mrb[0].mxu1 %v2119_v30  ;;  %v2682_v30 = vsub.s32 1, %v478_v26  ;;  %v480_v31 = vrot.slane %v475_v29, %v2674_v27  ;;  %v748_v32 = vrot.slane %v743_v28, %v2674_v27 }
  0x3a   : > { %1964 = vmatpush3.bf16.msra.mxu1 %v2143_v38  ;;  %1979 = vmatprep.mubr.msk.bf16.mxu1 %vm2306_vm0, %v2304_v6 }
  0x3b   : > { %1965 = vmatprep.subr.bf16.mxu1 %v2304_v6  ;;  %v752_v34 = vrot.slane %v743_v28, %v2682_v30 }
  0x3c   : > { %891 = vmatpush1.bf16.msra.mxu0 %v2121_v33  ;;  %v484_v33 = vrot.slane %v475_v29, %v2682_v30 }
  0x3d   : > { %892 = vmatprep.subr.bf16.mxu0 %v2127_v35  ;;  %v2043_v35 = vadd.f32 %v748_v32, %v480_v31  ;;  %v2211_v31 = vld [vmem:[%s2862_s7 + $0x20] ss:$12 sps:$4 sm:$0xff]  }
  0x3e   : > { %1966 = vmatpush3.bf16.msra.mxu1 %v2147_v40  ;;  %v2194_v32 = vld [vmem:[%s2862_s7 + $0x34] ss:$12 sps:$4 sm:$0xff]  }
  0x3f   : > { %1967 = vmatprep.subr.bf16.mxu1 %v2304_v6 }
  0x40   : > { %893 = vmatpush1.bf16.msra.mxu0 %v2125_v36 }
  0x41   : > { %894 = vmatprep.subr.bf16.mxu0 %v2131_v37  ;;  %v2045_v37 = vadd.f32 %v752_v34, %v484_v33  ;;  %v2192_v33 = vld [vmem:[%s2862_s7 + $0x30] ss:$12 sps:$4 sm:$0xff]   ;;  %v2212_v34 = vld [vmem:[%s2862_s7 + $0x38] ss:$12 sps:$4 sm:$0xff]  }
  0x42   : > { %1968 = vmatpush3.bf16.msra.mxu1 %v2148_v43 }
  0x43   : > { %1969 = vmatprep.subr.bf16.mxu1 %v2304_v6 }
  0x44   : > { %895 = vmatpush1.bf16.msra.mxu0 %v2129_v39 }
  0x45   : > { %896 = vmatprep.subr.bf16.mxu0 %v2135_v41 }
  0x46   : > { %1970 = vmatpush3.bf16.msra.mxu1 %v2149_v46 }
  0x47   : > { %1971 = vmatprep.subr.bf16.mxu1 %v2304_v6 }
  0x48   : > { %897 = vmatpush1.bf16.msra.mxu0 %v2133_v42 }
  0x49   : > { %898 = vmatprep.subr.bf16.mxu0 %v2139_v44 }
  0x4a   : > { %1972 = vmatpush3.bf16.msra.mxu1 %v2150_v49 }
  0x4b   : > { %1973 = vmatprep.subr.bf16.mxu1 %v2304_v6 }
  0x4c   : > { %899 = vmatpush1.bf16.msra.mxu0 %v2137_v45 }
  0x4d   : > { %900 = vmatprep.subr.bf16.mxu0 %v2142_v47 }
  0x4e   : > { %1974 = vmatpush3.bf16.msra.mxu1 %v2151_v54 }
  0x4f   : > { %1975 = vmatprep.subr.bf16.mxu1 %v2304_v6 }
  0x50   : > { %901 = vmatpush1.bf16.msra.mxu0 %v2140_v48 }
  0x51   : > { %902 = vmatprep.subr.bf16.mxu0 %v2146_v50 }
  0x52   : > { %1976 = vmatpush3.bf16.msra.mxu1 %v2152_v56 }
  0x53   : > { %1977 = vmatprep.subr.bf16.mxu1 %v2304_v6 }
  0x54   : > { %903 = vmatpush1.bf16.msra.mxu0 %v2144_v51 }
  0x55   : > { %1196 = vmatprep.subr.bf16.mxu0 %v2156_v58 }
  0x56   : > { %1978 = vmatpush3.bf16.msra.mxu1 %v2153_v57 }
  0x57   : > { %921 = vmatmul.mubr.bf16.vlgmr.msra.gmra.mrb[0].mxu0 %v710_v55  ;;  %1983 = vmatprep.subr.bf16.mxu1 %v2304_v6 }
  0x58   : > { %1228 = vmatprep.mubr.bf16.mxu0 %v2305_v7  ;;  %1197 = vmatpush1.bf16.msra.mxu0 %v2154_v59  ;;  %v2688_v59 = vsub.s32 2, %v478_v26  ;;  %v2186_v26 = vld [vmem:[%s2862_s7] ss:$12 sps:$4 sm:$0xff]  }
  0x59   : > { %1980 = vmatmul.mubr.bf16.vlgmr.msra.gmra.mrb[4].mxu1 %v710_v55  ;;  %1198 = vmatprep.subr.bf16.mxu0 %v2160_v61 }
  0x5a   : > { %1999 = vmatprep.mubr.msk.bf16.mxu1 %vm2306_vm0, %v2304_v6  ;;  %1984 = vmatpush3.bf16.msra.mxu1 %v2157_v60  ;;  %v756_v60 = vrot.slane %v743_v28, %v2688_v59  ;;  %v2207_v28 = vld [vmem:[%s2862_s7 + $0x8] ss:$12 sps:$4 sm:$0xff]  }
  0x5b   : > { %1985 = vmatprep.subr.bf16.mxu1 %v2304_v6 }
  0x5c   : > { %1199 = vmatpush1.bf16.msra.mxu0 %v2158_v62 }
  0x5d   : > { %1200 = vmatprep.subr.bf16.mxu0 %v2164_v0 }
  0x5e   : > { %1986 = vmatpush3.bf16.msra.mxu1 %v2161_v63  ;;  %v488_v63 = vrot.slane %v475_v29, %v2688_v59 }
  0x5f   : > { %1987 = vmatprep.subr.bf16.mxu1 %v2304_v6 }
  0x60   : > { %1201 = vmatpush1.bf16.msra.mxu0 %v2162_v1 }
  0x61   : > { %1202 = vmatprep.subr.bf16.mxu0 %v2168_v3 }
  0x62   : > { %1988 = vmatpush3.bf16.msra.mxu1 %v2165_v2 }
  0x63   : > { %1989 = vmatprep.subr.bf16.mxu1 %v2304_v6 }
  0x64   : > { %1203 = vmatpush1.bf16.msra.mxu0 %v2166_v4 }
  0x65   : > { %1204 = vmatprep.subr.bf16.mxu0 %v2172_v8 }
  0x66   : > { %1990 = vmatpush3.bf16.msra.mxu1 %v2169_v5 }
  0x67   : > { %1991 = vmatprep.subr.bf16.mxu1 %v2304_v6 }
  0x68   : > { %1205 = vmatpush1.bf16.msra.mxu0 %v2170_v9 }
  0x69   : > { %1206 = vmatprep.subr.bf16.mxu0 %v2176_v11 }
  0x6a   : > { %1992 = vmatpush3.bf16.msra.mxu1 %v2173_v10 }
  0x6b   : > { %1993 = vmatprep.subr.bf16.mxu1 %v2304_v6 }
  0x6c   : > { %1207 = vmatpush1.bf16.msra.mxu0 %v2174_v12 }
  0x6d   : > { %1208 = vmatprep.subr.bf16.mxu0 %v2180_v14 }
  0x6e   : > { %1994 = vmatpush3.bf16.msra.mxu1 %v2177_v13 }
  0x6f   : > { %1995 = vmatprep.subr.bf16.mxu1 %v2304_v6 }
  0x70   : > { %1209 = vmatpush1.bf16.msra.mxu0 %v2178_v15 }
  0x71   : > { %1210 = vmatprep.subr.bf16.mxu0 %v2184_v17 }
  0x72   : > { %1996 = vmatpush3.bf16.msra.mxu1 %v2181_v16 }
  0x73   : > { %1997 = vmatprep.subr.bf16.mxu1 %v2304_v6 }
  0x74   : > { %1211 = vmatpush1.bf16.msra.mxu0 %v2182_v18 }
  0x75   : > { %1458 = vmatprep.subr.bf16.mxu0 %v2188_v20 }
  0x76   : > { %1998 = vmatpush3.bf16.msra.mxu1 %v2185_v19 }
  0x77   : > { %2003 = vmatprep.subr.bf16.mxu1 %v2304_v6 }
 0x10c   : > { %v703_v21 = vpop.f32.mrb[0].mxu1 }
 0x10d   : > { %v1961_v22 = vpop.f32.mrb[1].mxu1  ;;  %v704_v4 = vadd.f32 %v703_v21, %v488_v63 }
 0x10e   : > { %v706_v23 = vpop.f32.mrb[2].mxu1 }
 0x10f   : > { %v1962_v24 = vpop.f32.mrb[3].mxu1  ;;  %v707_v10 = vadd.f32 %v706_v23, %v488_v63 }
 0x12a   : > { %v922_v36 = vpop.f32.mrb[0].mxu0 }
 0x12b   : > { %v2044_v38 = vadd.f32 %v2043_v35, %v922_v36  ;;  %v924_v39 = vpop.f32.mrb[1].mxu0  ;;  %v2213_v36 = vld [vmem:[%s2862_s7 + $0x50] ss:$12 sps:$4 sm:$0xff]  }
 0x12c   : > { %v926_v40 = vpop.f32.mrb[2].mxu0  ;;  %v2046_v44 = vadd.f32 %v2045_v37, %v924_v39  ;;  %v965_v48 = vpop.f32.mrb[4].mxu1  ;;  %v2214_v39 = vld [vmem:[%s2862_s7 + $0x68] ss:$12 sps:$4 sm:$0xff]  }
 0x12d   : > { %v1826_v41 = vmul.f32 -1.442695, %v2044_v38  ;;  %v2048_v42 = vadd.f32 %v2043_v35, %v926_v40  ;;  %v928_v43 = vpop.f32.mrb[3].mxu0  ;;  %v1981_v49 = vpop.f32.mrb[5].mxu1  ;;  %v966_v1 = vadd.f32 %v965_v48, %v756_v60  ;;  %v2197_v35 = vld [vmem:[%s2862_s7 + $0x4c] ss:$12 sps:$4 sm:$0xff]  }
 0x12e   : > { %v2050_v46 = vadd.f32 %v2045_v37, %v928_v43  ;;  %v1828_v47 = vmul.f32 -1.442695, %v2046_v44  ;;  %v968_v51 = vpop.f32.mrb[6].mxu1  ;;  %v2200_v37 = vld [vmem:[%s2862_s7 + $0x64] ss:$12 sps:$4 sm:$0xff]   ;;  %v2771_v49 = vld [vmem:[#allocation3 + $0x8] sm:$0xff] }
 0x12f   : > { %2218 = vpow2.f32 %v1826_v41  ;;  %v1827_v45 = vmul.f32 -1.442695, %v2048_v42  ;;  %v1982_v54 = vpop.f32.mrb[7].mxu1  ;;  %v969_v8 = vadd.f32 %v968_v51, %v756_v60  ;;  %v2198_v38 = vld [vmem:[%s2862_s7 + $0x60] ss:$12 sps:$4 sm:$0xff]   ;;  %v2769_v48 = vld [vmem:[#allocation3] sm:$0xff] }
 0x130   : > { %v1829_v50 = vmul.f32 -1.442695, %v2050_v46  ;;  %v2203_v40 = vld [vmem:[%s2862_s7 + $0x7c] ss:$12 sps:$4 sm:$0xff]   ;;  %v2201_v41 = vld [vmem:[%s2862_s7 + $0x78] ss:$12 sps:$4 sm:$0xff]   ;;  %v1280_v51 = vpack.c.bf16 %v2771_v49, %v2769_v48 }
 0x131   : > { %2220 = vpow2.f32 %v1827_v45  ;;  %v2215_v42 = vld [vmem:[%s2862_s7 + $0x80] ss:$12 sps:$4 sm:$0xff]   ;;  %v2204_v44 = vld [vmem:[%s2862_s7 + $0x90] ss:$12 sps:$4 sm:$0xff]   ;;  %v2216_v45 = vld [vmem:[%s2862_s7 + $0x98] ss:$12 sps:$4 sm:$0xff]  }
 0x132   : > { %2222 = vpow2.f32 %v1828_v47  ;;  %v2206_v43 = vld [vmem:[%s2862_s7 + $0x94] ss:$12 sps:$4 sm:$0xff]   ;;  %v2210_v46 = vld [vmem:[%s2862_s7 + $0xac] ss:$12 sps:$4 sm:$0xff]  }
 0x133   : > { %2224 = vpow2.f32 %v1829_v50  ;;  %v2208_v47 = vld [vmem:[%s2862_s7 + $0xa8] ss:$12 sps:$4 sm:$0xff]   ;;  %v2217_v50 = vld [vmem:[%s2862_s7 + $0xb0] ss:$12 sps:$4 sm:$0xff]   ;;  %v1051_v60 = vld [vmem:[%s2863_s8] sm:$0x7] }
 0x139   : > { %v2219_v55 = vpop.eup %2218 }
 0x13a   : > { %v980_v56 = vadd.f32 1.0, %v2219_v55 }
 0x13b   : > { %v2221_v57 = vpop.eup %2220 }
 0x13c   : > { %2226 = vrcp.f32 %v980_v56  ;;  %v981_v58 = vadd.f32 1.0, %v2221_v57  ;;  %v2223_v61 = vpop.eup %2222 }
 0x13d   : > { %v2225_v62 = vpop.eup %2224  ;;  %v994_v0 = vadd.f32 1.0, %v2223_v61 }
 0x13e   : > { %2228 = vrcp.f32 %v981_v58  ;;  %v995_v2 = vadd.f32 1.0, %v2225_v62  ;;  %v1313_v58 = vld [vmem:[%s2864_s9] sm:$0x7]  ;;  %v1060_v62 = vrot.slane %v1051_v60, %v2682_v30 }
 0x13f   : > { %2230 = vrcp.f32 %v994_v0  ;;  %v1318_v61 = vrot.slane %v1313_v58, %v2674_v27  ;;  %v1322_v63 = vrot.slane %v1313_v58, %v2682_v30 }
 0x140   : > { %2232 = vrcp.f32 %v995_v2 }
 0x141   : > { %v2053_v2 = vadd.f32 %v1322_v63, %v1060_v62 }
 0x146   : > { %v2227_v3 = vpop.eup %2226 }
 0x147   : > { %v1000_v5 = vmul.f32 %v2227_v3, %v966_v1 }
 0x148   : > { %v2229_v9 = vpop.eup %2228 }
 0x149   : > { %v1002_v11 = vadd.f32 %v1000_v5, %v704_v4  ;;  %v1001_v12 = vmul.f32 %v2229_v9, %v969_v8  ;;  %v2231_v14 = vpop.eup %2230 }
 0x14a   : > { %v2233_v15 = vpop.eup %2232  ;;  %v1006_v16 = vsub.f32 1.0, %v2231_v14  ;;  %v1010_v20 = vmul.f32 %v2231_v14, %v2569_v52  ;;  %v2191_v52 = vld [vmem:[%s2862_s7 + $0x1c] ss:$12 sps:$4 sm:$0xff]  }
 0x14b   : > { %2234 = vtanh.f32 %v1002_v11  ;;  %v1003_v13 = vadd.f32 %v1001_v12, %v707_v10  ;;  %v1007_v18 = vsub.f32 1.0, %v2233_v15  ;;  %v1011_v24 = vmul.f32 %v2233_v15, %v2571_v53  ;;  %v2189_v53 = vld [vmem:[%s2862_s7 + $0x18] ss:$12 sps:$4 sm:$0xff]  }
 0x14d   : > { %2236 = vtanh.f32 %v1003_v13 }
 0x155   : > { %v2235_v17 = vpop.eup %2234 }
 0x156   : > { %v1008_v19 = vmul.f32 %v2235_v17, %v1006_v16 }
 0x157   : > { %v2237_v21 = vpop.eup %2236 }
 0x158   : > { %v1009_v22 = vmul.f32 %v2237_v21, %v1007_v18  ;;  %v1012_v25 = vadd.f32 %v1010_v20, %v1008_v19 }
 0x15a   : > { %v1013_v23 = vadd.f32 %v1011_v24, %v1009_v22  ;;  %1014 = vst [vmem:[#allocation2] sm:$0xff] %v1012_v25  ;;  %v1326_v22 = vrot.slane %v1313_v58, %v2688_v59 }
 0x15c   : > { %1015 = vst [vmem:[#allocation2 + $0x8] sm:$0xff] %v1013_v23  ;;  %v1016_v29 = vpack.c.bf16 %v1013_v23, %v1012_v25  ;;  %v1064_v23 = vrot.slane %v1051_v60, %v2688_v59 }
 0x15e   : > { %1229 = vmatmul.mubr.bf16.vlgmr.msra.gmra.mrb[4].mxu0 %v1016_v29  ;;  %2000 = vmatmul.mubr.bf16.vlgmr.msra.gmra.mrb[8].mxu1 %v1016_v29 }
 0x15f   : > { %1459 = vmatpush1.bf16.msra.mxu0 %v2186_v26  ;;  %2004 = vmatpush3.bf16.msra.mxu1 %v2207_v28 }
 0x160   : > { %1460 = vmatprep.subr.bf16.mxu0 %v2191_v52  ;;  %2005 = vmatprep.subr.bf16.mxu1 %v2304_v6 }
 0x161   : > { %1490 = vmatprep.mubr.bf16.mxu0 %v2305_v7  ;;  %2019 = vmatprep.mubr.msk.bf16.mxu1 %vm2306_vm0, %v2304_v6  ;;  %v2195_v7 = vld [vmem:[%s2862_s7 + $0x48] ss:$12 sps:$4 sm:$0xff]  }
 0x163   : > { %1461 = vmatpush1.bf16.msra.mxu0 %v2189_v53  ;;  %2006 = vmatpush3.bf16.msra.mxu1 %v2211_v31 }
 0x164   : > { %1462 = vmatprep.subr.bf16.mxu0 %v2194_v32  ;;  %2007 = vmatprep.subr.bf16.mxu1 %v2304_v6 }
 0x167   : > { %1463 = vmatpush1.bf16.msra.mxu0 %v2192_v33  ;;  %2008 = vmatpush3.bf16.msra.mxu1 %v2212_v34 }
 0x168   : > { %1464 = vmatprep.subr.bf16.mxu0 %v2197_v35  ;;  %2009 = vmatprep.subr.bf16.mxu1 %v2304_v6 }
 0x16b   : > { %1465 = vmatpush1.bf16.msra.mxu0 %v2195_v7  ;;  %2010 = vmatpush3.bf16.msra.mxu1 %v2213_v36 }
 0x16c   : > { %1466 = vmatprep.subr.bf16.mxu0 %v2200_v37  ;;  %2011 = vmatprep.subr.bf16.mxu1 %v2304_v6 }
 0x16f   : > { %1467 = vmatpush1.bf16.msra.mxu0 %v2198_v38  ;;  %2012 = vmatpush3.bf16.msra.mxu1 %v2214_v39 }
 0x170   : > { %1468 = vmatprep.subr.bf16.mxu0 %v2203_v40  ;;  %2013 = vmatprep.subr.bf16.mxu1 %v2304_v6 }
 0x173   : > { %1469 = vmatpush1.bf16.msra.mxu0 %v2201_v41  ;;  %2014 = vmatpush3.bf16.msra.mxu1 %v2215_v42 }
 0x174   : > { %1470 = vmatprep.subr.bf16.mxu0 %v2206_v43  ;;  %2015 = vmatprep.subr.bf16.mxu1 %v2304_v6 }
 0x177   : > { %1471 = vmatpush1.bf16.msra.mxu0 %v2204_v44  ;;  %2016 = vmatpush3.bf16.msra.mxu1 %v2216_v45 }
 0x178   : > { %1472 = vmatprep.subr.bf16.mxu0 %v2210_v46  ;;  %2017 = vmatprep.subr.bf16.mxu1 %v2304_v6  ;;  %v1056_v6 = vrot.slane %v1051_v60, %v2674_v27 }
 0x17a   : > { %v2051_v0 = vadd.f32 %v1318_v61, %v1056_v6 }
 0x17b   : > { %1473 = vmatpush1.bf16.msra.mxu0 %v2208_v47  ;;  %2018 = vmatpush3.bf16.msra.mxu1 %v2217_v50  ;;  %v1589_v50 = vld [vmem:[#allocation2] sm:$0xff] (!%p1774_p4) }
 0x17c   : > { %1591 = vst [vmem:[#allocation4] sm:$0xff] (!%p1774_p4), %v1589_v50 }
 0x17e   : > { %1491 = vmatmul.mubr.bf16.vlgmr.msra.gmra.mrb[4].mxu0 %v1280_v51  ;;  %2020 = vmatmul.mubr.bf16.vlgmr.msra.gmra.mrb[12].mxu1 %v1280_v51  ;;  %v1590_v51 = vld [vmem:[#allocation2 + $0x8] sm:$0xff] (!%p1774_p4) }
 0x17f   : > { %1592 = vst [vmem:[#allocation4 + $0x8] sm:$0xff] (!%p1774_p4), %v1590_v51 }
 0x231   : > { %v1273_v54 = vpop.f32.mrb[8].mxu1 }
 0x232   : > { %v2001_v55 = vpop.f32.mrb[9].mxu1  ;;  %v1274_v53 = vadd.f32 %v1273_v54, %v1064_v23 }
 0x233   : > { %v1276_v56 = vpop.f32.mrb[10].mxu1 }
 0x234   : > { %v2002_v57 = vpop.f32.mrb[11].mxu1  ;;  %v1277_v34 = vadd.f32 %v1276_v56, %v1064_v23 }
 0x251   : > { %v1492_v1 = vpop.f32.mrb[4].mxu0  ;;  %v1535_v3 = vpop.f32.mrb[12].mxu1 }
 0x252   : > { %v2052_v4 = vadd.f32 %v2051_v0, %v1492_v1  ;;  %v1494_v5 = vpop.f32.mrb[5].mxu0  ;;  %v2021_v8 = vpop.f32.mrb[13].mxu1  ;;  %v1536_v28 = vadd.f32 %v1535_v3, %v1326_v22 }
 0x253   : > { %v1496_v9 = vpop.f32.mrb[6].mxu0  ;;  %v1538_v10 = vpop.f32.mrb[14].mxu1  ;;  %v2054_v15 = vadd.f32 %v2053_v2, %v1494_v5 }
 0x254   : > { %v1878_v11 = vmul.f32 -1.442695, %v2052_v4  ;;  %v2056_v12 = vadd.f32 %v2051_v0, %v1496_v9  ;;  %v1498_v13 = vpop.f32.mrb[7].mxu0  ;;  %v2022_v14 = vpop.f32.mrb[15].mxu1  ;;  %v1539_v32 = vadd.f32 %v1538_v10, %v1326_v22 }
 0x255   : > { %v2058_v16 = vadd.f32 %v2053_v2, %v1498_v13  ;;  %v1880_v17 = vmul.f32 -1.442695, %v2054_v15 }
 0x256   : > { %2238 = vpow2.f32 %v1878_v11  ;;  %v1879_v27 = vmul.f32 -1.442695, %v2056_v12 }
 0x257   : > { %v1881_v30 = vmul.f32 -1.442695, %v2058_v16 }
 0x258   : > { %2240 = vpow2.f32 %v1879_v27 }
 0x259   : > { %2242 = vpow2.f32 %v1880_v17 }
 0x25a   : > { %2244 = vpow2.f32 %v1881_v30 }
 0x260   : > { %v2239_v18 = vpop.eup %2238 }
 0x261   : > { %v1550_v19 = vadd.f32 1.0, %v2239_v18 }
 0x262   : > { %v2241_v20 = vpop.eup %2240 }
 0x263   : > { %2246 = vrcp.f32 %v1550_v19  ;;  %v1551_v21 = vadd.f32 1.0, %v2241_v20  ;;  %v2243_v24 = vpop.eup %2242 }
 0x264   : > { %v2245_v25 = vpop.eup %2244  ;;  %v1564_v26 = vadd.f32 1.0, %v2243_v24 }
 0x265   : > { %2248 = vrcp.f32 %v1551_v21  ;;  %v1565_v29 = vadd.f32 1.0, %v2245_v25 }
 0x266   : > { %2250 = vrcp.f32 %v1564_v26 }
 0x267   : > { %2252 = vrcp.f32 %v1565_v29 }
 0x26d   : > { %v2247_v52 = vpop.eup %2246 }
 0x26e   : > { %v1570_v31 = vmul.f32 %v2247_v52, %v1536_v28 }
 0x26f   : > { %v2249_v33 = vpop.eup %2248 }
 0x270   : > { %v1572_v35 = vadd.f32 %v1570_v31, %v1274_v53  ;;  %v1571_v7 = vmul.f32 %v2249_v33, %v1539_v32  ;;  %v2251_v37 = vpop.eup %2250 }
 0x271   : > { %v2253_v38 = vpop.eup %2252  ;;  %v1576_v39 = vsub.f32 1.0, %v2251_v37  ;;  %v1580_v40 = vmul.f32 %v2251_v37, %v2769_v48 }
 0x272   : > { %2254 = vtanh.f32 %v1572_v35  ;;  %v1573_v36 = vadd.f32 %v1571_v7, %v1277_v34  ;;  %v1577_v41 = vsub.f32 1.0, %v2253_v38  ;;  %v1581_v44 = vmul.f32 %v2253_v38, %v2771_v49 }
 0x274   : > { %2256 = vtanh.f32 %v1573_v36 }
 0x27c   : > { %v2255_v59 = vpop.eup %2254 }
 0x27d   : > { %v1578_v42 = vmul.f32 %v2255_v59, %v1576_v39  ;;  %1588 = sbr.rel (%p1774_p4) target bundleno = 644 (0x284), region = 76 }
 0x27e   : > { %v2257_v43 = vpop.eup %2256 }
 0x27f   : > { %v1582_v45 = vadd.f32 %v1580_v40, %v1578_v42  ;;  %v1579_v46 = vmul.f32 %v2257_v43, %v1577_v41 }
 0x281   : > { %1584 = vst [vmem:[#allocation3] sm:$0xff] %v1582_v45  ;;  %v1583_v47 = vadd.f32 %v1581_v44, %v1579_v46 }
 0x283   : > { %1585 = vst [vmem:[#allocation3 + $0x8] sm:$0xff] %v1583_v47 }
 0x284 PF: > { %p1883_p5 = scmp.ne.s32.totalorder %s2388_s26, 2 }
 0x285   : > { %v2258_v48 = vld [vmem:[%s2865_s10] sm:$0xff] (!%p1883_p5)   ;;  %v2307_v49 = vmov (!%p1883_p5), 0.0   ;;  %v2259_v54 = vld [vmem:[%s2865_s10 + $0x8] sm:$0xff] (!%p1883_p5)   ;;  %vm2308_vm1 = vmmov (!%p1883_p5), 0   ;;  %v2260_v55 = vld [vmem:[%s2865_s10 + $0x10] sm:$0xff] (!%p1883_p5)  }
 0x286   : > { %1596 = sbr.rel (%p1883_p5) target bundleno = 895 (0x37f), region = 80  ;;  %2023 = vmatprep.subr.bf16.mxu0 (!%p1883_p5), %v2307_v49  ;;  %2039 = vmatprep.mubr.msk.bf16.mxu0 (!%p1883_p5), %vm2308_vm1, %v2307_v49  ;;  %v2261_v56 = vld [vmem:[%s2865_s10 + $0x18] sm:$0xff] (!%p1883_p5)   ;;  %v2262_v57 = vld [vmem:[%s2865_s10 + $0x20] sm:$0xff] (!%p1883_p5)   ;;  %v2263_v58 = vld [vmem:[%s2865_s10 + $0x28] sm:$0xff] (!%p1883_p5)  }
 0x287   : > { %2024 = vmatpush3.bf16.msra.mxu0 (!%p1883_p5), %v2258_v48  ;;  %v2264_v60 = vld [vmem:[%s2865_s10 + $0x30] sm:$0xff] (!%p1883_p5)   ;;  %v2265_v6 = vld [vmem:[%s2865_s10 + $0x38] sm:$0xff] (!%p1883_p5)   ;;  %v1884_v0 = vld [vmem:[%s2866_s11] ss:$0 sm:$0xff] (!%p1883_p5) }
 0x288   : > { %2025 = vmatprep.subr.bf16.mxu0 (!%p1883_p5), %v2307_v49  ;;  %v1597_v61 = vld [vmem:[#allocation3] sm:$0xff] (!%p1883_p5) }
 0x28a   : > { %v1598_v62 = vld [vmem:[#allocation3 + $0x8] sm:$0xff] (!%p1883_p5) }
 0x28b   : > { %2026 = vmatpush3.bf16.msra.mxu0 (!%p1883_p5), %v2259_v54  ;;  %v1599_v63 = vpack.c.bf16 (!%p1883_p5), %v1598_v62, %v1597_v61 }
 0x28c   : > { %2027 = vmatprep.subr.bf16.mxu0 (!%p1883_p5), %v2307_v49 }
 0x28f   : > { %2028 = vmatpush3.bf16.msra.mxu0 %v2260_v55 }
 0x290   : > { %2029 = vmatprep.subr.bf16.mxu0 %v2307_v49 }
 0x293   : > { %2030 = vmatpush3.bf16.msra.mxu0 %v2261_v56 }
 0x294   : > { %2031 = vmatprep.subr.bf16.mxu0 %v2307_v49 }
 0x297   : > { %2032 = vmatpush3.bf16.msra.mxu0 %v2262_v57 }
 0x298   : > { %2033 = vmatprep.subr.bf16.mxu0 %v2307_v49 }
 0x29b   : > { %2034 = vmatpush3.bf16.msra.mxu0 %v2263_v58 }
 0x29c   : > { %2035 = vmatprep.subr.bf16.mxu0 %v2307_v49 }
 0x29f   : > { %2036 = vmatpush3.bf16.msra.mxu0 %v2264_v60 }
 0x2a0   : > { %2037 = vmatprep.subr.bf16.mxu0 %v2307_v49 }
 0x2a3   : > { %2038 = vmatpush3.bf16.msra.mxu0 %v2265_v6 }
 0x2a6   : > { %2040 = vmatmul.mubr.bf16.vlgmr.msra.gmra.mrb[0].mxu0 %v1599_v63 }
 0x379   : > { %v1705_v1 = vpop.f32.mrb[0].mxu0 }
 0x37a   : > { %v1706_v2 = vadd.f32 %v1884_v0, %v1705_v1  ;;  %v2041_v3 = vpop.f32.mrb[1].mxu0 }
 0x37b   : > { %v1708_v4 = vpop.f32.mrb[2].mxu0 }
 0x37c   : > { %1712 = vst [vmem:[%s2867_s12] sm:$0xff] %v1706_v2  ;;  %v1709_v5 = vadd.f32 %v1884_v0, %v1708_v4  ;;  %v2042_v8 = vpop.f32.mrb[3].mxu0 }
 0x37e   : > { %1713 = vst [vmem:[%s2867_s12 + $0x8] sm:$0xff] %v1709_v5 }
 0x37f PF: > { %p2071_p6 = scmp.eq.s32.totalorder %s2388_s26, 2  ;;  %s2309_s23 = smov [#allocation4]  }
 0x380   : > { %s1723_s24 = sshll.u32 %s2309_s23, 4  ;;  %s1724_s24 = int_to_ptr.vmem [resolvable:$true] %s1723_s24 }
 0x381   : > { %s2266_s27 = scalar_lea.vmem %s1724_s24, 256  ;;  %p2273_p10 = scmp.lt.s32.totalorder %s1724_s24, %s1724_s24 }
 0x382   : > { %p2267_p7 = scmp.ne.s32.totalorder %s1724_s24, %s2266_s27  ;;  %p2274_p11 = scmp.lt.s32.totalorder %s2266_s27, %s2266_s27 }
 0x384   : > { %p2268_p8 = pnand %p2267_p7, %p2071_p6  ;;  %p2275_p12 = por %p2274_p11, %p2273_p10 }
 0x386   : > { %p2269_p9 = pneg %p2268_p8 }
 0x388   : > { %p2276_p13 = pnand %p2275_p12, %p2269_p9 }
 0x38a   : > { %2279 = shalt.err (!%p2276_p13)
}
 0x38b   : > { %s2280_s30 = scalar_lea.hbm %s2868_s13, 256 }
 0x38c   : > { %p2281_p0 = scmp.ne.s32.totalorder %s2868_s13, %s2280_s30  ;;  %p2286_p3 = scmp.lt.u32.totalorder %s2280_s30, %s2868_s13 }
 0x38e   : > { %p2282_p1 = pnand %p2281_p0, %p2071_p6 }
 0x390   : > { %p2283_p2 = pneg %p2282_p1 }
 0x392   : > { %p2288_p4 = pnand %p2286_p3, %p2283_p2 }
 0x394   : > { %2291 = shalt.err (!%p2288_p4)
}
 0x395   : > { %s2310_s19 = smov 128   ;;  %s2311_s20 = smov 8  }
 0x396   : > { %2068 = dma.vmem_to_hbm [thread:$0]  (%p2071_p6), %s1724_s24, 256, %s2868_s13, [#allocation5], %s2310_s19, %s2310_s19, %s2311_s20  }
 0x397   : > { %2297 = dma.done.wait (%p2071_p6), [#allocation5], 256  }
 0x398   : > { %2299 = vsyncadd (%p2071_p6), [#allocation5], 4294967040 }
 0x399 PF: > { %s25_s25 = sadd.s32 1, %s2302_s25  }
 0x39a   : > { %p22_p5 = scmp.ge.s32.totalorder %s25_s25, 5  }
 0x39c   :  { %24 = sbr.rel (!%p22_p5) target bundleno = 1 (0x1), region = 116 }
 0x3a3   :  { %1742 = vsyncpa [#allocation5], 1 }
 0x3a4   :  { %1744 = vsyncpa [#allocation5 + $0x1], 1 }

</bundles_post_ra>
